<compile_context>
chip_gen: v6e
topology: v6e:2x2x1
jax: 0.10.0
libtpu: 0.0.40
codegen_flags: <defaults>
</compile_context>

<pallas_src>
import functools

import numpy as np
import jax
import jax.numpy as jnp
from jax.experimental import pallas as pl
from jax.experimental.pallas import tpu as pltpu

LN_EPS = 1e-5                    # torch.nn.LayerNorm default
ROW_TILE = 512                   # rows per grid step for row-wise kernels
VMEM_LIMIT = 48 * 1024 * 1024    # explicit scoped-VMEM budget (headroom on v7x's 64 MiB)


def _compiler_params(dims):
    return pltpu.CompilerParams(dimension_semantics=dims,
                                vmem_limit_bytes=VMEM_LIMIT)


def _row_tile(R, target=ROW_TILE):
    # Full-array block for small R (satisfies the (8,128) full-dim exception),
    # 512-row tiles (multiple of 8) otherwise; ragged tail handled by Pallas padding.
    return R if R <= target else target


# ----------------------------------------------------------------------------
# Fused row-wise Pallas kernels (LayerNorm / matmul / residual / feed-forward)
# ----------------------------------------------------------------------------
def _ln_matmul_kernel(x_ref, g_ref, b_ref, w_ref, bias_ref, o_ref):
    """o = LayerNorm(x) @ W + bias   (W in bf16, f32 accumulation)."""
    x = x_ref[...]
    mu = jnp.mean(x, axis=-1, keepdims=True)
    xc = x - mu
    var = jnp.mean(xc * xc, axis=-1, keepdims=True)
    xn = xc * jax.lax.rsqrt(var + LN_EPS) * g_ref[...] + b_ref[...]
    y = jnp.dot(xn.astype(jnp.bfloat16), w_ref[...],
                preferred_element_type=jnp.float32)
    o_ref[...] = (y + bias_ref[...]).astype(o_ref.dtype)


def ln_matmul(x2d, gamma, beta, W, bias, *, out_dtype=jnp.float32):
    R, K = x2d.shape
    M = W.shape[1]
    TM = _row_tile(R)
    return pl.pallas_call(
        _ln_matmul_kernel,
        out_shape=jax.ShapeDtypeStruct((R, M), out_dtype),
        grid=(pl.cdiv(R, TM),),
        in_specs=[pl.BlockSpec((TM, K), lambda i: (i, 0)),
                  pl.BlockSpec((1, K), lambda i: (0, 0)),
                  pl.BlockSpec((1, K), lambda i: (0, 0)),
                  pl.BlockSpec((K, M), lambda i: (0, 0)),
                  pl.BlockSpec((1, M), lambda i: (0, 0))],
        out_specs=pl.BlockSpec((TM, M), lambda i: (i, 0)),
        compiler_params=_compiler_params(("parallel",)),
    )(x2d, gamma.reshape(1, K), beta.reshape(1, K),
      W.astype(jnp.bfloat16), bias.reshape(1, M).astype(jnp.float32))


def _pair_proj_kernel(pair_ref, rbf_ref, g_ref, b_ref, wp_ref, wr_ref, pb_ref,
                      o_ref):
    """LayerNorm(pair); cat(pair_n, rbf) @ W + b as a split matmul (W = [Wp; Wr])."""
    x = pair_ref[...]
    mu = jnp.mean(x, axis=-1, keepdims=True)
    xc = x - mu
    var = jnp.mean(xc * xc, axis=-1, keepdims=True)
    xn = xc * jax.lax.rsqrt(var + LN_EPS) * g_ref[...] + b_ref[...]
    y = jnp.dot(xn.astype(jnp.bfloat16), wp_ref[...],
                preferred_element_type=jnp.float32)
    y = y + jnp.dot(rbf_ref[...].astype(jnp.bfloat16), wr_ref[...],
                    preferred_element_type=jnp.float32)
    o_ref[...] = (y + pb_ref[...]).astype(o_ref.dtype)


def pair_proj(pair2d, rbf2d, gamma, beta, W, bias):
    R, Dp = pair2d.shape
    Dr = rbf2d.shape[1]
    M = W.shape[1]
    Wp, Wr = W[:Dp], W[Dp:]
    TM = _row_tile(R)
    return pl.pallas_call(
        _pair_proj_kernel,
        out_shape=jax.ShapeDtypeStruct((R, M), jnp.float32),
        grid=(pl.cdiv(R, TM),),
        in_specs=[pl.BlockSpec((TM, Dp), lambda i: (i, 0)),
                  pl.BlockSpec((TM, Dr), lambda i: (i, 0)),
                  pl.BlockSpec((1, Dp), lambda i: (0, 0)),
                  pl.BlockSpec((1, Dp), lambda i: (0, 0)),
                  pl.BlockSpec((Dp, M), lambda i: (0, 0)),
                  pl.BlockSpec((Dr, M), lambda i: (0, 0)),
                  pl.BlockSpec((1, M), lambda i: (0, 0))],
        out_specs=pl.BlockSpec((TM, M), lambda i: (i, 0)),
        compiler_params=_compiler_params(("parallel",)),
    )(pair2d, rbf2d, gamma.reshape(1, Dp), beta.reshape(1, Dp),
      Wp.astype(jnp.bfloat16), Wr.astype(jnp.bfloat16),
      bias.reshape(1, M).astype(jnp.float32))


def _linear_residual_kernel(x_ref, res_ref, w_ref, b_ref, o_ref):
    """o = res + x @ W + b   (output projection fused with the residual add)."""
    y = jnp.dot(x_ref[...].astype(jnp.bfloat16), w_ref[...],
                preferred_element_type=jnp.float32)
    o_ref[...] = res_ref[...] + y + b_ref[...]


def linear_residual(x2d, res2d, W, b):
    R, K = x2d.shape
    M = W.shape[1]
    TM = _row_tile(R)
    return pl.pallas_call(
        _linear_residual_kernel,
        out_shape=jax.ShapeDtypeStruct((R, M), jnp.float32),
        grid=(pl.cdiv(R, TM),),
        in_specs=[pl.BlockSpec((TM, K), lambda i: (i, 0)),
                  pl.BlockSpec((TM, M), lambda i: (i, 0)),
                  pl.BlockSpec((K, M), lambda i: (0, 0)),
                  pl.BlockSpec((1, M), lambda i: (0, 0))],
        out_specs=pl.BlockSpec((TM, M), lambda i: (i, 0)),
        compiler_params=_compiler_params(("parallel",)),
    )(x2d, res2d, W.astype(jnp.bfloat16), b.reshape(1, M).astype(jnp.float32))


def _ff_kernel(x_ref, g_ref, b_ref, w1_ref, b1_ref, w2_ref, b2_ref, o_ref):
    """o = x + Linear2(ReLU(Linear1(LayerNorm(x))))   (whole FF block + residual)."""
    x = x_ref[...]
    mu = jnp.mean(x, axis=-1, keepdims=True)
    xc = x - mu
    var = jnp.mean(xc * xc, axis=-1, keepdims=True)
    xn = xc * jax.lax.rsqrt(var + LN_EPS) * g_ref[...] + b_ref[...]
    h = jnp.dot(xn.astype(jnp.bfloat16), w1_ref[...],
                preferred_element_type=jnp.float32) + b1_ref[...]
    h = jnp.maximum(h, 0.0)
    y = jnp.dot(h.astype(jnp.bfloat16), w2_ref[...],
                preferred_element_type=jnp.float32) + b2_ref[...]
    o_ref[...] = x + y


def ff_block(x2d, gamma, beta, W1, b1, W2, b2):
    R, D = x2d.shape
    Dh = W1.shape[1]
    TM = _row_tile(R)
    return pl.pallas_call(
        _ff_kernel,
        out_shape=jax.ShapeDtypeStruct((R, D), jnp.float32),
        grid=(pl.cdiv(R, TM),),
        in_specs=[pl.BlockSpec((TM, D), lambda i: (i, 0)),
                  pl.BlockSpec((1, D), lambda i: (0, 0)),
                  pl.BlockSpec((1, D), lambda i: (0, 0)),
                  pl.BlockSpec((D, Dh), lambda i: (0, 0)),
                  pl.BlockSpec((1, Dh), lambda i: (0, 0)),
                  pl.BlockSpec((Dh, D), lambda i: (0, 0)),
                  pl.BlockSpec((1, D), lambda i: (0, 0))],
        out_specs=pl.BlockSpec((TM, D), lambda i: (i, 0)),
        compiler_params=_compiler_params(("parallel",)),
    )(x2d, gamma.reshape(1, D), beta.reshape(1, D),
      W1.astype(jnp.bfloat16), b1.reshape(1, Dh).astype(jnp.float32),
      W2.astype(jnp.bfloat16), b2.reshape(1, D).astype(jnp.float32))


# ----------------------------------------------------------------------------
# Attention kernels: grid over (batch, head), lane-dense head-major layouts
# ----------------------------------------------------------------------------
def _row_attn_kernel(q_ref, k_ref, v_ref, g_ref, ksw_ref, qsw_ref, bias_ref,
                     e_ref, bm_ref, o_ref, *, d_hidden):
    """Tied row attention with pair bias + SequenceWeight, one (batch, head) per step.

    q/k/v/g/ksw blocks are (L, N*dh) with column index n*dh + d (lane-dense).
    e_ref  : (dh, N*dh)  tiled identity   -> broadcasts the length-dh target-seq query.
    bm_ref : (N,  N*dh)  group indicator  -> per-sequence group-sum / broadcast via MXU.
    """
    f32 = jnp.float32
    scale = 1.0 / float(np.sqrt(d_hidden))

    q = q_ref[0, 0]                               # (L, N*dh) bf16
    k = k_ref[0, 0]
    v = v_ref[0, 0]
    gate = jax.nn.sigmoid(g_ref[0, 0].astype(f32))
    ksw = ksw_ref[0, 0].astype(f32)               # (L, N*dh)
    qsw = qsw_ref[0, 0].astype(f32)               # (L, dh)
    e_mat = e_ref[...]                            # (dh, N*dh) f32
    bm = bm_ref[...]                              # (N, N*dh)  f32

    # --- SequenceWeight: softmax over the sequence axis N, per query position ---
    qsw_b = jnp.dot(qsw, e_mat, preferred_element_type=f32)          # (L, N*dh)
    swl = jax.lax.dot_general(qsw_b * ksw, bm, (((1,), (1,)), ((), ())),
                              preferred_element_type=f32) * scale    # (L, N)
    swl = swl - jnp.max(swl, axis=-1, keepdims=True)
    swe = jnp.exp(swl)
    sw = swe * pl.reciprocal(jnp.sum(swe, axis=-1, keepdims=True), approx=True)
    sw_b = jnp.dot(sw, bm, preferred_element_type=f32)               # (L, N*dh)

    # --- tied attention logits: single MXU matmul contracting K = N*dh ---
    qw = (q.astype(f32) * sw_b).astype(jnp.bfloat16)
    logits = jax.lax.dot_general(qw, k, (((1,), (1,)), ((), ())),
                                 preferred_element_type=f32)         # (L, L)
    logits = logits * scale + bias_ref[0, 0]
    logits = logits - jnp.max(logits, axis=-1, keepdims=True)
    p = jnp.exp(logits)
    p = p * pl.reciprocal(jnp.sum(p, axis=-1, keepdims=True), approx=True)

    # --- weighted values + gating, one lane-dense store per grid step ---
    out = jnp.dot(p.astype(jnp.bfloat16), v, preferred_element_type=f32)
    o_ref[0, 0] = (gate * out).astype(o_ref.dtype)


def row_attn(q, k, v, g, ksw, qsw, bias, e_mat, bm, *, d_hidden):
    B, H, L, ND = q.shape
    dh = d_hidden
    Nseq = bm.shape[0]
    m4 = lambda b, h: (b, h, 0, 0)
    return pl.pallas_call(
        functools.partial(_row_attn_kernel, d_hidden=d_hidden),
        out_shape=jax.ShapeDtypeStruct((B, H, L, ND), jnp.bfloat16),
        grid=(B, H),
        in_specs=[pl.BlockSpec((1, 1, L, ND), m4),
                  pl.BlockSpec((1, 1, L, ND), m4),
                  pl.BlockSpec((1, 1, L, ND), m4),
                  pl.BlockSpec((1, 1, L, ND), m4),
                  pl.BlockSpec((1, 1, L, ND), m4),
                  pl.BlockSpec((1, 1, L, dh), m4),
                  pl.BlockSpec((1, 1, L, L), m4),
                  pl.BlockSpec((dh, ND), lambda b, h: (0, 0)),
                  pl.BlockSpec((Nseq, ND), lambda b, h: (0, 0))],
        out_specs=pl.BlockSpec((1, 1, L, ND), m4),
        compiler_params=_compiler_params(("parallel", "parallel")),
    )(q, k, v, g, ksw, qsw, bias, e_mat, bm)


def _col_attn_kernel(q_ref, k_ref, v_ref, g_ref, o_ref, *, d_hidden):
    """Column (over sequences) gated attention, one (batch, head) per grid step.

    Blocks are (L, N, dh); logits / output are batched MXU matmuls over L.
    """
    f32 = jnp.float32
    scale = 1.0 / float(np.sqrt(d_hidden))
    q = q_ref[0, 0]                               # (L, N, dh) bf16
    k = k_ref[0, 0]
    v = v_ref[0, 0]
    gate = jax.nn.sigmoid(g_ref[0, 0].astype(f32))
    logits = jnp.einsum("ind,imd->inm", q, k,
                        preferred_element_type=f32) * scale          # (L, N, N)
    logits = logits - jnp.max(logits, axis=-1, keepdims=True)
    p = jnp.exp(logits)
    p = p * pl.reciprocal(jnp.sum(p, axis=-1, keepdims=True), approx=True)
    out = jnp.einsum("inm,imd->ind", p.astype(jnp.bfloat16), v,
                     preferred_element_type=f32)                     # (L, N, dh)
    o_ref[0, 0] = (gate * out).astype(o_ref.dtype)


def col_attn(q, k, v, g, *, d_hidden):
    B, H, L, Nseq, dh = q.shape
    m5 = lambda b, h: (b, h, 0, 0, 0)
    return pl.pallas_call(
        functools.partial(_col_attn_kernel, d_hidden=d_hidden),
        out_shape=jax.ShapeDtypeStruct((B, H, L, Nseq, dh), jnp.bfloat16),
        grid=(B, H),
        in_specs=[pl.BlockSpec((1, 1, L, Nseq, dh), m5),
                  pl.BlockSpec((1, 1, L, Nseq, dh), m5),
                  pl.BlockSpec((1, 1, L, Nseq, dh), m5),
                  pl.BlockSpec((1, 1, L, Nseq, dh), m5)],
        out_specs=pl.BlockSpec((1, 1, L, Nseq, dh), m5),
        compiler_params=_compiler_params(("parallel", "parallel")),
    )(q, k, v, g)


# ----------------------------------------------------------------------------
# Full forward (Pallas kernels + thin JAX glue: reshapes / transposes / index_add)
# ----------------------------------------------------------------------------
def msapairstr2msa_forward(p, msa, pair, rbf, state, *, n_head, d_hidden):
    B, N, L, d_msa = msa.shape
    d_pair = pair.shape[-1]
    d_state = state.shape[-1]
    H, dh = n_head, d_hidden
    hd = H * dh
    ND = N * dh
    f32 = jnp.float32
    msa = msa.astype(f32)

    # --- pair = proj_pair(cat(norm_pair(pair), rbf_feat)) --------------------
    pair_p = pair_proj(pair.reshape(-1, d_pair).astype(f32),
                       rbf.reshape(-1, rbf.shape[-1]).astype(f32),
                       p["np_g"], p["np_b"], p["pp_w"], p["pp_b"])   # (B*L*L, d_pair)

    # --- state = proj_state(norm_state(state)); msa = msa.index_add(1,[0],state)
    st = ln_matmul(state.reshape(-1, d_state).astype(f32),
                   p["ns_g"], p["ns_b"], p["ps_w"], p["ps_b"], out_dtype=f32)
    msa = msa.at[:, 0].add(st.reshape(B, L, d_msa))

    # ========================= row attention with pair bias =================
    # one fused LN + 5-way projection (q | k | v | gate | seq-weight-k)
    W5 = jnp.concatenate([p["ra_q_w"], p["ra_k_w"], p["ra_v_w"],
                          p["ra_g_w"], p["sw_k_w"]], axis=1)         # (d_msa, 5*hd)
    b5 = jnp.concatenate([jnp.zeros((3 * hd,), f32), p["ra_g_b"], p["sw_k_b"]])
    y5 = ln_matmul(msa.reshape(-1, d_msa), p["ra_nm_g"], p["ra_nm_b"], W5, b5,
                   out_dtype=jnp.bfloat16)
    y5 = y5.reshape(B, N, L, 5, H, dh)

    def to_head_major(t):                        # (B,N,L,H,dh) -> (B,H,L,N*dh)
        return t.transpose(0, 3, 2, 1, 4).reshape(B, H, L, ND)

    q_r = to_head_major(y5[..., 0, :, :])
    k_r = to_head_major(y5[..., 1, :, :])
    v_r = to_head_major(y5[..., 2, :, :])
    g_r = to_head_major(y5[..., 3, :, :])
    ksw_r = to_head_major(y5[..., 4, :, :])

    qsw = ln_matmul(msa[:, 0].reshape(-1, d_msa), p["ra_nm_g"], p["ra_nm_b"],
                    p["sw_q_w"], p["sw_q_b"], out_dtype=jnp.bfloat16)  # (B*L, hd)
    qsw_r = qsw.reshape(B, L, H, dh).transpose(0, 2, 1, 3)             # (B,H,L,dh)

    bias = ln_matmul(pair_p, p["ra_np_g"], p["ra_np_b"], p["ra_b_w"],
                     jnp.zeros((H,), f32), out_dtype=f32)              # (B*L*L, H)
    bias_r = bias.reshape(B, L, L, H).transpose(0, 3, 1, 2)            # (B,H,L,L)

    # small constant matrices used for sequence-group sum / broadcast on the MXU
    e_mat = jnp.asarray(np.tile(np.eye(dh, dtype=np.float32), (1, N)))            # (dh, N*dh)
    bm = jnp.asarray(np.kron(np.eye(N, dtype=np.float32),
                             np.ones((1, dh), np.float32)))                       # (N,  N*dh)

    row = row_attn(q_r, k_r, v_r, g_r, ksw_r, qsw_r, bias_r, e_mat, bm,
                   d_hidden=dh)                                        # (B,H,L,N*dh)
    row_m = row.reshape(B, H, L, N, dh).transpose(0, 3, 2, 1, 4).reshape(-1, hd)
    msa = linear_residual(row_m, msa.reshape(-1, d_msa),
                          p["ra_o_w"], p["ra_o_b"]).reshape(B, N, L, d_msa)

    # ============================ column attention ==========================
    W4 = jnp.concatenate([p["ca_q_w"], p["ca_k_w"], p["ca_v_w"], p["ca_g_w"]],
                         axis=1)                                       # (d_msa, 4*hd)
    b4 = jnp.concatenate([jnp.zeros((3 * hd,), f32), p["ca_g_b"]])
    y4 = ln_matmul(msa.reshape(-1, d_msa), p["ca_nm_g"], p["ca_nm_b"], W4, b4,
                   out_dtype=jnp.bfloat16).reshape(B, N, L, 4, H, dh)

    def to_head_major5(t):                       # (B,N,L,H,dh) -> (B,H,L,N,dh)
        return t.transpose(0, 3, 2, 1, 4)

    cq = to_head_major5(y4[..., 0, :, :])
    ck = to_head_major5(y4[..., 1, :, :])
    cv = to_head_major5(y4[..., 2, :, :])
    cg = to_head_major5(y4[..., 3, :, :])
    col = col_attn(cq, ck, cv, cg, d_hidden=dh)                        # (B,H,L,N,dh)
    col_m = col.transpose(0, 3, 2, 1, 4).reshape(-1, hd)
    msa = linear_residual(col_m, msa.reshape(-1, d_msa),
                          p["ca_o_w"], p["ca_o_b"]).reshape(B, N, L, d_msa)

    # ============================== feed-forward ============================
    msa = ff_block(msa.reshape(-1, d_msa), p["ff_n_g"], p["ff_n_b"],
                   p["ff_1_w"], p["ff_1_b"], p["ff_2_w"], p["ff_2_b"]
                   ).reshape(B, N, L, d_msa)
    return msa


# ----------------------------------------------------------------------------
# Pure-JAX reference (mirrors the PyTorch forward, eval mode, float32)
# ----------------------------------------------------------------------------
def reference_forward(p, msa, pair, rbf, state, *, n_head, d_hidden):
    B, N, L, d_msa = msa.shape
    h, dh = n_head, d_hidden
    scale = 1.0 / float(np.sqrt(dh))

    def ln(x, g, b):
        mu = x.mean(-1, keepdims=True)
        var = ((x - mu) ** 2).mean(-1, keepdims=True)
        return (x - mu) / jnp.sqrt(var + LN_EPS) * g + b

    pair_n = ln(pair, p["np_g"], p["np_b"])
    pair_p = jnp.concatenate([pair_n, rbf], axis=-1) @ p["pp_w"] + p["pp_b"]
    st = ln(state, p["ns_g"], p["ns_b"]) @ p["ps_w"] + p["ps_b"]
    msa = msa.astype(jnp.float32).at[:, 0].add(st)

    m_n = ln(msa, p["ra_nm_g"], p["ra_nm_b"])
    pr_n = ln(pair_p, p["ra_np_g"], p["ra_np_b"])
    qsw = (m_n[:, 0] @ p["sw_q_w"] + p["sw_q_b"]).reshape(B, 1, L, h, dh) * scale
    ksw = (m_n @ p["sw_k_w"] + p["sw_k_b"]).reshape(B, N, L, h, dh)
    sw = jax.nn.softmax(jnp.einsum("bqihd,bkihd->bkihq", qsw, ksw), axis=1)
    q = (m_n @ p["ra_q_w"]).reshape(B, N, L, h, dh) * sw
    k = (m_n @ p["ra_k_w"]).reshape(B, N, L, h, dh) * scale
    v = (m_n @ p["ra_v_w"]).reshape(B, N, L, h, dh)
    bias = pr_n @ p["ra_b_w"]
    gate = jax.nn.sigmoid(m_n @ p["ra_g_w"] + p["ra_g_b"])
    attn = jax.nn.softmax(jnp.einsum("bsqhd,bskhd->bqkh", q, k) + bias, axis=-2)
    out = jnp.einsum("bqkh,bskhd->bsqhd", attn, v).reshape(B, N, L, h * dh)
    msa = msa + ((gate * out) @ p["ra_o_w"] + p["ra_o_b"])

    m_n = ln(msa, p["ca_nm_g"], p["ca_nm_b"])
    q = (m_n @ p["ca_q_w"]).reshape(B, N, L, h, dh) * scale
    k = (m_n @ p["ca_k_w"]).reshape(B, N, L, h, dh)
    v = (m_n @ p["ca_v_w"]).reshape(B, N, L, h, dh)
    gate = jax.nn.sigmoid(m_n @ p["ca_g_w"] + p["ca_g_b"])
    attn = jax.nn.softmax(jnp.einsum("bqihd,bkihd->bihqk", q, k), axis=-1)
    out = jnp.einsum("bihqk,bkihd->bqihd", attn, v).reshape(B, N, L, h * dh)
    msa = msa + ((gate * out) @ p["ca_o_w"] + p["ca_o_b"])

    x = ln(msa, p["ff_n_g"], p["ff_n_b"])
    x = jnp.maximum(x @ p["ff_1_w"] + p["ff_1_b"], 0.0) @ p["ff_2_w"] + p["ff_2_b"]
    return msa + x


# ----------------------------------------------------------------------------
# Deterministic synthetic parameters
# ----------------------------------------------------------------------------
def init_params(key, d_msa, d_pair, d_state, n_head, d_hidden):
    hd = n_head * d_hidden
    keys = iter(jax.random.split(key, 64))

    def w(shape, fan_in):
        return jax.random.normal(next(keys), shape, jnp.float32) / np.sqrt(fan_in)

    def lnp(d):
        g = 1.0 + 0.1 * jax.random.normal(next(keys), (d,), jnp.float32)
        b = 0.1 * jax.random.normal(next(keys), (d,), jnp.float32)
        return g, b

    p = {}
    p["np_g"], p["np_b"] = lnp(d_pair)
    p["pp_w"] = w((d_pair + 36, d_pair), d_pair + 36)
    p["pp_b"] = jnp.zeros((d_pair,), jnp.float32)
    p["ns_g"], p["ns_b"] = lnp(d_state)
    p["ps_w"] = w((d_state, d_msa), d_state)
    p["ps_b"] = jnp.zeros((d_msa,), jnp.float32)
    # row attention with bias
    p["ra_nm_g"], p["ra_nm_b"] = lnp(d_msa)
    p["ra_np_g"], p["ra_np_b"] = lnp(d_pair)
    p["sw_q_w"] = w((d_msa, hd), d_msa)
    p["sw_q_b"] = 0.1 * jax.random.normal(next(keys), (hd,), jnp.float32)
    p["sw_k_w"] = w((d_msa, hd), d_msa)
    p["sw_k_b"] = 0.1 * jax.random.normal(next(keys), (hd,), jnp.float32)
    p["ra_q_w"] = w((d_msa, hd), d_msa)
    p["ra_k_w"] = w((d_msa, hd), d_msa)
    p["ra_v_w"] = w((d_msa, hd), d_msa)
    p["ra_b_w"] = w((d_pair, n_head), d_pair)
    p["ra_g_w"] = w((d_msa, hd), d_msa)
    p["ra_g_b"] = jnp.ones((hd,), jnp.float32)
    p["ra_o_w"] = w((hd, d_msa), hd)
    p["ra_o_b"] = jnp.zeros((d_msa,), jnp.float32)
    # column attention
    p["ca_nm_g"], p["ca_nm_b"] = lnp(d_msa)
    p["ca_q_w"] = w((d_msa, hd), d_msa)
    p["ca_k_w"] = w((d_msa, hd), d_msa)
    p["ca_v_w"] = w((d_msa, hd), d_msa)
    p["ca_g_w"] = w((d_msa, hd), d_msa)
    p["ca_g_b"] = jnp.ones((hd,), jnp.float32)
    p["ca_o_w"] = w((hd, d_msa), hd)
    p["ca_o_b"] = jnp.zeros((d_msa,), jnp.float32)
    # feed forward (r_ff = 4)
    p["ff_n_g"], p["ff_n_b"] = lnp(d_msa)
    p["ff_1_w"] = w((d_msa, 4 * d_msa), d_msa)
    p["ff_1_b"] = jnp.zeros((4 * d_msa,), jnp.float32)
    p["ff_2_w"] = w((4 * d_msa, d_msa), 4 * d_msa)
    p["ff_2_b"] = jnp.zeros((d_msa,), jnp.float32)
    return p


if __name__ == "__main__":
    # small shapes consistent with the module
    B, N, L = 1, 4, 8
    d_msa, d_pair, d_state, n_head, d_hidden = 32, 16, 8, 4, 8

    k0 = jax.random.PRNGKey(0)
    k1, k2, k3, k4, k5 = jax.random.split(k0, 5)
    msa = jax.random.normal(k1, (B, N, L, d_msa), jnp.float32)
    pair = jax.random.normal(k2, (B, L, L, d_pair), jnp.float32)
    rbf_feat = jax.random.normal(k3, (B, L, L, 36), jnp.float32)
    state = jax.random.normal(k4, (B, L, d_state), jnp.float32)
    params = init_params(k5, d_msa, d_pair, d_state, n_head, d_hidden)

    fwd = jax.jit(functools.partial(msapairstr2msa_forward,
                                    n_head=n_head, d_hidden=d_hidden))
    out = jax.block_until_ready(fwd(params, msa, pair, rbf_feat, state))

    ref = reference_forward(params, msa, pair, rbf_feat, state,
                            n_head=n_head, d_hidden=d_hidden)

    out_np = np.asarray(out, dtype=np.float64)
    ref_np = np.asarray(ref, dtype=np.float64)
    if not np.all(np.isfinite(out_np)):
        raise AssertionError("non-finite values in kernel output")
    # MXU operands run in bf16 (f32 accumulation), so compare with a norm-based
    # gate sized for mixed precision (typical rel-L2 ~1e-2; real bugs give O(1)).
    rel_l2 = np.linalg.norm(out_np - ref_np) / np.linalg.norm(ref_np)
    max_abs = np.max(np.abs(out_np - ref_np))
    if rel_l2 > 5e-2 or max_abs > 0.25:
        raise AssertionError(f"mismatch: rel_l2={rel_l2:.3e} max_abs={max_abs:.3e}")
    print("KERNEL_OK")
</pallas_src>

<mosaic_0001>
module attributes {stable_mosaic.version = 11 : i64} {
  func.func @_ln_matmul_kernel(%arg0: i32, %arg1: memref<8x8xf32, #tpu.memory_space<vmem>>, %arg2: memref<1x8xf32, #tpu.memory_space<vmem>>, %arg3: memref<1x8xf32, #tpu.memory_space<vmem>>, %arg4: memref<8x32xbf16, #tpu.memory_space<vmem>>, %arg5: memref<1x32xf32, #tpu.memory_space<vmem>>, %arg6: memref<8x32xf32, #tpu.memory_space<vmem>>) attributes {dimension_semantics = [#tpu.dimension_semantics<parallel>], iteration_bounds = array<i64: 1>, scalar_prefetch = 0 : i64, scratch_operands = 0 : i64, tpu.core_type = #tpu.core_type<tc>, window_params = [{transform_indices = @transform_0, window_bounds = array<i64: 8, 8>}, {pipeline_mode = #tpu.pipeline_mode<synchronous>, transform_indices = @transform_1, window_bounds = array<i64: 1, 8>}, {pipeline_mode = #tpu.pipeline_mode<synchronous>, transform_indices = @transform_2, window_bounds = array<i64: 1, 8>}, {pipeline_mode = #tpu.pipeline_mode<synchronous>, transform_indices = @transform_3, window_bounds = array<i64: 8, 32>}, {pipeline_mode = #tpu.pipeline_mode<synchronous>, transform_indices = @transform_4, window_bounds = array<i64: 1, 32>}, {transform_indices = @transform_5, window_bounds = array<i64: 8, 32>}]} {
    %c0 = arith.constant 0 : index
    %c0_0 = arith.constant 0 : index
    %0 = vector.load %arg1[%c0, %c0_0] : memref<8x8xf32, #tpu.memory_space<vmem>>, vector<8x8xf32>
    %cst = arith.constant dense<0.000000e+00> : vector<8xf32>
    %1 = vector.multi_reduction <add>, %0, %cst [1] : vector<8x8xf32> to vector<8xf32>
    %2 = vector.shape_cast %1 : vector<8xf32> to vector<8x1xf32>
    %cst_1 = arith.constant 8.000000e+00 : f32
    %3 = vector.broadcast %cst_1 : f32 to vector<8x1xf32>
    %4 = arith.divf %2, %3 : vector<8x1xf32>
    %5 = vector.broadcast %4 : vector<8x1xf32> to vector<8x8xf32>
    %6 = arith.subf %0, %5 : vector<8x8xf32>
    %7 = arith.mulf %6, %6 : vector<8x8xf32>
    %cst_2 = arith.constant dense<0.000000e+00> : vector<8xf32>
    %8 = vector.multi_reduction <add>, %7, %cst_2 [1] : vector<8x8xf32> to vector<8xf32>
    %9 = vector.shape_cast %8 : vector<8xf32> to vector<8x1xf32>
    %cst_3 = arith.constant 8.000000e+00 : f32
    %10 = vector.broadcast %cst_3 : f32 to vector<8x1xf32>
    %11 = arith.divf %9, %10 : vector<8x1xf32>
    %cst_4 = arith.constant 9.99999974E-6 : f32
    %12 = vector.broadcast %cst_4 : f32 to vector<8x1xf32>
    %13 = arith.addf %11, %12 : vector<8x1xf32>
    %14 = math.rsqrt %13 : vector<8x1xf32>
    %15 = vector.broadcast %14 : vector<8x1xf32> to vector<8x8xf32>
    %16 = arith.mulf %6, %15 : vector<8x8xf32>
    %c0_5 = arith.constant 0 : index
    %c0_6 = arith.constant 0 : index
    %17 = vector.load %arg2[%c0_5, %c0_6] : memref<1x8xf32, #tpu.memory_space<vmem>>, vector<1x8xf32>
    %18 = vector.broadcast %17 : vector<1x8xf32> to vector<8x8xf32>
    %19 = arith.mulf %16, %18 : vector<8x8xf32>
    %c0_7 = arith.constant 0 : index
    %c0_8 = arith.constant 0 : index
    %20 = vector.load %arg3[%c0_7, %c0_8] : memref<1x8xf32, #tpu.memory_space<vmem>>, vector<1x8xf32>
    %21 = vector.broadcast %20 : vector<1x8xf32> to vector<8x8xf32>
    %22 = arith.addf %19, %21 : vector<8x8xf32>
    %23 = arith.truncf %22 : vector<8x8xf32> to vector<8x8xbf16>
    %c0_9 = arith.constant 0 : index
    %c0_10 = arith.constant 0 : index
    %24 = vector.load %arg4[%c0_9, %c0_10] : memref<8x32xbf16, #tpu.memory_space<vmem>>, vector<8x32xbf16>
    %cst_11 = arith.constant dense<0.000000e+00> : vector<8x32xf32>
    %25 = tpu.matmul %23, %24, %cst_11 {dimension_numbers = #tpu.dot_dimension_numbers<[1], [0], [0], [1], [0, 0, 1, 1], [], []>} : vector<8x8xbf16>, vector<8x32xbf16>, vector<8x32xf32> -> vector<8x32xf32>
    %c0_12 = arith.constant 0 : index
    %c0_13 = arith.constant 0 : index
    %26 = vector.load %arg5[%c0_12, %c0_13] : memref<1x32xf32, #tpu.memory_space<vmem>>, vector<1x32xf32>
    %27 = vector.broadcast %26 : vector<1x32xf32> to vector<8x32xf32>
    %28 = arith.addf %25, %27 : vector<8x32xf32>
    %c0_14 = arith.constant 0 : index
    %c0_15 = arith.constant 0 : index
    %29 = vector.load %arg6[%c0_14, %c0_15] : memref<8x32xf32, #tpu.memory_space<vmem>>, vector<8x32xf32>
    tpu.vector_store %arg6[%c0_14, %c0_15], %28 {strides = array<i32>} : memref<8x32xf32, #tpu.memory_space<vmem>>, vector<8x32xf32>,
    return
  }
  func.func @transform_0(%arg0: i32) -> (i32, i32) {
    %c0_i32 = arith.constant 0 : i32
    %c0_i32_0 = arith.constant 0 : i32
    return %arg0, %c0_i32 : i32, i32
  }
  func.func @transform_1(%arg0: i32) -> (i32, i32) {
    %c0_i32 = arith.constant 0 : i32
    %c0_i32_0 = arith.constant 0 : i32
    %c0_i32_1 = arith.constant 0 : i32
    return %c0_i32, %c0_i32_0 : i32, i32
  }
  func.func @transform_2(%arg0: i32) -> (i32, i32) {
    %c0_i32 = arith.constant 0 : i32
    %c0_i32_0 = arith.constant 0 : i32
    %c0_i32_1 = arith.constant 0 : i32
    return %c0_i32, %c0_i32_0 : i32, i32
  }
  func.func @transform_3(%arg0: i32) -> (i32, i32) {
    %c0_i32 = arith.constant 0 : i32
    %c0_i32_0 = arith.constant 0 : i32
    %c0_i32_1 = arith.constant 0 : i32
    return %c0_i32, %c0_i32_0 : i32, i32
  }
  func.func @transform_4(%arg0: i32) -> (i32, i32) {
    %c0_i32 = arith.constant 0 : i32
    %c0_i32_0 = arith.constant 0 : i32
    %c0_i32_1 = arith.constant 0 : i32
    return %c0_i32, %c0_i32_0 : i32, i32
  }
  func.func @transform_5(%arg0: i32) -> (i32, i32) {
    %c0_i32 = arith.constant 0 : i32
    %c0_i32_0 = arith.constant 0 : i32
    return %arg0, %c0_i32 : i32, i32
  }
}

module attributes {stable_mosaic.version = 11 : i64} {
  func.func @_ln_matmul_kernel(%arg0: i32, %arg1: memref<32x32xf32, #tpu.memory_space<vmem>>, %arg2: memref<1x32xf32, #tpu.memory_space<vmem>>, %arg3: memref<1x32xf32, #tpu.memory_space<vmem>>, %arg4: memref<32x160xbf16, #tpu.memory_space<vmem>>, %arg5: memref<1x160xf32, #tpu.memory_space<vmem>>, %arg6: memref<32x160xbf16, #tpu.memory_space<vmem>>) attributes {dimension_semantics = [#tpu.dimension_semantics<parallel>], iteration_bounds = array<i64: 1>, scalar_prefetch = 0 : i64, scratch_operands = 0 : i64, tpu.core_type = #tpu.core_type<tc>, window_params = [{transform_indices = @transform_0, window_bounds = array<i64: 32, 32>}, {pipeline_mode = #tpu.pipeline_mode<synchronous>, transform_indices = @transform_1, window_bounds = array<i64: 1, 32>}, {pipeline_mode = #tpu.pipeline_mode<synchronous>, transform_indices = @transform_2, window_bounds = array<i64: 1, 32>}, {pipeline_mode = #tpu.pipeline_mode<synchronous>, transform_indices = @transform_3, window_bounds = array<i64: 32, 160>}, {pipeline_mode = #tpu.pipeline_mode<synchronous>, transform_indices = @transform_4, window_bounds = array<i64: 1, 160>}, {transform_indices = @transform_5, window_bounds = array<i64: 32, 160>}]} {
    %c0 = arith.constant 0 : index
    %c0_0 = arith.constant 0 : index
    %0 = vector.load %arg1[%c0, %c0_0] : memref<32x32xf32, #tpu.memory_space<vmem>>, vector<32x32xf32>
    %cst = arith.constant dense<0.000000e+00> : vector<32xf32>
    %1 = vector.multi_reduction <add>, %0, %cst [1] : vector<32x32xf32> to vector<32xf32>
    %2 = vector.shape_cast %1 : vector<32xf32> to vector<32x1xf32>
    %cst_1 = arith.constant 3.200000e+01 : f32
    %3 = vector.broadcast %cst_1 : f32 to vector<32x1xf32>
    %4 = arith.divf %2, %3 : vector<32x1xf32>
    %5 = vector.broadcast %4 : vector<32x1xf32> to vector<32x32xf32>
    %6 = arith.subf %0, %5 : vector<32x32xf32>
    %7 = arith.mulf %6, %6 : vector<32x32xf32>
    %cst_2 = arith.constant dense<0.000000e+00> : vector<32xf32>
    %8 = vector.multi_reduction <add>, %7, %cst_2 [1] : vector<32x32xf32> to vector<32xf32>
    %9 = vector.shape_cast %8 : vector<32xf32> to vector<32x1xf32>
    %cst_3 = arith.constant 3.200000e+01 : f32
    %10 = vector.broadcast %cst_3 : f32 to vector<32x1xf32>
    %11 = arith.divf %9, %10 : vector<32x1xf32>
    %cst_4 = arith.constant 9.99999974E-6 : f32
    %12 = vector.broadcast %cst_4 : f32 to vector<32x1xf32>
    %13 = arith.addf %11, %12 : vector<32x1xf32>
    %14 = math.rsqrt %13 : vector<32x1xf32>
    %15 = vector.broadcast %14 : vector<32x1xf32> to vector<32x32xf32>
    %16 = arith.mulf %6, %15 : vector<32x32xf32>
    %c0_5 = arith.constant 0 : index
    %c0_6 = arith.constant 0 : index
    %17 = vector.load %arg2[%c0_5, %c0_6] : memref<1x32xf32, #tpu.memory_space<vmem>>, vector<1x32xf32>
    %18 = vector.broadcast %17 : vector<1x32xf32> to vector<32x32xf32>
    %19 = arith.mulf %16, %18 : vector<32x32xf32>
    %c0_7 = arith.constant 0 : index
    %c0_8 = arith.constant 0 : index
    %20 = vector.load %arg3[%c0_7, %c0_8] : memref<1x32xf32, #tpu.memory_space<vmem>>, vector<1x32xf32>
    %21 = vector.broadcast %20 : vector<1x32xf32> to vector<32x32xf32>
    %22 = arith.addf %19, %21 : vector<32x32xf32>
    %23 = arith.truncf %22 : vector<32x32xf32> to vector<32x32xbf16>
    %c0_9 = arith.constant 0 : index
    %c0_10 = arith.constant 0 : index
    %24 = vector.load %arg4[%c0_9, %c0_10] : memref<32x160xbf16, #tpu.memory_space<vmem>>, vector<32x160xbf16>
    %cst_11 = arith.constant dense<0.000000e+00> : vector<32x160xf32>
    %25 = tpu.matmul %23, %24, %cst_11 {dimension_numbers = #tpu.dot_dimension_numbers<[1], [0], [0], [1], [0, 0, 1, 1], [], []>} : vector<32x32xbf16>, vector<32x160xbf16>, vector<32x160xf32> -> vector<32x160xf32>
    %c0_12 = arith.constant 0 : index
    %c0_13 = arith.constant 0 : index
    %26 = vector.load %arg5[%c0_12, %c0_13] : memref<1x160xf32, #tpu.memory_space<vmem>>, vector<1x160xf32>
    %27 = vector.broadcast %26 : vector<1x160xf32> to vector<32x160xf32>
    %28 = arith.addf %25, %27 : vector<32x160xf32>
    %29 = arith.truncf %28 : vector<32x160xf32> to vector<32x160xbf16>
    %c0_14 = arith.constant 0 : index
    %c0_15 = arith.constant 0 : index
    %30 = vector.load %arg6[%c0_14, %c0_15] : memref<32x160xbf16, #tpu.memory_space<vmem>>, vector<32x160xbf16>
    tpu.vector_store %arg6[%c0_14, %c0_15], %29 {strides = array<i32>} : memref<32x160xbf16, #tpu.memory_space<vmem>>, vector<32x160xbf16>,
    return
  }
  func.func @transform_0(%arg0: i32) -> (i32, i32) {
    %c0_i32 = arith.constant 0 : i32
    %c0_i32_0 = arith.constant 0 : i32
    return %arg0, %c0_i32 : i32, i32
  }
  func.func @transform_1(%arg0: i32) -> (i32, i32) {
    %c0_i32 = arith.constant 0 : i32
    %c0_i32_0 = arith.constant 0 : i32
    %c0_i32_1 = arith.constant 0 : i32
    return %c0_i32, %c0_i32_0 : i32, i32
  }
  func.func @transform_2(%arg0: i32) -> (i32, i32) {
    %c0_i32 = arith.constant 0 : i32
    %c0_i32_0 = arith.constant 0 : i32
    %c0_i32_1 = arith.constant 0 : i32
    return %c0_i32, %c0_i32_0 : i32, i32
  }
  func.func @transform_3(%arg0: i32) -> (i32, i32) {
    %c0_i32 = arith.constant 0 : i32
    %c0_i32_0 = arith.constant 0 : i32
    %c0_i32_1 = arith.constant 0 : i32
    return %c0_i32, %c0_i32_0 : i32, i32
  }
  func.func @transform_4(%arg0: i32) -> (i32, i32) {
    %c0_i32 = arith.constant 0 : i32
    %c0_i32_0 = arith.constant 0 : i32
    %c0_i32_1 = arith.constant 0 : i32
    return %c0_i32, %c0_i32_0 : i32, i32
  }
  func.func @transform_5(%arg0: i32) -> (i32, i32) {
    %c0_i32 = arith.constant 0 : i32
    %c0_i32_0 = arith.constant 0 : i32
    return %arg0, %c0_i32 : i32, i32
  }
}

module attributes {stable_mosaic.version = 11 : i64} {
  func.func @_ln_matmul_kernel(%arg0: i32, %arg1: memref<8x32xf32, #tpu.memory_space<vmem>>, %arg2: memref<1x32xf32, #tpu.memory_space<vmem>>, %arg3: memref<1x32xf32, #tpu.memory_space<vmem>>, %arg4: memref<32x32xbf16, #tpu.memory_space<vmem>>, %arg5: memref<1x32xf32, #tpu.memory_space<vmem>>, %arg6: memref<8x32xbf16, #tpu.memory_space<vmem>>) attributes {dimension_semantics = [#tpu.dimension_semantics<parallel>], iteration_bounds = array<i64: 1>, scalar_prefetch = 0 : i64, scratch_operands = 0 : i64, tpu.core_type = #tpu.core_type<tc>, window_params = [{transform_indices = @transform_0, window_bounds = array<i64: 8, 32>}, {pipeline_mode = #tpu.pipeline_mode<synchronous>, transform_indices = @transform_1, window_bounds = array<i64: 1, 32>}, {pipeline_mode = #tpu.pipeline_mode<synchronous>, transform_indices = @transform_2, window_bounds = array<i64: 1, 32>}, {pipeline_mode = #tpu.pipeline_mode<synchronous>, transform_indices = @transform_3, window_bounds = array<i64: 32, 32>}, {pipeline_mode = #tpu.pipeline_mode<synchronous>, transform_indices = @transform_4, window_bounds = array<i64: 1, 32>}, {transform_indices = @transform_5, window_bounds = array<i64: 8, 32>}]} {
    %c0 = arith.constant 0 : index
    %c0_0 = arith.constant 0 : index
    %0 = vector.load %arg1[%c0, %c0_0] : memref<8x32xf32, #tpu.memory_space<vmem>>, vector<8x32xf32>
    %cst = arith.constant dense<0.000000e+00> : vector<8xf32>
    %1 = vector.multi_reduction <add>, %0, %cst [1] : vector<8x32xf32> to vector<8xf32>
    %2 = vector.shape_cast %1 : vector<8xf32> to vector<8x1xf32>
    %cst_1 = arith.constant 3.200000e+01 : f32
    %3 = vector.broadcast %cst_1 : f32 to vector<8x1xf32>
    %4 = arith.divf %2, %3 : vector<8x1xf32>
    %5 = vector.broadcast %4 : vector<8x1xf32> to vector<8x32xf32>
    %6 = arith.subf %0, %5 : vector<8x32xf32>
    %7 = arith.mulf %6, %6 : vector<8x32xf32>
    %cst_2 = arith.constant dense<0.000000e+00> : vector<8xf32>
    %8 = vector.multi_reduction <add>, %7, %cst_2 [1] : vector<8x32xf32> to vector<8xf32>
    %9 = vector.shape_cast %8 : vector<8xf32> to vector<8x1xf32>
    %cst_3 = arith.constant 3.200000e+01 : f32
    %10 = vector.broadcast %cst_3 : f32 to vector<8x1xf32>
    %11 = arith.divf %9, %10 : vector<8x1xf32>
    %cst_4 = arith.constant 9.99999974E-6 : f32
    %12 = vector.broadcast %cst_4 : f32 to vector<8x1xf32>
    %13 = arith.addf %11, %12 : vector<8x1xf32>
    %14 = math.rsqrt %13 : vector<8x1xf32>
    %15 = vector.broadcast %14 : vector<8x1xf32> to vector<8x32xf32>
    %16 = arith.mulf %6, %15 : vector<8x32xf32>
    %c0_5 = arith.constant 0 : index
    %c0_6 = arith.constant 0 : index
    %17 = vector.load %arg2[%c0_5, %c0_6] : memref<1x32xf32, #tpu.memory_space<vmem>>, vector<1x32xf32>
    %18 = vector.broadcast %17 : vector<1x32xf32> to vector<8x32xf32>
    %19 = arith.mulf %16, %18 : vector<8x32xf32>
    %c0_7 = arith.constant 0 : index
    %c0_8 = arith.constant 0 : index
    %20 = vector.load %arg3[%c0_7, %c0_8] : memref<1x32xf32, #tpu.memory_space<vmem>>, vector<1x32xf32>
    %21 = vector.broadcast %20 : vector<1x32xf32> to vector<8x32xf32>
    %22 = arith.addf %19, %21 : vector<8x32xf32>
    %23 = arith.truncf %22 : vector<8x32xf32> to vector<8x32xbf16>
    %c0_9 = arith.constant 0 : index
    %c0_10 = arith.constant 0 : index
    %24 = vector.load %arg4[%c0_9, %c0_10] : memref<32x32xbf16, #tpu.memory_space<vmem>>, vector<32x32xbf16>
    %cst_11 = arith.constant dense<0.000000e+00> : vector<8x32xf32>
    %25 = tpu.matmul %23, %24, %cst_11 {dimension_numbers = #tpu.dot_dimension_numbers<[1], [0], [0], [1], [0, 0, 1, 1], [], []>} : vector<8x32xbf16>, vector<32x32xbf16>, vector<8x32xf32> -> vector<8x32xf32>
    %c0_12 = arith.constant 0 : index
    %c0_13 = arith.constant 0 : index
    %26 = vector.load %arg5[%c0_12, %c0_13] : memref<1x32xf32, #tpu.memory_space<vmem>>, vector<1x32xf32>
    %27 = vector.broadcast %26 : vector<1x32xf32> to vector<8x32xf32>
    %28 = arith.addf %25, %27 : vector<8x32xf32>
    %29 = arith.truncf %28 : vector<8x32xf32> to vector<8x32xbf16>
    %c0_14 = arith.constant 0 : index
    %c0_15 = arith.constant 0 : index
    %30 = vector.load %arg6[%c0_14, %c0_15] : memref<8x32xbf16, #tpu.memory_space<vmem>>, vector<8x32xbf16>
    tpu.vector_store %arg6[%c0_14, %c0_15], %29 {strides = array<i32>} : memref<8x32xbf16, #tpu.memory_space<vmem>>, vector<8x32xbf16>,
    return
  }
  func.func @transform_0(%arg0: i32) -> (i32, i32) {
    %c0_i32 = arith.constant 0 : i32
    %c0_i32_0 = arith.constant 0 : i32
    return %arg0, %c0_i32 : i32, i32
  }
  func.func @transform_1(%arg0: i32) -> (i32, i32) {
    %c0_i32 = arith.constant 0 : i32
    %c0_i32_0 = arith.constant 0 : i32
    %c0_i32_1 = arith.constant 0 : i32
    return %c0_i32, %c0_i32_0 : i32, i32
  }
  func.func @transform_2(%arg0: i32) -> (i32, i32) {
    %c0_i32 = arith.constant 0 : i32
    %c0_i32_0 = arith.constant 0 : i32
    %c0_i32_1 = arith.constant 0 : i32
    return %c0_i32, %c0_i32_0 : i32, i32
  }
  func.func @transform_3(%arg0: i32) -> (i32, i32) {
    %c0_i32 = arith.constant 0 : i32
    %c0_i32_0 = arith.constant 0 : i32
    %c0_i32_1 = arith.constant 0 : i32
    return %c0_i32, %c0_i32_0 : i32, i32
  }
  func.func @transform_4(%arg0: i32) -> (i32, i32) {
    %c0_i32 = arith.constant 0 : i32
    %c0_i32_0 = arith.constant 0 : i32
    %c0_i32_1 = arith.constant 0 : i32
    return %c0_i32, %c0_i32_0 : i32, i32
  }
  func.func @transform_5(%arg0: i32) -> (i32, i32) {
    %c0_i32 = arith.constant 0 : i32
    %c0_i32_0 = arith.constant 0 : i32
    return %arg0, %c0_i32 : i32, i32
  }
}

module attributes {stable_mosaic.version = 11 : i64} {
  func.func @_pair_proj_kernel(%arg0: i32, %arg1: memref<64x16xf32, #tpu.memory_space<vmem>>, %arg2: memref<64x36xf32, #tpu.memory_space<vmem>>, %arg3: memref<1x16xf32, #tpu.memory_space<vmem>>, %arg4: memref<1x16xf32, #tpu.memory_space<vmem>>, %arg5: memref<16x16xbf16, #tpu.memory_space<vmem>>, %arg6: memref<36x16xbf16, #tpu.memory_space<vmem>>, %arg7: memref<1x16xf32, #tpu.memory_space<vmem>>, %arg8: memref<64x16xf32, #tpu.memory_space<vmem>>) attributes {dimension_semantics = [#tpu.dimension_semantics<parallel>], iteration_bounds = array<i64: 1>, scalar_prefetch = 0 : i64, scratch_operands = 0 : i64, tpu.core_type = #tpu.core_type<tc>, window_params = [{transform_indices = @transform_0, window_bounds = array<i64: 64, 16>}, {transform_indices = @transform_1, window_bounds = array<i64: 64, 36>}, {pipeline_mode = #tpu.pipeline_mode<synchronous>, transform_indices = @transform_2, window_bounds = array<i64: 1, 16>}, {pipeline_mode = #tpu.pipeline_mode<synchronous>, transform_indices = @transform_3, window_bounds = array<i64: 1, 16>}, {pipeline_mode = #tpu.pipeline_mode<synchronous>, transform_indices = @transform_4, window_bounds = array<i64: 16, 16>}, {pipeline_mode = #tpu.pipeline_mode<synchronous>, transform_indices = @transform_5, window_bounds = array<i64: 36, 16>}, {pipeline_mode = #tpu.pipeline_mode<synchronous>, transform_indices = @transform_6, window_bounds = array<i64: 1, 16>}, {transform_indices = @transform_7, window_bounds = array<i64: 64, 16>}]} {
    %c0 = arith.constant 0 : index
    %c0_0 = arith.constant 0 : index
    %0 = vector.load %arg1[%c0, %c0_0] : memref<64x16xf32, #tpu.memory_space<vmem>>, vector<64x16xf32>
    %cst = arith.constant dense<0.000000e+00> : vector<64xf32>
    %1 = vector.multi_reduction <add>, %0, %cst [1] : vector<64x16xf32> to vector<64xf32>
    %2 = vector.shape_cast %1 : vector<64xf32> to vector<64x1xf32>
    %cst_1 = arith.constant 1.600000e+01 : f32
    %3 = vector.broadcast %cst_1 : f32 to vector<64x1xf32>
    %4 = arith.divf %2, %3 : vector<64x1xf32>
    %5 = vector.broadcast %4 : vector<64x1xf32> to vector<64x16xf32>
    %6 = arith.subf %0, %5 : vector<64x16xf32>
    %7 = arith.mulf %6, %6 : vector<64x16xf32>
    %cst_2 = arith.constant dense<0.000000e+00> : vector<64xf32>
    %8 = vector.multi_reduction <add>, %7, %cst_2 [1] : vector<64x16xf32> to vector<64xf32>
    %9 = vector.shape_cast %8 : vector<64xf32> to vector<64x1xf32>
    %cst_3 = arith.constant 1.600000e+01 : f32
    %10 = vector.broadcast %cst_3 : f32 to vector<64x1xf32>
    %11 = arith.divf %9, %10 : vector<64x1xf32>
    %cst_4 = arith.constant 9.99999974E-6 : f32
    %12 = vector.broadcast %cst_4 : f32 to vector<64x1xf32>
    %13 = arith.addf %11, %12 : vector<64x1xf32>
    %14 = math.rsqrt %13 : vector<64x1xf32>
    %15 = vector.broadcast %14 : vector<64x1xf32> to vector<64x16xf32>
    %16 = arith.mulf %6, %15 : vector<64x16xf32>
    %c0_5 = arith.constant 0 : index
    %c0_6 = arith.constant 0 : index
    %17 = vector.load %arg3[%c0_5, %c0_6] : memref<1x16xf32, #tpu.memory_space<vmem>>, vector<1x16xf32>
    %18 = vector.broadcast %17 : vector<1x16xf32> to vector<64x16xf32>
    %19 = arith.mulf %16, %18 : vector<64x16xf32>
    %c0_7 = arith.constant 0 : index
    %c0_8 = arith.constant 0 : index
    %20 = vector.load %arg4[%c0_7, %c0_8] : memref<1x16xf32, #tpu.memory_space<vmem>>, vector<1x16xf32>
    %21 = vector.broadcast %20 : vector<1x16xf32> to vector<64x16xf32>
    %22 = arith.addf %19, %21 : vector<64x16xf32>
    %23 = arith.truncf %22 : vector<64x16xf32> to vector<64x16xbf16>
    %c0_9 = arith.constant 0 : index
    %c0_10 = arith.constant 0 : index
    %24 = vector.load %arg5[%c0_9, %c0_10] : memref<16x16xbf16, #tpu.memory_space<vmem>>, vector<16x16xbf16>
    %cst_11 = arith.constant dense<0.000000e+00> : vector<64x16xf32>
    %25 = tpu.matmul %23, %24, %cst_11 {dimension_numbers = #tpu.dot_dimension_numbers<[1], [0], [0], [1], [0, 0, 1, 1], [], []>} : vector<64x16xbf16>, vector<16x16xbf16>, vector<64x16xf32> -> vector<64x16xf32>
    %c0_12 = arith.constant 0 : index
    %c0_13 = arith.constant 0 : index
    %26 = vector.load %arg2[%c0_12, %c0_13] : memref<64x36xf32, #tpu.memory_space<vmem>>, vector<64x36xf32>
    %27 = arith.truncf %26 : vector<64x36xf32> to vector<64x36xbf16>
    %c0_14 = arith.constant 0 : index
    %c0_15 = arith.constant 0 : index
    %28 = vector.load %arg6[%c0_14, %c0_15] : memref<36x16xbf16, #tpu.memory_space<vmem>>, vector<36x16xbf16>
    %cst_16 = arith.constant dense<0.000000e+00> : vector<64x16xf32>
    %29 = tpu.matmul %27, %28, %cst_16 {dimension_numbers = #tpu.dot_dimension_numbers<[1], [0], [0], [1], [0, 0, 1, 1], [], []>} : vector<64x36xbf16>, vector<36x16xbf16>, vector<64x16xf32> -> vector<64x16xf32>
    %30 = arith.addf %25, %29 : vector<64x16xf32>
    %c0_17 = arith.constant 0 : index
    %c0_18 = arith.constant 0 : index
    %31 = vector.load %arg7[%c0_17, %c0_18] : memref<1x16xf32, #tpu.memory_space<vmem>>, vector<1x16xf32>
    %32 = vector.broadcast %31 : vector<1x16xf32> to vector<64x16xf32>
    %33 = arith.addf %30, %32 : vector<64x16xf32>
    %c0_19 = arith.constant 0 : index
    %c0_20 = arith.constant 0 : index
    %34 = vector.load %arg8[%c0_19, %c0_20] : memref<64x16xf32, #tpu.memory_space<vmem>>, vector<64x16xf32>
    tpu.vector_store %arg8[%c0_19, %c0_20], %33 {strides = array<i32>} : memref<64x16xf32, #tpu.memory_space<vmem>>, vector<64x16xf32>,
    return
  }
  func.func @transform_0(%arg0: i32) -> (i32, i32) {
    %c0_i32 = arith.constant 0 : i32
    %c0_i32_0 = arith.constant 0 : i32
    return %arg0, %c0_i32 : i32, i32
  }
  func.func @transform_1(%arg0: i32) -> (i32, i32) {
    %c0_i32 = arith.constant 0 : i32
    %c0_i32_0 = arith.constant 0 : i32
    return %arg0, %c0_i32 : i32, i32
  }
  func.func @transform_2(%arg0: i32) -> (i32, i32) {
    %c0_i32 = arith.constant 0 : i32
    %c0_i32_0 = arith.constant 0 : i32
    %c0_i32_1 = arith.constant 0 : i32
    return %c0_i32, %c0_i32_0 : i32, i32
  }
  func.func @transform_3(%arg0: i32) -> (i32, i32) {
    %c0_i32 = arith.constant 0 : i32
    %c0_i32_0 = arith.constant 0 : i32
    %c0_i32_1 = arith.constant 0 : i32
    return %c0_i32, %c0_i32_0 : i32, i32
  }
  func.func @transform_4(%arg0: i32) -> (i32, i32) {
    %c0_i32 = arith.constant 0 : i32
    %c0_i32_0 = arith.constant 0 : i32
    %c0_i32_1 = arith.constant 0 : i32
    return %c0_i32, %c0_i32_0 : i32, i32
  }
  func.func @transform_5(%arg0: i32) -> (i32, i32) {
    %c0_i32 = arith.constant 0 : i32
    %c0_i32_0 = arith.constant 0 : i32
    %c0_i32_1 = arith.constant 0 : i32
    return %c0_i32, %c0_i32_0 : i32, i32
  }
  func.func @transform_6(%arg0: i32) -> (i32, i32) {
    %c0_i32 = arith.constant 0 : i32
    %c0_i32_0 = arith.constant 0 : i32
    %c0_i32_1 = arith.constant 0 : i32
    return %c0_i32, %c0_i32_0 : i32, i32
  }
  func.func @transform_7(%arg0: i32) -> (i32, i32) {
    %c0_i32 = arith.constant 0 : i32
    %c0_i32_0 = arith.constant 0 : i32
    return %arg0, %c0_i32 : i32, i32
  }
}

module attributes {stable_mosaic.version = 11 : i64} {
  func.func @_ln_matmul_kernel(%arg0: i32, %arg1: memref<64x16xf32, #tpu.memory_space<vmem>>, %arg2: memref<1x16xf32, #tpu.memory_space<vmem>>, %arg3: memref<1x16xf32, #tpu.memory_space<vmem>>, %arg4: memref<16x4xbf16, #tpu.memory_space<vmem>>, %arg5: memref<1x4xf32, #tpu.memory_space<vmem>>, %arg6: memref<64x4xf32, #tpu.memory_space<vmem>>) attributes {dimension_semantics = [#tpu.dimension_semantics<parallel>], iteration_bounds = array<i64: 1>, scalar_prefetch = 0 : i64, scratch_operands = 0 : i64, tpu.core_type = #tpu.core_type<tc>, window_params = [{transform_indices = @transform_0, window_bounds = array<i64: 64, 16>}, {pipeline_mode = #tpu.pipeline_mode<synchronous>, transform_indices = @transform_1, window_bounds = array<i64: 1, 16>}, {pipeline_mode = #tpu.pipeline_mode<synchronous>, transform_indices = @transform_2, window_bounds = array<i64: 1, 16>}, {pipeline_mode = #tpu.pipeline_mode<synchronous>, transform_indices = @transform_3, window_bounds = array<i64: 16, 4>}, {pipeline_mode = #tpu.pipeline_mode<synchronous>, transform_indices = @transform_4, window_bounds = array<i64: 1, 4>}, {transform_indices = @transform_5, window_bounds = array<i64: 64, 4>}]} {
    %c0 = arith.constant 0 : index
    %c0_0 = arith.constant 0 : index
    %0 = vector.load %arg1[%c0, %c0_0] : memref<64x16xf32, #tpu.memory_space<vmem>>, vector<64x16xf32>
    %cst = arith.constant dense<0.000000e+00> : vector<64xf32>
    %1 = vector.multi_reduction <add>, %0, %cst [1] : vector<64x16xf32> to vector<64xf32>
    %2 = vector.shape_cast %1 : vector<64xf32> to vector<64x1xf32>
    %cst_1 = arith.constant 1.600000e+01 : f32
    %3 = vector.broadcast %cst_1 : f32 to vector<64x1xf32>
    %4 = arith.divf %2, %3 : vector<64x1xf32>
    %5 = vector.broadcast %4 : vector<64x1xf32> to vector<64x16xf32>
    %6 = arith.subf %0, %5 : vector<64x16xf32>
    %7 = arith.mulf %6, %6 : vector<64x16xf32>
    %cst_2 = arith.constant dense<0.000000e+00> : vector<64xf32>
    %8 = vector.multi_reduction <add>, %7, %cst_2 [1] : vector<64x16xf32> to vector<64xf32>
    %9 = vector.shape_cast %8 : vector<64xf32> to vector<64x1xf32>
    %cst_3 = arith.constant 1.600000e+01 : f32
    %10 = vector.broadcast %cst_3 : f32 to vector<64x1xf32>
    %11 = arith.divf %9, %10 : vector<64x1xf32>
    %cst_4 = arith.constant 9.99999974E-6 : f32
    %12 = vector.broadcast %cst_4 : f32 to vector<64x1xf32>
    %13 = arith.addf %11, %12 : vector<64x1xf32>
    %14 = math.rsqrt %13 : vector<64x1xf32>
    %15 = vector.broadcast %14 : vector<64x1xf32> to vector<64x16xf32>
    %16 = arith.mulf %6, %15 : vector<64x16xf32>
    %c0_5 = arith.constant 0 : index
    %c0_6 = arith.constant 0 : index
    %17 = vector.load %arg2[%c0_5, %c0_6] : memref<1x16xf32, #tpu.memory_space<vmem>>, vector<1x16xf32>
    %18 = vector.broadcast %17 : vector<1x16xf32> to vector<64x16xf32>
    %19 = arith.mulf %16, %18 : vector<64x16xf32>
    %c0_7 = arith.constant 0 : index
    %c0_8 = arith.constant 0 : index
    %20 = vector.load %arg3[%c0_7, %c0_8] : memref<1x16xf32, #tpu.memory_space<vmem>>, vector<1x16xf32>
    %21 = vector.broadcast %20 : vector<1x16xf32> to vector<64x16xf32>
    %22 = arith.addf %19, %21 : vector<64x16xf32>
    %23 = arith.truncf %22 : vector<64x16xf32> to vector<64x16xbf16>
    %c0_9 = arith.constant 0 : index
    %c0_10 = arith.constant 0 : index
    %24 = vector.load %arg4[%c0_9, %c0_10] : memref<16x4xbf16, #tpu.memory_space<vmem>>, vector<16x4xbf16>
    %cst_11 = arith.constant dense<0.000000e+00> : vector<64x4xf32>
    %25 = tpu.matmul %23, %24, %cst_11 {dimension_numbers = #tpu.dot_dimension_numbers<[1], [0], [0], [1], [0, 0, 1, 1], [], []>} : vector<64x16xbf16>, vector<16x4xbf16>, vector<64x4xf32> -> vector<64x4xf32>
    %c0_12 = arith.constant 0 : index
    %c0_13 = arith.constant 0 : index
    %26 = vector.load %arg5[%c0_12, %c0_13] : memref<1x4xf32, #tpu.memory_space<vmem>>, vector<1x4xf32>
    %27 = vector.broadcast %26 : vector<1x4xf32> to vector<64x4xf32>
    %28 = arith.addf %25, %27 : vector<64x4xf32>
    %c0_14 = arith.constant 0 : index
    %c0_15 = arith.constant 0 : index
    %29 = vector.load %arg6[%c0_14, %c0_15] : memref<64x4xf32, #tpu.memory_space<vmem>>, vector<64x4xf32>
    tpu.vector_store %arg6[%c0_14, %c0_15], %28 {strides = array<i32>} : memref<64x4xf32, #tpu.memory_space<vmem>>, vector<64x4xf32>,
    return
  }
  func.func @transform_0(%arg0: i32) -> (i32, i32) {
    %c0_i32 = arith.constant 0 : i32
    %c0_i32_0 = arith.constant 0 : i32
    return %arg0, %c0_i32 : i32, i32
  }
  func.func @transform_1(%arg0: i32) -> (i32, i32) {
    %c0_i32 = arith.constant 0 : i32
    %c0_i32_0 = arith.constant 0 : i32
    %c0_i32_1 = arith.constant 0 : i32
    return %c0_i32, %c0_i32_0 : i32, i32
  }
  func.func @transform_2(%arg0: i32) -> (i32, i32) {
    %c0_i32 = arith.constant 0 : i32
    %c0_i32_0 = arith.constant 0 : i32
    %c0_i32_1 = arith.constant 0 : i32
    return %c0_i32, %c0_i32_0 : i32, i32
  }
  func.func @transform_3(%arg0: i32) -> (i32, i32) {
    %c0_i32 = arith.constant 0 : i32
    %c0_i32_0 = arith.constant 0 : i32
    %c0_i32_1 = arith.constant 0 : i32
    return %c0_i32, %c0_i32_0 : i32, i32
  }
  func.func @transform_4(%arg0: i32) -> (i32, i32) {
    %c0_i32 = arith.constant 0 : i32
    %c0_i32_0 = arith.constant 0 : i32
    %c0_i32_1 = arith.constant 0 : i32
    return %c0_i32, %c0_i32_0 : i32, i32
  }
  func.func @transform_5(%arg0: i32) -> (i32, i32) {
    %c0_i32 = arith.constant 0 : i32
    %c0_i32_0 = arith.constant 0 : i32
    return %arg0, %c0_i32 : i32, i32
  }
}

module attributes {stable_mosaic.version = 11 : i64} {
  func.func @_row_attn_kernel(%arg0: i32, %arg1: i32, %arg2: memref<1x1x8x32xbf16, #tpu.memory_space<vmem>>, %arg3: memref<1x1x8x32xbf16, #tpu.memory_space<vmem>>, %arg4: memref<1x1x8x32xbf16, #tpu.memory_space<vmem>>, %arg5: memref<1x1x8x32xbf16, #tpu.memory_space<vmem>>, %arg6: memref<1x1x8x32xbf16, #tpu.memory_space<vmem>>, %arg7: memref<1x1x8x8xbf16, #tpu.memory_space<vmem>>, %arg8: memref<1x1x8x8xf32, #tpu.memory_space<vmem>>, %arg9: memref<8x32xf32, #tpu.memory_space<vmem>>, %arg10: memref<4x32xf32, #tpu.memory_space<vmem>>, %arg11: memref<1x1x8x32xbf16, #tpu.memory_space<vmem>>) attributes {dimension_semantics = [#tpu.dimension_semantics<parallel>, #tpu.dimension_semantics<parallel>], iteration_bounds = array<i64: 1, 4>, scalar_prefetch = 0 : i64, scratch_operands = 0 : i64, tpu.core_type = #tpu.core_type<tc>, window_params = [{transform_indices = @transform_0, window_bounds = array<i64: 1, 1, 8, 32>}, {transform_indices = @transform_1, window_bounds = array<i64: 1, 1, 8, 32>}, {transform_indices = @transform_2, window_bounds = array<i64: 1, 1, 8, 32>}, {transform_indices = @transform_3, window_bounds = array<i64: 1, 1, 8, 32>}, {transform_indices = @transform_4, window_bounds = array<i64: 1, 1, 8, 32>}, {transform_indices = @transform_5, window_bounds = array<i64: 1, 1, 8, 8>}, {transform_indices = @transform_6, window_bounds = array<i64: 1, 1, 8, 8>}, {pipeline_mode = #tpu.pipeline_mode<synchronous>, transform_indices = @transform_7, window_bounds = array<i64: 8, 32>}, {pipeline_mode = #tpu.pipeline_mode<synchronous>, transform_indices = @transform_8, window_bounds = array<i64: 4, 32>}, {transform_indices = @transform_9, window_bounds = array<i64: 1, 1, 8, 32>}]} {
    %c0 = arith.constant 0 : index
    %c0_0 = arith.constant 0 : index
    %c0_1 = arith.constant 0 : index
    %c0_2 = arith.constant 0 : index
    %0 = vector.load %arg2[%c0, %c0_0, %c0_1, %c0_2] : memref<1x1x8x32xbf16, #tpu.memory_space<vmem>>, vector<1x1x8x32xbf16>
    %1 = vector.shape_cast %0 : vector<1x1x8x32xbf16> to vector<8x32xbf16>
    %c0_3 = arith.constant 0 : index
    %c0_4 = arith.constant 0 : index
    %c0_5 = arith.constant 0 : index
    %c0_6 = arith.constant 0 : index
    %2 = vector.load %arg3[%c0_3, %c0_4, %c0_5, %c0_6] : memref<1x1x8x32xbf16, #tpu.memory_space<vmem>>, vector<1x1x8x32xbf16>
    %3 = vector.shape_cast %2 : vector<1x1x8x32xbf16> to vector<8x32xbf16>
    %c0_7 = arith.constant 0 : index
    %c0_8 = arith.constant 0 : index
    %c0_9 = arith.constant 0 : index
    %c0_10 = arith.constant 0 : index
    %4 = vector.load %arg4[%c0_7, %c0_8, %c0_9, %c0_10] : memref<1x1x8x32xbf16, #tpu.memory_space<vmem>>, vector<1x1x8x32xbf16>
    %5 = vector.shape_cast %4 : vector<1x1x8x32xbf16> to vector<8x32xbf16>
    %c0_11 = arith.constant 0 : index
    %c0_12 = arith.constant 0 : index
    %c0_13 = arith.constant 0 : index
    %c0_14 = arith.constant 0 : index
    %6 = vector.load %arg5[%c0_11, %c0_12, %c0_13, %c0_14] : memref<1x1x8x32xbf16, #tpu.memory_space<vmem>>, vector<1x1x8x32xbf16>
    %7 = vector.shape_cast %6 : vector<1x1x8x32xbf16> to vector<8x32xbf16>
    %8 = arith.extf %7 : vector<8x32xbf16> to vector<8x32xf32>
    %9 = arith.negf %8 : vector<8x32xf32>
    %10 = math.exp %9 : vector<8x32xf32>
    %cst = arith.constant 1.000000e+00 : f32
    %11 = vector.broadcast %cst : f32 to vector<8x32xf32>
    %12 = arith.addf %11, %10 : vector<8x32xf32>
    %13 = arith.divf %11, %12 : vector<8x32xf32>
    %c0_15 = arith.constant 0 : index
    %c0_16 = arith.constant 0 : index
    %c0_17 = arith.constant 0 : index
    %c0_18 = arith.constant 0 : index
    %14 = vector.load %arg6[%c0_15, %c0_16, %c0_17, %c0_18] : memref<1x1x8x32xbf16, #tpu.memory_space<vmem>>, vector<1x1x8x32xbf16>
    %15 = vector.shape_cast %14 : vector<1x1x8x32xbf16> to vector<8x32xbf16>
    %16 = arith.extf %15 : vector<8x32xbf16> to vector<8x32xf32>
    %c0_19 = arith.constant 0 : index
    %c0_20 = arith.constant 0 : index
    %c0_21 = arith.constant 0 : index
    %c0_22 = arith.constant 0 : index
    %17 = vector.load %arg7[%c0_19, %c0_20, %c0_21, %c0_22] : memref<1x1x8x8xbf16, #tpu.memory_space<vmem>>, vector<1x1x8x8xbf16>
    %18 = vector.shape_cast %17 : vector<1x1x8x8xbf16> to vector<8x8xbf16>
    %19 = arith.extf %18 : vector<8x8xbf16> to vector<8x8xf32>
    %c0_23 = arith.constant 0 : index
    %c0_24 = arith.constant 0 : index
    %20 = vector.load %arg9[%c0_23, %c0_24] : memref<8x32xf32, #tpu.memory_space<vmem>>, vector<8x32xf32>
    %c0_25 = arith.constant 0 : index
    %c0_26 = arith.constant 0 : index
    %21 = vector.load %arg10[%c0_25, %c0_26] : memref<4x32xf32, #tpu.memory_space<vmem>>, vector<4x32xf32>
    %cst_27 = arith.constant dense<0.000000e+00> : vector<8x32xf32>
    %22 = tpu.matmul %19, %20, %cst_27 {dimension_numbers = #tpu.dot_dimension_numbers<[1], [0], [0], [1], [0, 0, 1, 1], [], []>} : vector<8x8xf32>, vector<8x32xf32>, vector<8x32xf32> -> vector<8x32xf32>
    %23 = arith.mulf %22, %16 : vector<8x32xf32>
    %cst_28 = arith.constant dense<0.000000e+00> : vector<8x4xf32>
    %24 = tpu.matmul %23, %21, %cst_28 {dimension_numbers = #tpu.dot_dimension_numbers<[1], [1], [0], [0], [0, 0, 1, 0], [], []>} : vector<8x32xf32>, vector<4x32xf32>, vector<8x4xf32> -> vector<8x4xf32>
    %cst_29 = arith.constant 0.353553385 : f32
    %25 = vector.broadcast %cst_29 : f32 to vector<8x4xf32>
    %26 = arith.mulf %24, %25 : vector<8x4xf32>
    %cst_30 = arith.constant dense<0xFF800000> : vector<8xf32>
    %27 = vector.multi_reduction <maximumf>, %26, %cst_30 [1] : vector<8x4xf32> to vector<8xf32>
    %28 = vector.shape_cast %27 : vector<8xf32> to vector<8x1xf32>
    %29 = vector.broadcast %28 : vector<8x1xf32> to vector<8x4xf32>
    %30 = arith.subf %26, %29 : vector<8x4xf32>
    %31 = math.exp %30 : vector<8x4xf32>
    %cst_31 = arith.constant dense<0.000000e+00> : vector<8xf32>
    %32 = vector.multi_reduction <add>, %31, %cst_31 [1] : vector<8x4xf32> to vector<8xf32>
    %33 = vector.shape_cast %32 : vector<8xf32> to vector<8x1xf32>
    %34 = tpu.reciprocal %33 {approx = true} : vector<8x1xf32> -> vector<8x1xf32>
    %35 = vector.broadcast %34 : vector<8x1xf32> to vector<8x4xf32>
    %36 = arith.mulf %31, %35 : vector<8x4xf32>
    %cst_32 = arith.constant dense<0.000000e+00> : vector<8x32xf32>
    %37 = tpu.matmul %36, %21, %cst_32 {dimension_numbers = #tpu.dot_dimension_numbers<[1], [0], [0], [1], [0, 0, 1, 1], [], []>} : vector<8x4xf32>, vector<4x32xf32>, vector<8x32xf32> -> vector<8x32xf32>
    %38 = arith.extf %1 : vector<8x32xbf16> to vector<8x32xf32>
    %39 = arith.mulf %38, %37 : vector<8x32xf32>
    %40 = arith.truncf %39 : vector<8x32xf32> to vector<8x32xbf16>
    %cst_33 = arith.constant dense<0.000000e+00> : vector<8x8xf32>
    %41 = tpu.matmul %40, %3, %cst_33 {dimension_numbers = #tpu.dot_dimension_numbers<[1], [1], [0], [0], [0, 0, 1, 0], [], []>} : vector<8x32xbf16>, vector<8x32xbf16>, vector<8x8xf32> -> vector<8x8xf32>
    %cst_34 = arith.constant 0.353553385 : f32
    %42 = vector.broadcast %cst_34 : f32 to vector<8x8xf32>
    %43 = arith.mulf %41, %42 : vector<8x8xf32>
    %c0_35 = arith.constant 0 : index
    %c0_36 = arith.constant 0 : index
    %c0_37 = arith.constant 0 : index
    %c0_38 = arith.constant 0 : index
    %44 = vector.load %arg8[%c0_35, %c0_36, %c0_37, %c0_38] : memref<1x1x8x8xf32, #tpu.memory_space<vmem>>, vector<1x1x8x8xf32>
    %45 = vector.shape_cast %44 : vector<1x1x8x8xf32> to vector<8x8xf32>
    %46 = arith.addf %43, %45 : vector<8x8xf32>
    %cst_39 = arith.constant dense<0xFF800000> : vector<8xf32>
    %47 = vector.multi_reduction <maximumf>, %46, %cst_39 [1] : vector<8x8xf32> to vector<8xf32>
    %48 = vector.shape_cast %47 : vector<8xf32> to vector<8x1xf32>
    %49 = vector.broadcast %48 : vector<8x1xf32> to vector<8x8xf32>
    %50 = arith.subf %46, %49 : vector<8x8xf32>
    %51 = math.exp %50 : vector<8x8xf32>
    %cst_40 = arith.constant dense<0.000000e+00> : vector<8xf32>
    %52 = vector.multi_reduction <add>, %51, %cst_40 [1] : vector<8x8xf32> to vector<8xf32>
    %53 = vector.shape_cast %52 : vector<8xf32> to vector<8x1xf32>
    %54 = tpu.reciprocal %53 {approx = true} : vector<8x1xf32> -> vector<8x1xf32>
    %55 = vector.broadcast %54 : vector<8x1xf32> to vector<8x8xf32>
    %56 = arith.mulf %51, %55 : vector<8x8xf32>
    %57 = arith.truncf %56 : vector<8x8xf32> to vector<8x8xbf16>
    %cst_41 = arith.constant dense<0.000000e+00> : vector<8x32xf32>
    %58 = tpu.matmul %57, %5, %cst_41 {dimension_numbers = #tpu.dot_dimension_numbers<[1], [0], [0], [1], [0, 0, 1, 1], [], []>} : vector<8x8xbf16>, vector<8x32xbf16>, vector<8x32xf32> -> vector<8x32xf32>
    %59 = arith.mulf %13, %58 : vector<8x32xf32>
    %60 = arith.truncf %59 : vector<8x32xf32> to vector<8x32xbf16>
    %c0_42 = arith.constant 0 : index
    %c0_43 = arith.constant 0 : index
    %c0_44 = arith.constant 0 : index
    %c0_45 = arith.constant 0 : index
    %61 = vector.load %arg11[%c0_42, %c0_43, %c0_44, %c0_45] : memref<1x1x8x32xbf16, #tpu.memory_space<vmem>>, vector<1x1x8x32xbf16>
    %62 = vector.shape_cast %61 : vector<1x1x8x32xbf16> to vector<8x32xbf16>
    %63 = vector.shape_cast %60 : vector<8x32xbf16> to vector<1x1x8x32xbf16>
    tpu.vector_store %arg11[%c0_42, %c0_43, %c0_44, %c0_45], %63 {strides = array<i32>} : memref<1x1x8x32xbf16, #tpu.memory_space<vmem>>, vector<1x1x8x32xbf16>,
    return
  }
  func.func @transform_0(%arg0: i32, %arg1: i32) -> (i32, i32, i32, i32) {
    %c0_i32 = arith.constant 0 : i32
    %c0_i32_0 = arith.constant 0 : i32
    %c0_i32_1 = arith.constant 0 : i32
    return %arg0, %arg1, %c0_i32, %c0_i32_0 : i32, i32, i32, i32
  }
  func.func @transform_1(%arg0: i32, %arg1: i32) -> (i32, i32, i32, i32) {
    %c0_i32 = arith.constant 0 : i32
    %c0_i32_0 = arith.constant 0 : i32
    %c0_i32_1 = arith.constant 0 : i32
    return %arg0, %arg1, %c0_i32, %c0_i32_0 : i32, i32, i32, i32
  }
  func.func @transform_2(%arg0: i32, %arg1: i32) -> (i32, i32, i32, i32) {
    %c0_i32 = arith.constant 0 : i32
    %c0_i32_0 = arith.constant 0 : i32
    %c0_i32_1 = arith.constant 0 : i32
    return %arg0, %arg1, %c0_i32, %c0_i32_0 : i32, i32, i32, i32
  }
  func.func @transform_3(%arg0: i32, %arg1: i32) -> (i32, i32, i32, i32) {
    %c0_i32 = arith.constant 0 : i32
    %c0_i32_0 = arith.constant 0 : i32
    %c0_i32_1 = arith.constant 0 : i32
    return %arg0, %arg1, %c0_i32, %c0_i32_0 : i32, i32, i32, i32
  }
  func.func @transform_4(%arg0: i32, %arg1: i32) -> (i32, i32, i32, i32) {
    %c0_i32 = arith.constant 0 : i32
    %c0_i32_0 = arith.constant 0 : i32
    %c0_i32_1 = arith.constant 0 : i32
    return %arg0, %arg1, %c0_i32, %c0_i32_0 : i32, i32, i32, i32
  }
  func.func @transform_5(%arg0: i32, %arg1: i32) -> (i32, i32, i32, i32) {
    %c0_i32 = arith.constant 0 : i32
    %c0_i32_0 = arith.constant 0 : i32
    %c0_i32_1 = arith.constant 0 : i32
    return %arg0, %arg1, %c0_i32, %c0_i32_0 : i32, i32, i32, i32
  }
  func.func @transform_6(%arg0: i32, %arg1: i32) -> (i32, i32, i32, i32) {
    %c0_i32 = arith.constant 0 : i32
    %c0_i32_0 = arith.constant 0 : i32
    %c0_i32_1 = arith.constant 0 : i32
    return %arg0, %arg1, %c0_i32, %c0_i32_0 : i32, i32, i32, i32
  }
  func.func @transform_7(%arg0: i32, %arg1: i32) -> (i32, i32) {
    %c0_i32 = arith.constant 0 : i32
    %c0_i32_0 = arith.constant 0 : i32
    %c0_i32_1 = arith.constant 0 : i32
    return %c0_i32, %c0_i32_0 : i32, i32
  }
  func.func @transform_8(%arg0: i32, %arg1: i32) -> (i32, i32) {
    %c0_i32 = arith.constant 0 : i32
    %c0_i32_0 = arith.constant 0 : i32
    %c0_i32_1 = arith.constant 0 : i32
    return %c0_i32, %c0_i32_0 : i32, i32
  }
  func.func @transform_9(%arg0: i32, %arg1: i32) -> (i32, i32, i32, i32) {
    %c0_i32 = arith.constant 0 : i32
    %c0_i32_0 = arith.constant 0 : i32
    %c0_i32_1 = arith.constant 0 : i32
    return %arg0, %arg1, %c0_i32, %c0_i32_0 : i32, i32, i32, i32
  }
}

module attributes {stable_mosaic.version = 11 : i64} {
  func.func @_linear_residual_kernel(%arg0: i32, %arg1: memref<32x32xbf16, #tpu.memory_space<vmem>>, %arg2: memref<32x32xf32, #tpu.memory_space<vmem>>, %arg3: memref<32x32xbf16, #tpu.memory_space<vmem>>, %arg4: memref<1x32xf32, #tpu.memory_space<vmem>>, %arg5: memref<32x32xf32, #tpu.memory_space<vmem>>) attributes {dimension_semantics = [#tpu.dimension_semantics<parallel>], iteration_bounds = array<i64: 1>, scalar_prefetch = 0 : i64, scratch_operands = 0 : i64, tpu.core_type = #tpu.core_type<tc>, window_params = [{transform_indices = @transform_0, window_bounds = array<i64: 32, 32>}, {transform_indices = @transform_1, window_bounds = array<i64: 32, 32>}, {pipeline_mode = #tpu.pipeline_mode<synchronous>, transform_indices = @transform_2, window_bounds = array<i64: 32, 32>}, {pipeline_mode = #tpu.pipeline_mode<synchronous>, transform_indices = @transform_3, window_bounds = array<i64: 1, 32>}, {transform_indices = @transform_4, window_bounds = array<i64: 32, 32>}]} {
    %c0 = arith.constant 0 : index
    %c0_0 = arith.constant 0 : index
    %0 = vector.load %arg1[%c0, %c0_0] : memref<32x32xbf16, #tpu.memory_space<vmem>>, vector<32x32xbf16>
    %c0_1 = arith.constant 0 : index
    %c0_2 = arith.constant 0 : index
    %1 = vector.load %arg3[%c0_1, %c0_2] : memref<32x32xbf16, #tpu.memory_space<vmem>>, vector<32x32xbf16>
    %cst = arith.constant dense<0.000000e+00> : vector<32x32xf32>
    %2 = tpu.matmul %0, %1, %cst {dimension_numbers = #tpu.dot_dimension_numbers<[1], [0], [0], [1], [0, 0, 1, 1], [], []>} : vector<32x32xbf16>, vector<32x32xbf16>, vector<32x32xf32> -> vector<32x32xf32>
    %c0_3 = arith.constant 0 : index
    %c0_4 = arith.constant 0 : index
    %3 = vector.load %arg2[%c0_3, %c0_4] : memref<32x32xf32, #tpu.memory_space<vmem>>, vector<32x32xf32>
    %4 = arith.addf %3, %2 : vector<32x32xf32>
    %c0_5 = arith.constant 0 : index
    %c0_6 = arith.constant 0 : index
    %5 = vector.load %arg4[%c0_5, %c0_6] : memref<1x32xf32, #tpu.memory_space<vmem>>, vector<1x32xf32>
    %6 = vector.broadcast %5 : vector<1x32xf32> to vector<32x32xf32>
    %7 = arith.addf %4, %6 : vector<32x32xf32>
    %c0_7 = arith.constant 0 : index
    %c0_8 = arith.constant 0 : index
    %8 = vector.load %arg5[%c0_7, %c0_8] : memref<32x32xf32, #tpu.memory_space<vmem>>, vector<32x32xf32>
    tpu.vector_store %arg5[%c0_7, %c0_8], %7 {strides = array<i32>} : memref<32x32xf32, #tpu.memory_space<vmem>>, vector<32x32xf32>,
    return
  }
  func.func @transform_0(%arg0: i32) -> (i32, i32) {
    %c0_i32 = arith.constant 0 : i32
    %c0_i32_0 = arith.constant 0 : i32
    return %arg0, %c0_i32 : i32, i32
  }
  func.func @transform_1(%arg0: i32) -> (i32, i32) {
    %c0_i32 = arith.constant 0 : i32
    %c0_i32_0 = arith.constant 0 : i32
    return %arg0, %c0_i32 : i32, i32
  }
  func.func @transform_2(%arg0: i32) -> (i32, i32) {
    %c0_i32 = arith.constant 0 : i32
    %c0_i32_0 = arith.constant 0 : i32
    %c0_i32_1 = arith.constant 0 : i32
    return %c0_i32, %c0_i32_0 : i32, i32
  }
  func.func @transform_3(%arg0: i32) -> (i32, i32) {
    %c0_i32 = arith.constant 0 : i32
    %c0_i32_0 = arith.constant 0 : i32
    %c0_i32_1 = arith.constant 0 : i32
    return %c0_i32, %c0_i32_0 : i32, i32
  }
  func.func @transform_4(%arg0: i32) -> (i32, i32) {
    %c0_i32 = arith.constant 0 : i32
    %c0_i32_0 = arith.constant 0 : i32
    return %arg0, %c0_i32 : i32, i32
  }
}

module attributes {stable_mosaic.version = 11 : i64} {
  func.func @_ln_matmul_kernel(%arg0: i32, %arg1: memref<32x32xf32, #tpu.memory_space<vmem>>, %arg2: memref<1x32xf32, #tpu.memory_space<vmem>>, %arg3: memref<1x32xf32, #tpu.memory_space<vmem>>, %arg4: memref<32x128xbf16, #tpu.memory_space<vmem>>, %arg5: memref<1x128xf32, #tpu.memory_space<vmem>>, %arg6: memref<32x128xbf16, #tpu.memory_space<vmem>>) attributes {dimension_semantics = [#tpu.dimension_semantics<parallel>], iteration_bounds = array<i64: 1>, scalar_prefetch = 0 : i64, scratch_operands = 0 : i64, tpu.core_type = #tpu.core_type<tc>, window_params = [{transform_indices = @transform_0, window_bounds = array<i64: 32, 32>}, {pipeline_mode = #tpu.pipeline_mode<synchronous>, transform_indices = @transform_1, window_bounds = array<i64: 1, 32>}, {pipeline_mode = #tpu.pipeline_mode<synchronous>, transform_indices = @transform_2, window_bounds = array<i64: 1, 32>}, {pipeline_mode = #tpu.pipeline_mode<synchronous>, transform_indices = @transform_3, window_bounds = array<i64: 32, 128>}, {pipeline_mode = #tpu.pipeline_mode<synchronous>, transform_indices = @transform_4, window_bounds = array<i64: 1, 128>}, {transform_indices = @transform_5, window_bounds = array<i64: 32, 128>}]} {
    %c0 = arith.constant 0 : index
    %c0_0 = arith.constant 0 : index
    %0 = vector.load %arg1[%c0, %c0_0] : memref<32x32xf32, #tpu.memory_space<vmem>>, vector<32x32xf32>
    %cst = arith.constant dense<0.000000e+00> : vector<32xf32>
    %1 = vector.multi_reduction <add>, %0, %cst [1] : vector<32x32xf32> to vector<32xf32>
    %2 = vector.shape_cast %1 : vector<32xf32> to vector<32x1xf32>
    %cst_1 = arith.constant 3.200000e+01 : f32
    %3 = vector.broadcast %cst_1 : f32 to vector<32x1xf32>
    %4 = arith.divf %2, %3 : vector<32x1xf32>
    %5 = vector.broadcast %4 : vector<32x1xf32> to vector<32x32xf32>
    %6 = arith.subf %0, %5 : vector<32x32xf32>
    %7 = arith.mulf %6, %6 : vector<32x32xf32>
    %cst_2 = arith.constant dense<0.000000e+00> : vector<32xf32>
    %8 = vector.multi_reduction <add>, %7, %cst_2 [1] : vector<32x32xf32> to vector<32xf32>
    %9 = vector.shape_cast %8 : vector<32xf32> to vector<32x1xf32>
    %cst_3 = arith.constant 3.200000e+01 : f32
    %10 = vector.broadcast %cst_3 : f32 to vector<32x1xf32>
    %11 = arith.divf %9, %10 : vector<32x1xf32>
    %cst_4 = arith.constant 9.99999974E-6 : f32
    %12 = vector.broadcast %cst_4 : f32 to vector<32x1xf32>
    %13 = arith.addf %11, %12 : vector<32x1xf32>
    %14 = math.rsqrt %13 : vector<32x1xf32>
    %15 = vector.broadcast %14 : vector<32x1xf32> to vector<32x32xf32>
    %16 = arith.mulf %6, %15 : vector<32x32xf32>
    %c0_5 = arith.constant 0 : index
    %c0_6 = arith.constant 0 : index
    %17 = vector.load %arg2[%c0_5, %c0_6] : memref<1x32xf32, #tpu.memory_space<vmem>>, vector<1x32xf32>
    %18 = vector.broadcast %17 : vector<1x32xf32> to vector<32x32xf32>
    %19 = arith.mulf %16, %18 : vector<32x32xf32>
    %c0_7 = arith.constant 0 : index
    %c0_8 = arith.constant 0 : index
    %20 = vector.load %arg3[%c0_7, %c0_8] : memref<1x32xf32, #tpu.memory_space<vmem>>, vector<1x32xf32>
    %21 = vector.broadcast %20 : vector<1x32xf32> to vector<32x32xf32>
    %22 = arith.addf %19, %21 : vector<32x32xf32>
    %23 = arith.truncf %22 : vector<32x32xf32> to vector<32x32xbf16>
    %c0_9 = arith.constant 0 : index
    %c0_10 = arith.constant 0 : index
    %24 = vector.load %arg4[%c0_9, %c0_10] : memref<32x128xbf16, #tpu.memory_space<vmem>>, vector<32x128xbf16>
    %cst_11 = arith.constant dense<0.000000e+00> : vector<32x128xf32>
    %25 = tpu.matmul %23, %24, %cst_11 {dimension_numbers = #tpu.dot_dimension_numbers<[1], [0], [0], [1], [0, 0, 1, 1], [], []>} : vector<32x32xbf16>, vector<32x128xbf16>, vector<32x128xf32> -> vector<32x128xf32>
    %c0_12 = arith.constant 0 : index
    %c0_13 = arith.constant 0 : index
    %26 = vector.load %arg5[%c0_12, %c0_13] : memref<1x128xf32, #tpu.memory_space<vmem>>, vector<1x128xf32>
    %27 = vector.broadcast %26 : vector<1x128xf32> to vector<32x128xf32>
    %28 = arith.addf %25, %27 : vector<32x128xf32>
    %29 = arith.truncf %28 : vector<32x128xf32> to vector<32x128xbf16>
    %c0_14 = arith.constant 0 : index
    %c0_15 = arith.constant 0 : index
    %30 = vector.load %arg6[%c0_14, %c0_15] : memref<32x128xbf16, #tpu.memory_space<vmem>>, vector<32x128xbf16>
    tpu.vector_store %arg6[%c0_14, %c0_15], %29 {strides = array<i32>} : memref<32x128xbf16, #tpu.memory_space<vmem>>, vector<32x128xbf16>,
    return
  }
  func.func @transform_0(%arg0: i32) -> (i32, i32) {
    %c0_i32 = arith.constant 0 : i32
    %c0_i32_0 = arith.constant 0 : i32
    return %arg0, %c0_i32 : i32, i32
  }
  func.func @transform_1(%arg0: i32) -> (i32, i32) {
    %c0_i32 = arith.constant 0 : i32
    %c0_i32_0 = arith.constant 0 : i32
    %c0_i32_1 = arith.constant 0 : i32
    return %c0_i32, %c0_i32_0 : i32, i32
  }
  func.func @transform_2(%arg0: i32) -> (i32, i32) {
    %c0_i32 = arith.constant 0 : i32
    %c0_i32_0 = arith.constant 0 : i32
    %c0_i32_1 = arith.constant 0 : i32
    return %c0_i32, %c0_i32_0 : i32, i32
  }
  func.func @transform_3(%arg0: i32) -> (i32, i32) {
    %c0_i32 = arith.constant 0 : i32
    %c0_i32_0 = arith.constant 0 : i32
    %c0_i32_1 = arith.constant 0 : i32
    return %c0_i32, %c0_i32_0 : i32, i32
  }
  func.func @transform_4(%arg0: i32) -> (i32, i32) {
    %c0_i32 = arith.constant 0 : i32
    %c0_i32_0 = arith.constant 0 : i32
    %c0_i32_1 = arith.constant 0 : i32
    return %c0_i32, %c0_i32_0 : i32, i32
  }
  func.func @transform_5(%arg0: i32) -> (i32, i32) {
    %c0_i32 = arith.constant 0 : i32
    %c0_i32_0 = arith.constant 0 : i32
    return %arg0, %c0_i32 : i32, i32
  }
}

module attributes {stable_mosaic.version = 11 : i64} {
  func.func @_col_attn_kernel(%arg0: i32, %arg1: i32, %arg2: memref<1x1x8x4x8xbf16, #tpu.memory_space<vmem>>, %arg3: memref<1x1x8x4x8xbf16, #tpu.memory_space<vmem>>, %arg4: memref<1x1x8x4x8xbf16, #tpu.memory_space<vmem>>, %arg5: memref<1x1x8x4x8xbf16, #tpu.memory_space<vmem>>, %arg6: memref<1x1x8x4x8xbf16, #tpu.memory_space<vmem>>) attributes {dimension_semantics = [#tpu.dimension_semantics<parallel>, #tpu.dimension_semantics<parallel>], iteration_bounds = array<i64: 1, 4>, scalar_prefetch = 0 : i64, scratch_operands = 0 : i64, tpu.core_type = #tpu.core_type<tc>, window_params = [{transform_indices = @transform_0, window_bounds = array<i64: 1, 1, 8, 4, 8>}, {transform_indices = @transform_1, window_bounds = array<i64: 1, 1, 8, 4, 8>}, {transform_indices = @transform_2, window_bounds = array<i64: 1, 1, 8, 4, 8>}, {transform_indices = @transform_3, window_bounds = array<i64: 1, 1, 8, 4, 8>}, {transform_indices = @transform_4, window_bounds = array<i64: 1, 1, 8, 4, 8>}]} {
    %c0 = arith.constant 0 : index
    %c0_0 = arith.constant 0 : index
    %c0_1 = arith.constant 0 : index
    %c0_2 = arith.constant 0 : index
    %c0_3 = arith.constant 0 : index
    %0 = vector.load %arg2[%c0, %c0_0, %c0_1, %c0_2, %c0_3] : memref<1x1x8x4x8xbf16, #tpu.memory_space<vmem>>, vector<1x1x8x4x8xbf16>
    %1 = vector.shape_cast %0 : vector<1x1x8x4x8xbf16> to vector<8x4x8xbf16>
    %c0_4 = arith.constant 0 : index
    %c0_5 = arith.constant 0 : index
    %c0_6 = arith.constant 0 : index
    %c0_7 = arith.constant 0 : index
    %c0_8 = arith.constant 0 : index
    %2 = vector.load %arg3[%c0_4, %c0_5, %c0_6, %c0_7, %c0_8] : memref<1x1x8x4x8xbf16, #tpu.memory_space<vmem>>, vector<1x1x8x4x8xbf16>
    %3 = vector.shape_cast %2 : vector<1x1x8x4x8xbf16> to vector<8x4x8xbf16>
    %c0_9 = arith.constant 0 : index
    %c0_10 = arith.constant 0 : index
    %c0_11 = arith.constant 0 : index
    %c0_12 = arith.constant 0 : index
    %c0_13 = arith.constant 0 : index
    %4 = vector.load %arg4[%c0_9, %c0_10, %c0_11, %c0_12, %c0_13] : memref<1x1x8x4x8xbf16, #tpu.memory_space<vmem>>, vector<1x1x8x4x8xbf16>
    %5 = vector.shape_cast %4 : vector<1x1x8x4x8xbf16> to vector<8x4x8xbf16>
    %c0_14 = arith.constant 0 : index
    %c0_15 = arith.constant 0 : index
    %c0_16 = arith.constant 0 : index
    %c0_17 = arith.constant 0 : index
    %c0_18 = arith.constant 0 : index
    %6 = vector.load %arg5[%c0_14, %c0_15, %c0_16, %c0_17, %c0_18] : memref<1x1x8x4x8xbf16, #tpu.memory_space<vmem>>, vector<1x1x8x4x8xbf16>
    %7 = vector.shape_cast %6 : vector<1x1x8x4x8xbf16> to vector<8x4x8xbf16>
    %8 = arith.extf %7 : vector<8x4x8xbf16> to vector<8x4x8xf32>
    %9 = arith.negf %8 : vector<8x4x8xf32>
    %10 = math.exp %9 : vector<8x4x8xf32>
    %cst = arith.constant 1.000000e+00 : f32
    %11 = vector.broadcast %cst : f32 to vector<8x4x8xf32>
    %12 = arith.addf %11, %10 : vector<8x4x8xf32>
    %13 = arith.divf %11, %12 : vector<8x4x8xf32>
    "tpu.trace_start"() <{level = 10 : i32, message = "ind,imd->inm"}> : () -> ()
    %cst_19 = arith.constant dense<0.000000e+00> : vector<8x4x4xf32>
    %14 = tpu.matmul %1, %3, %cst_19 {dimension_numbers = #tpu.dot_dimension_numbers<[2], [2], [1], [1], [0, 0, 0, 1, 1, 1], [0], [0]>} : vector<8x4x8xbf16>, vector<8x4x8xbf16>, vector<8x4x4xf32> -> vector<8x4x4xf32>
    "tpu.trace_stop"() : () -> ()
    %cst_20 = arith.constant 0.353553385 : f32
    %15 = vector.broadcast %cst_20 : f32 to vector<8x4x4xf32>
    %16 = arith.mulf %14, %15 : vector<8x4x4xf32>
    %cst_21 = arith.constant dense<0xFF800000> : vector<8x4xf32>
    %17 = vector.multi_reduction <maximumf>, %16, %cst_21 [2] : vector<8x4x4xf32> to vector<8x4xf32>
    %18 = vector.shape_cast %17 : vector<8x4xf32> to vector<8x4x1xf32>
    %19 = vector.broadcast %18 : vector<8x4x1xf32> to vector<8x4x4xf32>
    %20 = arith.subf %16, %19 : vector<8x4x4xf32>
    %21 = math.exp %20 : vector<8x4x4xf32>
    %cst_22 = arith.constant dense<0.000000e+00> : vector<8x4xf32>
    %22 = vector.multi_reduction <add>, %21, %cst_22 [2] : vector<8x4x4xf32> to vector<8x4xf32>
    %23 = vector.shape_cast %22 : vector<8x4xf32> to vector<8x4x1xf32>
    %24 = tpu.reciprocal %23 {approx = true} : vector<8x4x1xf32> -> vector<8x4x1xf32>
    %25 = vector.broadcast %24 : vector<8x4x1xf32> to vector<8x4x4xf32>
    %26 = arith.mulf %21, %25 : vector<8x4x4xf32>
    %27 = arith.truncf %26 : vector<8x4x4xf32> to vector<8x4x4xbf16>
    "tpu.trace_start"() <{level = 10 : i32, message = "inm,imd->ind"}> : () -> ()
    %cst_23 = arith.constant dense<0.000000e+00> : vector<8x4x8xf32>
    %28 = tpu.matmul %27, %5, %cst_23 {dimension_numbers = #tpu.dot_dimension_numbers<[2], [1], [1], [2], [0, 0, 0, 1, 1, 2], [0], [0]>} : vector<8x4x4xbf16>, vector<8x4x8xbf16>, vector<8x4x8xf32> -> vector<8x4x8xf32>
    "tpu.trace_stop"() : () -> ()
    %29 = arith.mulf %13, %28 : vector<8x4x8xf32>
    %30 = arith.truncf %29 : vector<8x4x8xf32> to vector<8x4x8xbf16>
    %c0_24 = arith.constant 0 : index
    %c0_25 = arith.constant 0 : index
    %c0_26 = arith.constant 0 : index
    %c0_27 = arith.constant 0 : index
    %c0_28 = arith.constant 0 : index
    %31 = vector.load %arg6[%c0_24, %c0_25, %c0_26, %c0_27, %c0_28] : memref<1x1x8x4x8xbf16, #tpu.memory_space<vmem>>, vector<1x1x8x4x8xbf16>
    %32 = vector.shape_cast %31 : vector<1x1x8x4x8xbf16> to vector<8x4x8xbf16>
    %33 = vector.shape_cast %30 : vector<8x4x8xbf16> to vector<1x1x8x4x8xbf16>
    tpu.vector_store %arg6[%c0_24, %c0_25, %c0_26, %c0_27, %c0_28], %33 {strides = array<i32>} : memref<1x1x8x4x8xbf16, #tpu.memory_space<vmem>>, vector<1x1x8x4x8xbf16>,
    return
  }
  func.func @transform_0(%arg0: i32, %arg1: i32) -> (i32, i32, i32, i32, i32) {
    %c0_i32 = arith.constant 0 : i32
    %c0_i32_0 = arith.constant 0 : i32
    %c0_i32_1 = arith.constant 0 : i32
    %c0_i32_2 = arith.constant 0 : i32
    return %arg0, %arg1, %c0_i32, %c0_i32_0, %c0_i32_1 : i32, i32, i32, i32, i32
  }
  func.func @transform_1(%arg0: i32, %arg1: i32) -> (i32, i32, i32, i32, i32) {
    %c0_i32 = arith.constant 0 : i32
    %c0_i32_0 = arith.constant 0 : i32
    %c0_i32_1 = arith.constant 0 : i32
    %c0_i32_2 = arith.constant 0 : i32
    return %arg0, %arg1, %c0_i32, %c0_i32_0, %c0_i32_1 : i32, i32, i32, i32, i32
  }
  func.func @transform_2(%arg0: i32, %arg1: i32) -> (i32, i32, i32, i32, i32) {
    %c0_i32 = arith.constant 0 : i32
    %c0_i32_0 = arith.constant 0 : i32
    %c0_i32_1 = arith.constant 0 : i32
    %c0_i32_2 = arith.constant 0 : i32
    return %arg0, %arg1, %c0_i32, %c0_i32_0, %c0_i32_1 : i32, i32, i32, i32, i32
  }
  func.func @transform_3(%arg0: i32, %arg1: i32) -> (i32, i32, i32, i32, i32) {
    %c0_i32 = arith.constant 0 : i32
    %c0_i32_0 = arith.constant 0 : i32
    %c0_i32_1 = arith.constant 0 : i32
    %c0_i32_2 = arith.constant 0 : i32
    return %arg0, %arg1, %c0_i32, %c0_i32_0, %c0_i32_1 : i32, i32, i32, i32, i32
  }
  func.func @transform_4(%arg0: i32, %arg1: i32) -> (i32, i32, i32, i32, i32) {
    %c0_i32 = arith.constant 0 : i32
    %c0_i32_0 = arith.constant 0 : i32
    %c0_i32_1 = arith.constant 0 : i32
    %c0_i32_2 = arith.constant 0 : i32
    return %arg0, %arg1, %c0_i32, %c0_i32_0, %c0_i32_1 : i32, i32, i32, i32, i32
  }
}

module attributes {stable_mosaic.version = 11 : i64} {
  func.func @_ff_kernel(%arg0: i32, %arg1: memref<32x32xf32, #tpu.memory_space<vmem>>, %arg2: memref<1x32xf32, #tpu.memory_space<vmem>>, %arg3: memref<1x32xf32, #tpu.memory_space<vmem>>, %arg4: memref<32x128xbf16, #tpu.memory_space<vmem>>, %arg5: memref<1x128xf32, #tpu.memory_space<vmem>>, %arg6: memref<128x32xbf16, #tpu.memory_space<vmem>>, %arg7: memref<1x32xf32, #tpu.memory_space<vmem>>, %arg8: memref<32x32xf32, #tpu.memory_space<vmem>>) attributes {dimension_semantics = [#tpu.dimension_semantics<parallel>], iteration_bounds = array<i64: 1>, scalar_prefetch = 0 : i64, scratch_operands = 0 : i64, tpu.core_type = #tpu.core_type<tc>, window_params = [{transform_indices = @transform_0, window_bounds = array<i64: 32, 32>}, {pipeline_mode = #tpu.pipeline_mode<synchronous>, transform_indices = @transform_1, window_bounds = array<i64: 1, 32>}, {pipeline_mode = #tpu.pipeline_mode<synchronous>, transform_indices = @transform_2, window_bounds = array<i64: 1, 32>}, {pipeline_mode = #tpu.pipeline_mode<synchronous>, transform_indices = @transform_3, window_bounds = array<i64: 32, 128>}, {pipeline_mode = #tpu.pipeline_mode<synchronous>, transform_indices = @transform_4, window_bounds = array<i64: 1, 128>}, {pipeline_mode = #tpu.pipeline_mode<synchronous>, transform_indices = @transform_5, window_bounds = array<i64: 128, 32>}, {pipeline_mode = #tpu.pipeline_mode<synchronous>, transform_indices = @transform_6, window_bounds = array<i64: 1, 32>}, {transform_indices = @transform_7, window_bounds = array<i64: 32, 32>}]} {
    %c0 = arith.constant 0 : index
    %c0_0 = arith.constant 0 : index
    %0 = vector.load %arg1[%c0, %c0_0] : memref<32x32xf32, #tpu.memory_space<vmem>>, vector<32x32xf32>
    %cst = arith.constant dense<0.000000e+00> : vector<32xf32>
    %1 = vector.multi_reduction <add>, %0, %cst [1] : vector<32x32xf32> to vector<32xf32>
    %2 = vector.shape_cast %1 : vector<32xf32> to vector<32x1xf32>
    %cst_1 = arith.constant 3.200000e+01 : f32
    %3 = vector.broadcast %cst_1 : f32 to vector<32x1xf32>
    %4 = arith.divf %2, %3 : vector<32x1xf32>
    %5 = vector.broadcast %4 : vector<32x1xf32> to vector<32x32xf32>
    %6 = arith.subf %0, %5 : vector<32x32xf32>
    %7 = arith.mulf %6, %6 : vector<32x32xf32>
    %cst_2 = arith.constant dense<0.000000e+00> : vector<32xf32>
    %8 = vector.multi_reduction <add>, %7, %cst_2 [1] : vector<32x32xf32> to vector<32xf32>
    %9 = vector.shape_cast %8 : vector<32xf32> to vector<32x1xf32>
    %cst_3 = arith.constant 3.200000e+01 : f32
    %10 = vector.broadcast %cst_3 : f32 to vector<32x1xf32>
    %11 = arith.divf %9, %10 : vector<32x1xf32>
    %cst_4 = arith.constant 9.99999974E-6 : f32
    %12 = vector.broadcast %cst_4 : f32 to vector<32x1xf32>
    %13 = arith.addf %11, %12 : vector<32x1xf32>
    %14 = math.rsqrt %13 : vector<32x1xf32>
    %15 = vector.broadcast %14 : vector<32x1xf32> to vector<32x32xf32>
    %16 = arith.mulf %6, %15 : vector<32x32xf32>
    %c0_5 = arith.constant 0 : index
    %c0_6 = arith.constant 0 : index
    %17 = vector.load %arg2[%c0_5, %c0_6] : memref<1x32xf32, #tpu.memory_space<vmem>>, vector<1x32xf32>
    %18 = vector.broadcast %17 : vector<1x32xf32> to vector<32x32xf32>
    %19 = arith.mulf %16, %18 : vector<32x32xf32>
    %c0_7 = arith.constant 0 : index
    %c0_8 = arith.constant 0 : index
    %20 = vector.load %arg3[%c0_7, %c0_8] : memref<1x32xf32, #tpu.memory_space<vmem>>, vector<1x32xf32>
    %21 = vector.broadcast %20 : vector<1x32xf32> to vector<32x32xf32>
    %22 = arith.addf %19, %21 : vector<32x32xf32>
    %23 = arith.truncf %22 : vector<32x32xf32> to vector<32x32xbf16>
    %c0_9 = arith.constant 0 : index
    %c0_10 = arith.constant 0 : index
    %24 = vector.load %arg4[%c0_9, %c0_10] : memref<32x128xbf16, #tpu.memory_space<vmem>>, vector<32x128xbf16>
    %cst_11 = arith.constant dense<0.000000e+00> : vector<32x128xf32>
    %25 = tpu.matmul %23, %24, %cst_11 {dimension_numbers = #tpu.dot_dimension_numbers<[1], [0], [0], [1], [0, 0, 1, 1], [], []>} : vector<32x32xbf16>, vector<32x128xbf16>, vector<32x128xf32> -> vector<32x128xf32>
    %c0_12 = arith.constant 0 : index
    %c0_13 = arith.constant 0 : index
    %26 = vector.load %arg5[%c0_12, %c0_13] : memref<1x128xf32, #tpu.memory_space<vmem>>, vector<1x128xf32>
    %27 = vector.broadcast %26 : vector<1x128xf32> to vector<32x128xf32>
    %28 = arith.addf %25, %27 : vector<32x128xf32>
    %cst_14 = arith.constant 0.000000e+00 : f32
    %29 = vector.broadcast %cst_14 : f32 to vector<32x128xf32>
    %30 = arith.maximumf %28, %29 : vector<32x128xf32>
    %31 = arith.truncf %30 : vector<32x128xf32> to vector<32x128xbf16>
    %c0_15 = arith.constant 0 : index
    %c0_16 = arith.constant 0 : index
    %32 = vector.load %arg6[%c0_15, %c0_16] : memref<128x32xbf16, #tpu.memory_space<vmem>>, vector<128x32xbf16>
    %cst_17 = arith.constant dense<0.000000e+00> : vector<32x32xf32>
    %33 = tpu.matmul %31, %32, %cst_17 {dimension_numbers = #tpu.dot_dimension_numbers<[1], [0], [0], [1], [0, 0, 1, 1], [], []>} : vector<32x128xbf16>, vector<128x32xbf16>, vector<32x32xf32> -> vector<32x32xf32>
    %c0_18 = arith.constant 0 : index
    %c0_19 = arith.constant 0 : index
    %34 = vector.load %arg7[%c0_18, %c0_19] : memref<1x32xf32, #tpu.memory_space<vmem>>, vector<1x32xf32>
    %35 = vector.broadcast %34 : vector<1x32xf32> to vector<32x32xf32>
    %36 = arith.addf %33, %35 : vector<32x32xf32>
    %37 = arith.addf %0, %36 : vector<32x32xf32>
    %c0_20 = arith.constant 0 : index
    %c0_21 = arith.constant 0 : index
    %38 = vector.load %arg8[%c0_20, %c0_21] : memref<32x32xf32, #tpu.memory_space<vmem>>, vector<32x32xf32>
    tpu.vector_store %arg8[%c0_20, %c0_21], %37 {strides = array<i32>} : memref<32x32xf32, #tpu.memory_space<vmem>>, vector<32x32xf32>,
    return
  }
  func.func @transform_0(%arg0: i32) -> (i32, i32) {
    %c0_i32 = arith.constant 0 : i32
    %c0_i32_0 = arith.constant 0 : i32
    return %arg0, %c0_i32 : i32, i32
  }
  func.func @transform_1(%arg0: i32) -> (i32, i32) {
    %c0_i32 = arith.constant 0 : i32
    %c0_i32_0 = arith.constant 0 : i32
    %c0_i32_1 = arith.constant 0 : i32
    return %c0_i32, %c0_i32_0 : i32, i32
  }
  func.func @transform_2(%arg0: i32) -> (i32, i32) {
    %c0_i32 = arith.constant 0 : i32
    %c0_i32_0 = arith.constant 0 : i32
    %c0_i32_1 = arith.constant 0 : i32
    return %c0_i32, %c0_i32_0 : i32, i32
  }
  func.func @transform_3(%arg0: i32) -> (i32, i32) {
    %c0_i32 = arith.constant 0 : i32
    %c0_i32_0 = arith.constant 0 : i32
    %c0_i32_1 = arith.constant 0 : i32
    return %c0_i32, %c0_i32_0 : i32, i32
  }
  func.func @transform_4(%arg0: i32) -> (i32, i32) {
    %c0_i32 = arith.constant 0 : i32
    %c0_i32_0 = arith.constant 0 : i32
    %c0_i32_1 = arith.constant 0 : i32
    return %c0_i32, %c0_i32_0 : i32, i32
  }
  func.func @transform_5(%arg0: i32) -> (i32, i32) {
    %c0_i32 = arith.constant 0 : i32
    %c0_i32_0 = arith.constant 0 : i32
    %c0_i32_1 = arith.constant 0 : i32
    return %c0_i32, %c0_i32_0 : i32, i32
  }
  func.func @transform_6(%arg0: i32) -> (i32, i32) {
    %c0_i32 = arith.constant 0 : i32
    %c0_i32_0 = arith.constant 0 : i32
    %c0_i32_1 = arith.constant 0 : i32
    return %c0_i32, %c0_i32_0 : i32, i32
  }
  func.func @transform_7(%arg0: i32) -> (i32, i32) {
    %c0_i32 = arith.constant 0 : i32
    %c0_i32_0 = arith.constant 0 : i32
    return %arg0, %c0_i32 : i32, i32
  }
}

</mosaic_0001>

<bundles_post_ra>
// kernel: msapairstr2msa_forward.12
= control target key start
LH: loop header
LB: loop body
LE: loop exit
PB: predicated region body
PF: predicated region fallthrough
CT: control target
= control target key end

     0   :  { %vm22_vm0 = vcmask 64512   ;;  %vm65_vm1 = vcmask 1043456   ;;  %v131_v7 = vmov 0.0   ;;  %vm132_vm2 = vmmov 0   ;;  %s184_s0 = inlined_call_operand.vmem [shape: f32[8,8], index: 0, kind: input, shape index: {}]   ;;  %s185_s3 = inlined_call_operand.vmem [shape: bf16[8,32], index: 3, kind: input, shape index: {}]   ;;  %s186_s1 = inlined_call_operand.vmem [shape: f32[1,8], index: 1, kind: input, shape index: {}]   ;;  %s187_s2 = inlined_call_operand.vmem [shape: f32[1,8], index: 2, kind: input, shape index: {}]   ;;  %s188_s4 = inlined_call_operand.vmem [shape: f32[1,32], index: 4, kind: input, shape index: {}]   ;;  %s189_s5 = inlined_call_operand.vmem [shape: f32[8,32], index: 5, kind: output, shape index: {}]  }
   0x1   :  { %v21_v0 = vld [vmem:[%s184_s0] sm:$0xff]  ;;  %121 = vmatprep.subr.bf16.mxu0 %v131_v7  ;;  %123 = vmatprep.mubr.msk.bf16.mxu0 %vm132_vm2, %v131_v7  ;;  %vm109_vm3 = vcmask 261120  }
   0x2   :  { %v23_v1 = vsel %vm22_vm0, %v21_v0, 0.0  ;;  %v54_v8 = vld [vmem:[%s185_s3] sm:$0xf] }
   0x3   :  { %24 = vadd.xlane.f32.xlu0 %v23_v1  ;;  %v67_v9 = vsel %vm65_vm1, %v54_v8, 0  ;;  %v115_v14 = vld [vmem:[%s186_s1] ss:$0 sm:$0xff] }
   0x4   :  { %122 = vmatpush3.bf16.msra.mxu0 %v67_v9  ;;  %v116_v16 = vld [vmem:[%s187_s2] ss:$0 sm:$0xff] }
   0x5   :  { %v117_v20 = vld [vmem:[%s188_s4] ss:$0 sm:$0xff] }
  0x8c   :  { %v25_v2 = vpop.xlane.xlu0 %24 }
  0x8d   :  { %v27_v3 = vmul.f32 0.125, %v25_v2 }
  0x8f   :  { %v28_v4 = vsub.f32 %v21_v0, %v27_v3 }
  0x91   :  { %v29_v5 = vmul.f32 %v28_v4, %v28_v4 }
  0x93   :  { %v30_v6 = vsel %vm22_vm0, %v29_v5, 0.0 }
  0x94   :  { %31 = vadd.xlane.f32.xlu0 %v30_v6 }
 0x11d   :  { %v32_v10 = vpop.xlane.xlu0 %31 }
 0x11e   :  { %v33_v11 = vmul.f32 0.125, %v32_v10 }
 0x120   :  { %v34_v12 = vadd.f32 1e-05, %v33_v11 }
 0x122   :  { %129 = vrsqrt.f32 %v34_v12 }
 0x12f   :  { %v130_v13 = vpop.eup %129 }
 0x130   :  { %v36_v15 = vmul.f32 %v130_v13, %v28_v4 }
 0x132   :  { %v44_v17 = vmul.f32 %v115_v14, %v36_v15 }
 0x134   :  { %v52_v18 = vadd.f32 %v116_v16, %v44_v17 }
 0x136   :  { %v53_v19 = vpack.c.bf16 %v52_v18, %v52_v18 }
 0x138   :  { %124 = vmatmul.mubr.msk.bf16.vlgmr.msra.gmra.mxu0 %vm22_vm0, %v53_v19 }
 0x1f8   :  { %v103_v21 = vpop.f32.mrf.mxu0 }
 0x1f9   :  { %v104_v22 = vadd.f32 %v117_v20, %v103_v21 }
 0x1fa   :  { %v125_v23 = vpop.f32.mrf.mxu0 }
 0x1fb   :  { %110 = vst.msk [vmem:[%s189_s5] sm:$0xff] %vm109_vm3, %v104_v22 }
 0x1fc   :  { %v106_v24 = vpop.f32.mrf.mxu0 }
 0x1fe   :  { %v126_v25 = vpop.f32.mrf.mxu0 }

// kernel: msapairstr2msa_forward.13
= control target key start
LH: loop header
LB: loop body
LE: loop exit
PB: predicated region body
PF: predicated region fallthrough
CT: control target
= control target key end

     0   :  { %vm25_vm0 = vcmask 261120   ;;  %v268_v29 = vmov 0   ;;  %vm222_vm1 = vcmask 1043456   ;;  %vm223_vm2 = vcmask 261124   ;;  %s366_s0 = inlined_call_operand.vmem [shape: f32[32,32], index: 0, kind: input, shape index: {}]   ;;  %s367_s3 = inlined_call_operand.vmem [shape: bf16[32,160], index: 3, kind: input, shape index: {}]   ;;  %s368_s1 = inlined_call_operand.vmem [shape: f32[1,32], index: 1, kind: input, shape index: {}]   ;;  %s369_s2 = inlined_call_operand.vmem [shape: f32[1,32], index: 2, kind: input, shape index: {}]   ;;  %s370_s4 = inlined_call_operand.vmem [shape: f32[1,160], index: 4, kind: input, shape index: {}]   ;;  %s371_s5 = inlined_call_operand.vmem [shape: bf16[32,160], index: 5, kind: output, shape index: {}]  }
   0x1   :  { %v21_v0 = vld [vmem:[%s366_s0] sm:$0xff]  ;;  %v23_v1 = vld [vmem:[%s366_s0 + $0x10] sm:$0xff]  ;;  %v22_v2 = vld [vmem:[%s366_s0 + $0x8] sm:$0xff]  ;;  %177 = vmatprep.mubr.bf16.mxu0 %v268_v29  ;;  %187 = vmatprep.mubr.bf16.mxu1 %v268_v29 }
   0x2   :  { %v26_v3 = vsel %vm25_vm0, %v21_v0, 0.0  ;;  %v32_v4 = vsel %vm25_vm0, %v23_v1, 0.0  ;;  %v24_v5 = vld [vmem:[%s366_s0 + $0x18] sm:$0xff]  ;;  %v29_v6 = vsel %vm25_vm0, %v22_v2, 0.0  ;;  %v257_v31 = vld [vmem:[%s367_s3 + $0x4] ss:$8 sps:$4 sm:$0xff]   ;;  %vm342_vm3 = vmor %vm223_vm2, %vm222_vm1 }
   0x3   :  { %27 = vadd.xlane.f32.xlu0 %v26_v3  ;;  %33 = vadd.xlane.f32.xlu1 %v32_v4  ;;  %v35_v7 = vsel %vm25_vm0, %v24_v5, 0.0  ;;  %v254_v28 = vld [vmem:[%s367_s3 + $0x14] ss:$8 sps:$4 sm:$0xff]   ;;  %v256_v30 = vld [vmem:[%s367_s3 + $0x10] ss:$8 sps:$4 sm:$0xff]  }
   0x4   :  { %157 = vmatprep.subr.bf16.mxu0 %v254_v28  ;;  %249 = vmatprep.subr.bf16.mxu1 %v254_v28  ;;  %v259_v32 = vld [vmem:[%s367_s3] ss:$8 sps:$4 sm:$0xff]  }
   0x5   :  { %158 = vmatpush1.bf16.msra.mxu0 %v256_v30  ;;  %251 = vmatpush1.bf16.msra.mxu1 %v256_v30  ;;  %v233_v47 = vld [vmem:[%s368_s1] ss:$0 sm:$0xff] }
   0x6   :  { %159 = vmatprep.subr.bf16.mxu0 %v257_v31  ;;  %250 = vmatprep.subr.bf16.mxu1 %v257_v31  ;;  %v234_v52 = vld [vmem:[%s369_s2] ss:$0 sm:$0xff] }
   0x7   :  { %30 = vadd.xlane.f32.xlu0 %v29_v6  ;;  %36 = vadd.xlane.f32.xlu1 %v35_v7 }
   0x9   :  { %160 = vmatpush1.bf16.msra.mxu0 %v259_v32  ;;  %252 = vmatpush1.bf16.msra.mxu1 %v259_v32 }
  0x8c   :  { %v28_v8 = vpop.xlane.xlu0 %27  ;;  %v34_v9 = vpop.xlane.xlu1 %33 }
  0x8d   :  { %v39_v10 = vmul.f32 0.03125, %v28_v8  ;;  %v41_v11 = vmul.f32 0.03125, %v34_v9 }
  0x8f   :  { %v43_v12 = vsub.f32 %v21_v0, %v39_v10  ;;  %v45_v13 = vsub.f32 %v23_v1, %v41_v11  ;;  %v109_v1 = vlaneseq }
  0x90   :  { %v31_v14 = vpop.xlane.xlu0 %30  ;;  %v37_v15 = vpop.xlane.xlu1 %36 }
  0x91   :  { %v40_v16 = vmul.f32 0.03125, %v31_v14  ;;  %v42_v17 = vmul.f32 0.03125, %v37_v15  ;;  %v47_v18 = vmul.f32 %v43_v12, %v43_v12  ;;  %v49_v19 = vmul.f32 %v45_v13, %v45_v13 }
  0x93   :  { %v44_v20 = vsub.f32 %v22_v2, %v40_v16  ;;  %v46_v21 = vsub.f32 %v24_v5, %v42_v17  ;;  %v51_v22 = vsel %vm25_vm0, %v47_v18, 0.0  ;;  %v57_v23 = vsel %vm25_vm0, %v49_v19, 0.0  ;;  %v107_v5 = vld [vmem:[%s370_s4] sm:$0x3] }
  0x94   :  { %52 = vadd.xlane.f32.xlu0 %v51_v22  ;;  %v110_v2 = vshrl.u32 %v109_v1, 7 }
  0x95   :  { %v48_v24 = vmul.f32 %v44_v20, %v44_v20  ;;  %v50_v25 = vmul.f32 %v46_v21, %v46_v21 }
  0x96   :  { %v111_v3 = vsub.s32 0, %v110_v2  ;;  %v115_v4 = vsub.s32 1, %v110_v2 }
  0x97   :  { %v54_v26 = vsel %vm25_vm0, %v48_v24, 0.0  ;;  %v60_v27 = vsel %vm25_vm0, %v50_v25, 0.0 }
  0x98   :  { %58 = vadd.xlane.f32.xlu0 %v57_v23  ;;  %55 = vadd.xlane.f32.xlu1 %v54_v26  ;;  %v112_v6 = vrot.slane %v107_v5, %v111_v3  ;;  %v116_v7 = vrot.slane %v107_v5, %v115_v4 }
  0x9c   :  { %61 = vadd.xlane.f32.xlu1 %v60_v27 }
 0x11d   :  { %v53_v33 = vpop.xlane.xlu0 %52 }
 0x11e   :  { %v63_v34 = vmul.f32 0.03125, %v53_v33 }
 0x120   :  { %v67_v35 = vadd.f32 1e-05, %v63_v34 }
 0x121   :  { %v56_v36 = vpop.xlane.xlu1 %55  ;;  %v59_v37 = vpop.xlane.xlu0 %58 }
 0x122   :  { %260 = vrsqrt.f32 %v67_v35  ;;  %v64_v38 = vmul.f32 0.03125, %v56_v36  ;;  %v65_v39 = vmul.f32 0.03125, %v59_v37 }
 0x124   :  { %v68_v40 = vadd.f32 1e-05, %v64_v38  ;;  %v69_v41 = vadd.f32 1e-05, %v65_v39 }
 0x125   :  { %v62_v42 = vpop.xlane.xlu1 %61 }
 0x126   :  { %262 = vrsqrt.f32 %v68_v40  ;;  %v66_v43 = vmul.f32 0.03125, %v62_v42 }
 0x127   :  { %264 = vrsqrt.f32 %v69_v41 }
 0x128   :  { %v70_v44 = vadd.f32 1e-05, %v66_v43 }
 0x12a   :  { %266 = vrsqrt.f32 %v70_v44 }
 0x12f   :  { %v261_v45 = vpop.eup %260 }
 0x130   :  { %v75_v46 = vmul.f32 %v261_v45, %v43_v12 }
 0x132   :  { %v86_v51 = vmul.f32 %v233_v47, %v75_v46 }
 0x133   :  { %v263_v48 = vpop.eup %262 }
 0x134   :  { %v265_v49 = vpop.eup %264  ;;  %v76_v50 = vmul.f32 %v263_v48, %v44_v20  ;;  %v97_v56 = vadd.f32 %v234_v52, %v86_v51 }
 0x135   :  { %v77_v53 = vmul.f32 %v265_v49, %v45_v13 }
 0x136   :  { %v87_v54 = vmul.f32 %v233_v47, %v76_v50 }
 0x137   :  { %v267_v55 = vpop.eup %266  ;;  %v88_v59 = vmul.f32 %v233_v47, %v77_v53 }
 0x138   :  { %v98_v57 = vadd.f32 %v234_v52, %v87_v54  ;;  %v78_v58 = vmul.f32 %v267_v55, %v46_v21 }
 0x139   :  { %v99_v62 = vadd.f32 %v234_v52, %v88_v59 }
 0x13a   :  { %v101_v60 = vpack.c.bf16 %v98_v57, %v97_v56  ;;  %v89_v61 = vmul.f32 %v233_v47, %v78_v58 }
 0x13c   :  { %239 = vmatmul.mubr.msk.bf16.vlgmr.msra.gmra.mxu0 %vm25_vm0, %v101_v60  ;;  %v100_v63 = vadd.f32 %v234_v52, %v89_v61 }
 0x13e   :  { %v102_v0 = vpack.c.bf16 %v100_v63, %v99_v62 }
 0x140   :  { %240 = vmatmul.mubr.msk.bf16.vlgmr.msra.gmra.mxu1 %vm25_vm0, %v102_v0 }
 0x1fc   :  { %v179_v8 = vpop.f32.mrf.mxu0 }
 0x1fd   :  { %v180_v10 = vadd.f32 %v179_v8, %v112_v6 }
 0x1fe   :  { %v181_v9 = vpop.f32.mrf.mxu0 }
 0x1ff   :  { %v182_v11 = vadd.f32 %v181_v9, %v116_v7 }
 0x200   :  { %v183_v13 = vpop.f32.mrf.mxu0  ;;  %v189_v14 = vpop.f32.mrf.mxu1 }
 0x201   :  { %v245_v15 = vpack.c.bf16 %v182_v11, %v180_v10  ;;  %v184_v18 = vadd.f32 %v183_v13, %v112_v6  ;;  %v190_v19 = vadd.f32 %v189_v14, %v112_v6 }
 0x202   :  { %v185_v16 = vpop.f32.mrf.mxu0  ;;  %v191_v17 = vpop.f32.mrf.mxu1 }
 0x203   :  { %225 = vst.msk [vmem:[%s371_s5] sm:$0xff] %vm342_vm3, %v245_v15  ;;  %v186_v20 = vadd.f32 %v185_v16, %v116_v7  ;;  %v192_v21 = vadd.f32 %v191_v17, %v116_v7 }
 0x204   :  { %v193_v22 = vpop.f32.mrf.mxu1 }
 0x205   :  { %v246_v23 = vpack.c.bf16 %v186_v20, %v184_v18  ;;  %v247_v24 = vpack.c.bf16 %v192_v21, %v190_v19  ;;  %v194_v26 = vadd.f32 %v193_v22, %v112_v6 }
 0x206   :  { %v195_v25 = vpop.f32.mrf.mxu1 }
 0x207   :  { %226 = vst.msk [vmem:[%s371_s5 + $0x8] sm:$0xff] %vm342_vm3, %v246_v23  ;;  %227 = vst.msk [vmem:[%s371_s5 + $0x10] sm:$0xff] %vm342_vm3, %v247_v24  ;;  %v196_v27 = vadd.f32 %v195_v25, %v116_v7 }
 0x209   :  { %v248_v28 = vpack.c.bf16 %v196_v27, %v194_v26 }
 0x20b   :  { %228 = vst.msk [vmem:[%s371_s5 + $0x18] sm:$0xff] %vm342_vm3, %v248_v28 }

// kernel: msapairstr2msa_forward.14
= control target key start
LH: loop header
LB: loop body
LE: loop exit
PB: predicated region body
PF: predicated region fallthrough
CT: control target
= control target key end

     0   :  { %vm22_vm0 = vcmask 261120   ;;  %v150_v7 = vmov 0.0   ;;  %vm151_vm1 = vmmov 0   ;;  %vm121_vm2 = vcmask 257024   ;;  %s206_s0 = inlined_call_operand.vmem [shape: f32[8,32], index: 0, kind: input, shape index: {}]   ;;  %s207_s3 = inlined_call_operand.vmem [shape: bf16[32,32], index: 3, kind: input, shape index: {}]   ;;  %s208_s1 = inlined_call_operand.vmem [shape: f32[1,32], index: 1, kind: input, shape index: {}]   ;;  %s209_s2 = inlined_call_operand.vmem [shape: f32[1,32], index: 2, kind: input, shape index: {}]   ;;  %s210_s4 = inlined_call_operand.vmem [shape: f32[1,32], index: 4, kind: input, shape index: {}]   ;;  %s211_s5 = inlined_call_operand.vmem [shape: bf16[8,32], index: 5, kind: output, shape index: {}]  }
   0x1   :  { %v21_v0 = vld [vmem:[%s206_s0] sm:$0xff]  ;;  %136 = vmatprep.subr.bf16.mxu0 %v150_v7  ;;  %v146_v8 = vld [vmem:[%s207_s3 + $0x8] sm:$0xff]   ;;  %140 = vmatprep.mubr.msk.bf16.mxu0 %vm151_vm1, %v150_v7 }
   0x2   :  { %v23_v1 = vsel %vm22_vm0, %v21_v0, 0.0  ;;  %137 = vmatpush3.bf16.msra.mxu0 %v146_v8  ;;  %v147_v9 = vld [vmem:[%s207_s3] sm:$0xff]  }
   0x3   :  { %24 = vadd.xlane.f32.xlu0 %v23_v1  ;;  %138 = vmatprep.subr.bf16.mxu0 %v150_v7  ;;  %v127_v14 = vld [vmem:[%s208_s1] ss:$0 sm:$0xff] }
   0x4   :  { %v128_v16 = vld [vmem:[%s209_s2] ss:$0 sm:$0xff] }
   0x5   :  { %v129_v20 = vld [vmem:[%s210_s4] ss:$0 sm:$0xff] }
   0x6   :  { %139 = vmatpush3.bf16.msra.mxu0 %v147_v9 }
  0x8c   :  { %v25_v2 = vpop.xlane.xlu0 %24 }
  0x8d   :  { %v27_v3 = vmul.f32 0.03125, %v25_v2 }
  0x8f   :  { %v28_v4 = vsub.f32 %v21_v0, %v27_v3 }
  0x91   :  { %v29_v5 = vmul.f32 %v28_v4, %v28_v4 }
  0x93   :  { %v30_v6 = vsel %vm22_vm0, %v29_v5, 0.0 }
  0x94   :  { %31 = vadd.xlane.f32.xlu0 %v30_v6 }
 0x11d   :  { %v32_v10 = vpop.xlane.xlu0 %31 }
 0x11e   :  { %v33_v11 = vmul.f32 0.03125, %v32_v10 }
 0x120   :  { %v34_v12 = vadd.f32 1e-05, %v33_v11 }
 0x122   :  { %148 = vrsqrt.f32 %v34_v12 }
 0x12f   :  { %v149_v13 = vpop.eup %148 }
 0x130   :  { %v36_v15 = vmul.f32 %v149_v13, %v28_v4 }
 0x132   :  { %v44_v17 = vmul.f32 %v127_v14, %v36_v15 }
 0x134   :  { %v52_v18 = vadd.f32 %v128_v16, %v44_v17 }
 0x136   :  { %v53_v19 = vpack.c.bf16 %v52_v18, %v52_v18 }
 0x138   :  { %141 = vmatmul.mubr.msk.bf16.vlgmr.msra.gmra.mxu0 %vm22_vm0, %v53_v19 }
 0x1f8   :  { %v114_v21 = vpop.f32.mrf.mxu0 }
 0x1f9   :  { %v115_v22 = vadd.f32 %v129_v20, %v114_v21 }
 0x1fa   :  { %v142_v23 = vpop.f32.mrf.mxu0 }
 0x1fb   :  { %v120_v24 = vpack.c.bf16 %v115_v22, %v115_v22 }
 0x1fc   :  { %v117_v25 = vpop.f32.mrf.mxu0 }
 0x1fd   :  { %122 = vst.msk [vmem:[%s211_s5] sm:$0xf] %vm121_vm2, %v120_v24 }
 0x1fe   :  { %v143_v26 = vpop.f32.mrf.mxu0 }

// kernel: msapairstr2msa_forward.11
= control target key start
LH: loop header
LB: loop body
LE: loop exit
PB: predicated region body
PF: predicated region fallthrough
CT: control target
= control target key end

     0   :  { %vm35_vm0 = vcmask 130048   ;;  %vm222_vm1 = vcmask 1041408   ;;  %vm209_vm2 = vcmask 293888   ;;  %s678_s0 = inlined_call_operand.vmem [shape: f32[64,16], index: 0, kind: input, shape index: {}]   ;;  %s679_s5 = inlined_call_operand.vmem [shape: bf16[36,16], index: 5, kind: input, shape index: {}]   ;;  %s680_s1 = inlined_call_operand.vmem [shape: f32[64,36], index: 1, kind: input, shape index: {}]   ;;  %s681_s4 = inlined_call_operand.vmem [shape: bf16[16,16], index: 4, kind: input, shape index: {}]   ;;  %s682_s2 = inlined_call_operand.vmem [shape: f32[1,16], index: 2, kind: input, shape index: {}]   ;;  %s683_s3 = inlined_call_operand.vmem [shape: f32[1,16], index: 3, kind: input, shape index: {}]   ;;  %s684_s6 = inlined_call_operand.vmem [shape: f32[1,16], index: 6, kind: input, shape index: {}]   ;;  %s685_s7 = inlined_call_operand.vmem [shape: f32[64,16], index: 7, kind: output, shape index: {}]  }
   0x1   :  { %v27_v0 = vld [vmem:[%s678_s0] sm:$0xff]  ;;  %v29_v1 = vld [vmem:[%s678_s0 + $0x10] sm:$0xff]  ;;  %v28_v2 = vld [vmem:[%s678_s0 + $0x8] sm:$0xff] }
   0x2   :  { %v36_v3 = vsel %vm35_vm0, %v27_v0, 0.0  ;;  %v42_v4 = vsel %vm35_vm0, %v29_v1, 0.0  ;;  %v30_v5 = vld [vmem:[%s678_s0 + $0x18] sm:$0xff]  ;;  %v39_v6 = vsel %vm35_vm0, %v28_v2, 0.0  ;;  %v31_v8 = vld [vmem:[%s678_s0 + $0x20] sm:$0xff]  ;;  %v32_v9 = vld [vmem:[%s678_s0 + $0x28] sm:$0xff] }
   0x3   :  { %37 = vadd.xlane.f32.xlu0 %v36_v3  ;;  %43 = vadd.xlane.f32.xlu1 %v42_v4  ;;  %v45_v7 = vsel %vm35_vm0, %v30_v5, 0.0  ;;  %v48_v10 = vsel %vm35_vm0, %v31_v8, 0.0  ;;  %v51_v11 = vsel %vm35_vm0, %v32_v9, 0.0  ;;  %v33_v12 = vld [vmem:[%s678_s0 + $0x30] sm:$0xff]  ;;  %v34_v13 = vld [vmem:[%s678_s0 + $0x38] sm:$0xff]  ;;  %v454_v58 = vld [vmem:[%s679_s5 + $0x8] sm:$0xff]  }
   0x4   :  { %v54_v14 = vsel %vm35_vm0, %v33_v12, 0.0  ;;  %v57_v15 = vsel %vm35_vm0, %v34_v13, 0.0  ;;  %v453_v56 = vld [vmem:[%s679_s5 + $0x10] ss:$0 sps:$4 sm:$0x33]   ;;  %v455_v59 = vld [vmem:[%s679_s5] sm:$0xff]  }
   0x5   :  { %452 = vmatprep.subr.msk.bf16.mxu0 %vm222_vm1, %v453_v56  ;;  %v224_v57 = vsel %vm222_vm1, %v453_v56, 0  ;;  %v177_v60 = vld [vmem:[%s680_s1] sm:$0xff]  ;;  %v178_v61 = vld [vmem:[%s680_s1 + $0x8] sm:$0xff]  ;;  %v179_v62 = vld [vmem:[%s680_s1 + $0x10] sm:$0xff] }
   0x6   :  { %429 = vmatpush3.bf16.msra.mxu0 %v224_v57  ;;  %v185_v63 = vpack.c.bf16 %v178_v61, %v177_v60  ;;  %v181_v3 = vld [vmem:[%s680_s1 + $0x20] sm:$0xff]  ;;  %v182_v4 = vld [vmem:[%s680_s1 + $0x28] sm:$0xff] }
   0x7   :  { %40 = vadd.xlane.f32.xlu0 %v39_v6  ;;  %46 = vadd.xlane.f32.xlu1 %v45_v7  ;;  %v183_v6 = vld [vmem:[%s680_s1 + $0x30] sm:$0xff]  ;;  %v184_v7 = vld [vmem:[%s680_s1 + $0x38] sm:$0xff] }
   0x8   :  { %430 = vmatprep.subr.bf16.mxu0 %v454_v58  ;;  %434 = vmatprep.mubr.msk.bf16.mxu0 %vm209_vm2, %v185_v63 }
   0xa   :  { %431 = vmatpush3.bf16.msra.mxu0 %v454_v58 }
   0xb   :  { %49 = vadd.xlane.f32.xlu0 %v48_v10  ;;  %52 = vadd.xlane.f32.xlu1 %v51_v11 }
   0xc   :  { %432 = vmatprep.subr.bf16.mxu0 %v455_v59 }
   0xe   :  { %433 = vmatpush3.bf16.msra.mxu0 %v455_v59 }
   0xf   :  { %55 = vadd.xlane.f32.xlu0 %v54_v14  ;;  %58 = vadd.xlane.f32.xlu1 %v57_v15 }
  0x8c   :  { %v38_v16 = vpop.xlane.xlu0 %37  ;;  %v44_v17 = vpop.xlane.xlu1 %43 }
  0x8d   :  { %v61_v18 = vmul.f32 0.0625, %v38_v16  ;;  %v63_v19 = vmul.f32 0.0625, %v44_v17 }
  0x8f   :  { %v545_v20 = vsub.f32 %v27_v0, %v61_v18  ;;  %v547_v21 = vsub.f32 %v29_v1, %v63_v19  ;;  %v180_v0 = vld [vmem:[%s680_s1 + $0x18] sm:$0xff]  ;;  %v456_v1 = vld [vmem:[%s681_s4] sm:$0xff]  }
  0x90   :  { %v41_v22 = vpop.xlane.xlu0 %40  ;;  %v47_v23 = vpop.xlane.xlu1 %46  ;;  %442 = vmatprep.subr.bf16.mxu1 %v456_v1 }
  0x91   :  { %v62_v24 = vmul.f32 0.0625, %v41_v22  ;;  %v64_v25 = vmul.f32 0.0625, %v47_v23  ;;  %v77_v26 = vmul.f32 %v545_v20, %v545_v20  ;;  %v79_v27 = vmul.f32 %v547_v21, %v547_v21  ;;  %443 = vmatpush3.bf16.msra.mxu1 %v456_v1 }
  0x93   :  { %v553_v28 = vsub.f32 %v28_v2, %v62_v24  ;;  %v555_v29 = vsub.f32 %v30_v5, %v64_v25  ;;  %v85_v30 = vsel %vm35_vm0, %v77_v26, 0.0  ;;  %v91_v33 = vsel %vm35_vm0, %v79_v27, 0.0 }
  0x94   :  { %86 = vadd.xlane.f32.xlu0 %v85_v30  ;;  %v50_v31 = vpop.xlane.xlu0 %49  ;;  %v53_v32 = vpop.xlane.xlu1 %52  ;;  %v186_v2 = vpack.c.bf16 %v180_v0, %v179_v62  ;;  %v187_v5 = vpack.c.bf16 %v182_v4, %v181_v3 }
  0x95   :  { %v65_v34 = vmul.f32 0.0625, %v50_v31  ;;  %v66_v35 = vmul.f32 0.0625, %v53_v32  ;;  %v78_v36 = vmul.f32 %v553_v28, %v553_v28  ;;  %v80_v37 = vmul.f32 %v555_v29, %v555_v29 }
  0x96   :  { %435 = vmatmul.mubr.msk.bf16.vlgmr.msra.gmra.mxu0 %vm209_vm2, %v186_v2 }
  0x97   :  { %v563_v38 = vsub.f32 %v31_v8, %v65_v34  ;;  %v565_v39 = vsub.f32 %v32_v9, %v66_v35  ;;  %v88_v40 = vsel %vm35_vm0, %v78_v36, 0.0  ;;  %v94_v43 = vsel %vm35_vm0, %v80_v37, 0.0  ;;  %438 = vmatprep.mubr.msk.bf16.mxu0 %vm209_vm2, %v187_v5 }
  0x98   :  { %92 = vadd.xlane.f32.xlu0 %v91_v33  ;;  %89 = vadd.xlane.f32.xlu1 %v88_v40  ;;  %v56_v41 = vpop.xlane.xlu0 %55  ;;  %v59_v42 = vpop.xlane.xlu1 %58  ;;  %v188_v8 = vpack.c.bf16 %v184_v7, %v183_v6 }
  0x99   :  { %v67_v44 = vmul.f32 0.0625, %v56_v41  ;;  %v68_v45 = vmul.f32 0.0625, %v59_v42  ;;  %v81_v46 = vmul.f32 %v563_v38, %v563_v38  ;;  %v82_v47 = vmul.f32 %v565_v39, %v565_v39  ;;  %v401_v41 = vld [vmem:[%s682_s2] ss:$0 sm:$0xff] }
  0x9b   :  { %v573_v48 = vsub.f32 %v33_v12, %v67_v44  ;;  %v575_v49 = vsub.f32 %v34_v13, %v68_v45  ;;  %v97_v50 = vsel %vm35_vm0, %v81_v46, 0.0  ;;  %v100_v51 = vsel %vm35_vm0, %v82_v47, 0.0  ;;  %v402_v46 = vld [vmem:[%s683_s3] ss:$0 sm:$0xff] }
  0x9c   :  { %95 = vadd.xlane.f32.xlu1 %v94_v43  ;;  %98 = vadd.xlane.f32.xlu0 %v97_v50 }
  0x9d   :  { %v83_v52 = vmul.f32 %v573_v48, %v573_v48  ;;  %v84_v53 = vmul.f32 %v575_v49, %v575_v49 }
  0x9e   :  { %439 = vmatmul.mubr.msk.bf16.gmra.mxu0 %vm209_vm2, %v188_v8 }
  0x9f   :  { %v103_v54 = vsel %vm35_vm0, %v83_v52, 0.0  ;;  %v106_v55 = vsel %vm35_vm0, %v84_v53, 0.0 }
  0xa0   :  { %101 = vadd.xlane.f32.xlu1 %v100_v51  ;;  %104 = vadd.xlane.f32.xlu0 %v103_v54 }
  0xa4   :  { %107 = vadd.xlane.f32.xlu1 %v106_v55 }
 0x11d   :  { %v87_v9 = vpop.xlane.xlu0 %86 }
 0x11e   :  { %v109_v10 = vmul.f32 0.0625, %v87_v9 }
 0x120   :  { %v117_v11 = vadd.f32 1e-05, %v109_v10 }
 0x121   :  { %v90_v12 = vpop.xlane.xlu1 %89  ;;  %v93_v13 = vpop.xlane.xlu0 %92 }
 0x122   :  { %457 = vrsqrt.f32 %v117_v11  ;;  %v110_v14 = vmul.f32 0.0625, %v90_v12  ;;  %v111_v15 = vmul.f32 0.0625, %v93_v13  ;;  %v415_v13 = vld [vmem:[%s684_s6] ss:$0 sm:$0xff] }
 0x124   :  { %v118_v16 = vadd.f32 1e-05, %v110_v14  ;;  %v119_v17 = vadd.f32 1e-05, %v111_v15 }
 0x125   :  { %v96_v18 = vpop.xlane.xlu1 %95  ;;  %v99_v19 = vpop.xlane.xlu0 %98 }
 0x126   :  { %459 = vrsqrt.f32 %v118_v16  ;;  %v112_v22 = vmul.f32 0.0625, %v96_v18  ;;  %v113_v23 = vmul.f32 0.0625, %v99_v19 }
 0x127   :  { %461 = vrsqrt.f32 %v119_v17 }
 0x128   :  { %v120_v24 = vadd.f32 1e-05, %v112_v22  ;;  %v121_v25 = vadd.f32 1e-05, %v113_v23 }
 0x129   :  { %v102_v26 = vpop.xlane.xlu1 %101  ;;  %v105_v27 = vpop.xlane.xlu0 %104 }
 0x12a   :  { %463 = vrsqrt.f32 %v120_v24  ;;  %v114_v30 = vmul.f32 0.0625, %v102_v26  ;;  %v115_v31 = vmul.f32 0.0625, %v105_v27 }
 0x12b   :  { %465 = vrsqrt.f32 %v121_v25 }
 0x12c   :  { %v122_v32 = vadd.f32 1e-05, %v114_v30  ;;  %v123_v33 = vadd.f32 1e-05, %v115_v31 }
 0x12d   :  { %v108_v34 = vpop.xlane.xlu1 %107 }
 0x12e   :  { %467 = vrsqrt.f32 %v122_v32  ;;  %v116_v35 = vmul.f32 0.0625, %v108_v34 }
 0x12f   :  { %v458_v36 = vpop.eup %457  ;;  %469 = vrsqrt.f32 %v123_v33 }
 0x130   :  { %v124_v37 = vadd.f32 1e-05, %v116_v35  ;;  %v133_v40 = vmul.f32 %v458_v36, %v545_v20 }
 0x132   :  { %471 = vrsqrt.f32 %v124_v37  ;;  %v148_v45 = vmul.f32 %v401_v41, %v133_v40 }
 0x133   :  { %v460_v42 = vpop.eup %459 }
 0x134   :  { %v462_v43 = vpop.eup %461  ;;  %v134_v44 = vmul.f32 %v460_v42, %v553_v28  ;;  %v163_v20 = vadd.f32 %v402_v46, %v148_v45 }
 0x135   :  { %v135_v47 = vmul.f32 %v462_v43, %v547_v21 }
 0x136   :  { %v149_v50 = vmul.f32 %v401_v41, %v134_v44 }
 0x137   :  { %v464_v51 = vpop.eup %463  ;;  %v150_v55 = vmul.f32 %v401_v41, %v135_v47 }
 0x138   :  { %v466_v52 = vpop.eup %465  ;;  %v164_v53 = vadd.f32 %v402_v46, %v149_v50  ;;  %v136_v54 = vmul.f32 %v464_v51, %v555_v29 }
 0x139   :  { %v137_v56 = vmul.f32 %v466_v52, %v563_v38  ;;  %v165_v60 = vadd.f32 %v402_v46, %v150_v55 }
 0x13a   :  { %v171_v57 = vpack.c.bf16 %v164_v53, %v163_v20  ;;  %v151_v58 = vmul.f32 %v401_v41, %v136_v54 }
 0x13b   :  { %v468_v28 = vpop.eup %467  ;;  %v152_v62 = vmul.f32 %v401_v41, %v137_v56 }
 0x13c   :  { %v470_v59 = vpop.eup %469  ;;  %444 = vmatprep.mubr.msk.bf16.mxu1 %vm35_vm0, %v171_v57  ;;  %v166_v61 = vadd.f32 %v402_v46, %v151_v58  ;;  %v138_v21 = vmul.f32 %v468_v28, %v565_v39 }
 0x13d   :  { %v139_v63 = vmul.f32 %v470_v59, %v573_v48  ;;  %v167_v29 = vadd.f32 %v402_v46, %v152_v62 }
 0x13e   :  { %v172_v0 = vpack.c.bf16 %v166_v61, %v165_v60  ;;  %v153_v1 = vmul.f32 %v401_v41, %v138_v21 }
 0x13f   :  { %v472_v2 = vpop.eup %471  ;;  %v154_v4 = vmul.f32 %v401_v41, %v139_v63 }
 0x140   :  { %445 = vmatmul.mubr.msk.bf16.vlgmr.msra.gmra.mxu1 %vm35_vm0, %v172_v0  ;;  %v168_v38 = vadd.f32 %v402_v46, %v153_v1  ;;  %v140_v3 = vmul.f32 %v472_v2, %v575_v49 }
 0x141   :  { %v169_v7 = vadd.f32 %v402_v46, %v154_v4 }
 0x142   :  { %v173_v5 = vpack.c.bf16 %v168_v38, %v167_v29  ;;  %v155_v6 = vmul.f32 %v401_v41, %v140_v3 }
 0x144   :  { %448 = vmatprep.mubr.msk.bf16.mxu1 %vm35_vm0, %v173_v5  ;;  %v170_v8 = vadd.f32 %v402_v46, %v155_v6 }
 0x146   :  { %v174_v39 = vpack.c.bf16 %v170_v8, %v169_v7 }
 0x148   :  { %449 = vmatmul.mubr.msk.bf16.gmra.mxu1 %vm35_vm0, %v174_v39 }
 0x156   :  { %v436_v48 = vpop.f32.mrf.mxu0 }
 0x158   :  { %v260_v9 = vpop.f32.mrf.mxu0 }
 0x15a   :  { %v437_v10 = vpop.f32.mrf.mxu0 }
 0x15c   :  { %v263_v11 = vpop.f32.mrf.mxu0 }
 0x15e   :  { %v440_v14 = vpop.f32.mrf.mxu0 }
 0x160   :  { %v276_v23 = vpop.f32.mrf.mxu0 }
 0x162   :  { %v441_v32 = vpop.f32.mrf.mxu0 }
 0x164   :  { %v279_v41 = vpop.f32.mrf.mxu0 }
 0x200   :  { %v446_v12 = vpop.f32.mrf.mxu1 }
 0x201   :  { %v352_v49 = vadd.f32 %v446_v12, %v436_v48 }
 0x202   :  { %v343_v15 = vpop.f32.mrf.mxu1 }
 0x203   :  { %v383_v16 = vadd.f32 %v415_v13, %v352_v49  ;;  %v344_v17 = vadd.f32 %v343_v15, %v260_v9 }
 0x204   :  { %v447_v18 = vpop.f32.mrf.mxu1 }
 0x205   :  { %391 = vst.msk [vmem:[%s685_s7 + $0x10] sm:$0xff] %vm35_vm0, %v383_v16  ;;  %v381_v19 = vadd.f32 %v415_v13, %v344_v17  ;;  %v355_v22 = vadd.f32 %v447_v18, %v437_v10 }
 0x206   :  { %v346_v24 = vpop.f32.mrf.mxu1 }
 0x207   :  { %389 = vst.msk [vmem:[%s685_s7] sm:$0xff] %vm35_vm0, %v381_v19  ;;  %v384_v25 = vadd.f32 %v415_v13, %v355_v22  ;;  %v347_v26 = vadd.f32 %v346_v24, %v263_v11 }
 0x208   :  { %v450_v27 = vpop.f32.mrf.mxu1 }
 0x209   :  { %392 = vst.msk [vmem:[%s685_s7 + $0x18] sm:$0xff] %vm35_vm0, %v384_v25  ;;  %v382_v30 = vadd.f32 %v415_v13, %v347_v26  ;;  %v368_v31 = vadd.f32 %v450_v27, %v440_v14 }
 0x20a   :  { %v359_v33 = vpop.f32.mrf.mxu1 }
 0x20b   :  { %390 = vst.msk [vmem:[%s685_s7 + $0x8] sm:$0xff] %vm35_vm0, %v382_v30  ;;  %v387_v34 = vadd.f32 %v415_v13, %v368_v31  ;;  %v360_v35 = vadd.f32 %v359_v33, %v276_v23 }
 0x20c   :  { %v451_v36 = vpop.f32.mrf.mxu1 }
 0x20d   :  { %395 = vst.msk [vmem:[%s685_s7 + $0x30] sm:$0xff] %vm35_vm0, %v387_v34  ;;  %v385_v37 = vadd.f32 %v415_v13, %v360_v35  ;;  %v371_v40 = vadd.f32 %v451_v36, %v441_v32 }
 0x20e   :  { %v362_v42 = vpop.f32.mrf.mxu1 }
 0x20f   :  { %393 = vst.msk [vmem:[%s685_s7 + $0x20] sm:$0xff] %vm35_vm0, %v385_v37  ;;  %v388_v43 = vadd.f32 %v415_v13, %v371_v40  ;;  %v363_v44 = vadd.f32 %v362_v42, %v279_v41 }
 0x211   :  { %396 = vst.msk [vmem:[%s685_s7 + $0x38] sm:$0xff] %vm35_vm0, %v388_v43  ;;  %v386_v45 = vadd.f32 %v415_v13, %v363_v44 }
 0x213   :  { %394 = vst.msk [vmem:[%s685_s7 + $0x28] sm:$0xff] %vm35_vm0, %v386_v45 }

// kernel: msapairstr2msa_forward.15
= control target key start
LH: loop header
LB: loop body
LE: loop exit
PB: predicated region body
PF: predicated region fallthrough
CT: control target
= control target key end

     0   :  { %vm29_vm0 = vcmask 130048   ;;  %vm261_vm1 = vcmask 31744   ;;  %s474_s0 = inlined_call_operand.vmem [shape: f32[64,16], index: 0, kind: input, shape index: {}]   ;;  %s475_s3 = inlined_call_operand.vmem [shape: bf16[16,4], index: 3, kind: input, shape index: {}]   ;;  %s476_s1 = inlined_call_operand.vmem [shape: f32[1,16], index: 1, kind: input, shape index: {}]   ;;  %s477_s2 = inlined_call_operand.vmem [shape: f32[1,16], index: 2, kind: input, shape index: {}]   ;;  %s478_s4 = inlined_call_operand.vmem [shape: f32[1,4], index: 4, kind: input, shape index: {}]   ;;  %s479_s5 = inlined_call_operand.vmem [shape: f32[64,4], index: 5, kind: output, shape index: {}]  }
   0x1   :  { %v21_v0 = vld [vmem:[%s474_s0] sm:$0xff]  ;;  %v22_v2 = vld [vmem:[%s474_s0 + $0x8] sm:$0xff]  ;;  %v23_v8 = vld [vmem:[%s474_s0 + $0x10] sm:$0xff] }
   0x2   :  { %v25_v1 = vld [vmem:[%s474_s0 + $0x20] sm:$0xff]  ;;  %v30_v3 = vsel %vm29_vm0, %v21_v0, 0.0  ;;  %v26_v5 = vld [vmem:[%s474_s0 + $0x28] sm:$0xff]  ;;  %v33_v6 = vsel %vm29_vm0, %v22_v2, 0.0  ;;  %v24_v9 = vld [vmem:[%s474_s0 + $0x18] sm:$0xff]  ;;  %v36_v10 = vsel %vm29_vm0, %v23_v8, 0.0 }
   0x3   :  { %v42_v4 = vsel %vm29_vm0, %v25_v1, 0.0  ;;  %31 = vadd.xlane.f32.xlu0 %v30_v3  ;;  %v45_v7 = vsel %vm29_vm0, %v26_v5, 0.0  ;;  %v39_v11 = vsel %vm29_vm0, %v24_v9, 0.0  ;;  %v27_v12 = vld [vmem:[%s474_s0 + $0x30] sm:$0xff]  ;;  %v28_v13 = vld [vmem:[%s474_s0 + $0x38] sm:$0xff]  ;;  %v299_v56 = vld [vmem:[%s475_s3] sm:$0xff]  }
   0x4   :  { %43 = vadd.xlane.f32.xlu1 %v42_v4  ;;  %v48_v14 = vsel %vm29_vm0, %v27_v12, 0.0  ;;  %v51_v15 = vsel %vm29_vm0, %v28_v13, 0.0  ;;  %287 = vmatprep.subr.bf16.mxu0 %v299_v56 }
   0x5   :  { %297 = vmatprep.subr.bf16.mxu1 %v299_v56  ;;  %288 = vmatpush3.bf16.msra.mxu0 %v299_v56 }
   0x6   :  { %298 = vmatpush3.bf16.msra.mxu1 %v299_v56 }
   0x7   :  { %34 = vadd.xlane.f32.xlu0 %v33_v6 }
   0x8   :  { %46 = vadd.xlane.f32.xlu1 %v45_v7 }
   0xb   :  { %37 = vadd.xlane.f32.xlu0 %v36_v10 }
   0xc   :  { %40 = vadd.xlane.f32.xlu1 %v39_v11 }
   0xf   :  { %49 = vadd.xlane.f32.xlu0 %v48_v14 }
  0x10   :  { %52 = vadd.xlane.f32.xlu1 %v51_v15 }
  0x8c   :  { %v32_v16 = vpop.xlane.xlu0 %31 }
  0x8d   :  { %v44_v17 = vpop.xlane.xlu1 %43  ;;  %v55_v18 = vmul.f32 0.0625, %v32_v16 }
  0x8e   :  { %v59_v19 = vmul.f32 0.0625, %v44_v17 }
  0x8f   :  { %v378_v20 = vsub.f32 %v21_v0, %v55_v18 }
  0x90   :  { %v380_v21 = vsub.f32 %v25_v1, %v59_v19  ;;  %v35_v22 = vpop.xlane.xlu0 %34  ;;  %v274_v19 = vld [vmem:[%s476_s1] ss:$0 sm:$0xff] }
  0x91   :  { %v47_v23 = vpop.xlane.xlu1 %46  ;;  %v56_v24 = vmul.f32 0.0625, %v35_v22  ;;  %v71_v26 = vmul.f32 %v378_v20, %v378_v20 }
  0x92   :  { %v60_v25 = vmul.f32 0.0625, %v47_v23  ;;  %v75_v27 = vmul.f32 %v380_v21, %v380_v21 }
  0x93   :  { %v386_v28 = vsub.f32 %v22_v2, %v56_v24  ;;  %v79_v30 = vsel %vm29_vm0, %v71_v26, 0.0  ;;  %v275_v26 = vld [vmem:[%s477_s2] ss:$0 sm:$0xff] }
  0x94   :  { %v388_v29 = vsub.f32 %v26_v5, %v60_v25  ;;  %80 = vadd.xlane.f32.xlu0 %v79_v30  ;;  %v38_v31 = vpop.xlane.xlu0 %37  ;;  %v91_v33 = vsel %vm29_vm0, %v75_v27, 0.0 }
  0x95   :  { %v41_v32 = vpop.xlane.xlu1 %40  ;;  %v57_v34 = vmul.f32 0.0625, %v38_v31  ;;  %v72_v36 = vmul.f32 %v386_v28, %v386_v28 }
  0x96   :  { %v58_v35 = vmul.f32 0.0625, %v41_v32  ;;  %v76_v37 = vmul.f32 %v388_v29, %v388_v29 }
  0x97   :  { %v396_v38 = vsub.f32 %v23_v8, %v57_v34  ;;  %v82_v40 = vsel %vm29_vm0, %v72_v36, 0.0 }
  0x98   :  { %v398_v39 = vsub.f32 %v24_v9, %v58_v35  ;;  %92 = vadd.xlane.f32.xlu0 %v91_v33  ;;  %83 = vadd.xlane.f32.xlu1 %v82_v40  ;;  %v50_v41 = vpop.xlane.xlu0 %49  ;;  %v94_v43 = vsel %vm29_vm0, %v76_v37, 0.0 }
  0x99   :  { %v53_v42 = vpop.xlane.xlu1 %52  ;;  %v61_v44 = vmul.f32 0.0625, %v50_v41  ;;  %v73_v46 = vmul.f32 %v396_v38, %v396_v38 }
  0x9a   :  { %v62_v45 = vmul.f32 0.0625, %v53_v42  ;;  %v74_v47 = vmul.f32 %v398_v39, %v398_v39 }
  0x9b   :  { %v406_v48 = vsub.f32 %v27_v12, %v61_v44  ;;  %v85_v50 = vsel %vm29_vm0, %v73_v46, 0.0 }
  0x9c   :  { %v408_v49 = vsub.f32 %v28_v13, %v62_v45  ;;  %95 = vadd.xlane.f32.xlu1 %v94_v43  ;;  %86 = vadd.xlane.f32.xlu0 %v85_v50  ;;  %v88_v51 = vsel %vm29_vm0, %v74_v47, 0.0 }
  0x9d   :  { %v77_v52 = vmul.f32 %v406_v48, %v406_v48 }
  0x9e   :  { %v78_v53 = vmul.f32 %v408_v49, %v408_v49 }
  0x9f   :  { %v97_v54 = vsel %vm29_vm0, %v77_v52, 0.0 }
  0xa0   :  { %89 = vadd.xlane.f32.xlu1 %v88_v51  ;;  %98 = vadd.xlane.f32.xlu0 %v97_v54  ;;  %v100_v55 = vsel %vm29_vm0, %v78_v53, 0.0 }
  0xa4   :  { %101 = vadd.xlane.f32.xlu1 %v100_v55 }
 0x11d   :  { %v81_v57 = vpop.xlane.xlu0 %80 }
 0x11e   :  { %v103_v58 = vmul.f32 0.0625, %v81_v57 }
 0x120   :  { %v111_v59 = vadd.f32 1e-05, %v103_v58 }
 0x121   :  { %v84_v60 = vpop.xlane.xlu1 %83  ;;  %v93_v61 = vpop.xlane.xlu0 %92 }
 0x122   :  { %300 = vrsqrt.f32 %v111_v59  ;;  %v104_v62 = vmul.f32 0.0625, %v84_v60  ;;  %v107_v63 = vmul.f32 0.0625, %v93_v61 }
 0x124   :  { %v112_v0 = vadd.f32 1e-05, %v104_v62  ;;  %v115_v1 = vadd.f32 1e-05, %v107_v63 }
 0x125   :  { %v96_v2 = vpop.xlane.xlu1 %95  ;;  %v87_v3 = vpop.xlane.xlu0 %86 }
 0x126   :  { %302 = vrsqrt.f32 %v112_v0  ;;  %v108_v4 = vmul.f32 0.0625, %v96_v2  ;;  %v105_v5 = vmul.f32 0.0625, %v87_v3 }
 0x127   :  { %304 = vrsqrt.f32 %v115_v1 }
 0x128   :  { %v116_v6 = vadd.f32 1e-05, %v108_v4  ;;  %v113_v7 = vadd.f32 1e-05, %v105_v5 }
 0x129   :  { %v90_v8 = vpop.xlane.xlu1 %89  ;;  %v99_v9 = vpop.xlane.xlu0 %98 }
 0x12a   :  { %306 = vrsqrt.f32 %v116_v6  ;;  %v106_v10 = vmul.f32 0.0625, %v90_v8  ;;  %v109_v11 = vmul.f32 0.0625, %v99_v9 }
 0x12b   :  { %308 = vrsqrt.f32 %v113_v7 }
 0x12c   :  { %v114_v12 = vadd.f32 1e-05, %v106_v10  ;;  %v117_v13 = vadd.f32 1e-05, %v109_v11 }
 0x12d   :  { %v102_v14 = vpop.xlane.xlu1 %101 }
 0x12e   :  { %310 = vrsqrt.f32 %v114_v12  ;;  %v110_v15 = vmul.f32 0.0625, %v102_v14 }
 0x12f   :  { %v301_v16 = vpop.eup %300  ;;  %312 = vrsqrt.f32 %v117_v13 }
 0x130   :  { %v118_v17 = vadd.f32 1e-05, %v110_v15  ;;  %v127_v18 = vmul.f32 %v301_v16, %v378_v20 }
 0x132   :  { %314 = vrsqrt.f32 %v118_v17  ;;  %v142_v25 = vmul.f32 %v274_v19, %v127_v18 }
 0x133   :  { %v303_v22 = vpop.eup %302 }
 0x134   :  { %v305_v23 = vpop.eup %304  ;;  %v128_v24 = vmul.f32 %v303_v22, %v386_v28  ;;  %v157_v20 = vadd.f32 %v275_v26, %v142_v25 }
 0x135   :  { %v131_v27 = vmul.f32 %v305_v23, %v380_v21 }
 0x136   :  { %v143_v30 = vmul.f32 %v274_v19, %v128_v24 }
 0x137   :  { %v307_v31 = vpop.eup %306  ;;  %v146_v35 = vmul.f32 %v274_v19, %v131_v27 }
 0x138   :  { %v309_v32 = vpop.eup %308  ;;  %v158_v33 = vadd.f32 %v275_v26, %v143_v30  ;;  %v132_v34 = vmul.f32 %v307_v31, %v388_v29 }
 0x139   :  { %v129_v36 = vmul.f32 %v309_v32, %v396_v38  ;;  %v161_v42 = vadd.f32 %v275_v26, %v146_v35 }
 0x13a   :  { %v165_v37 = vpack.c.bf16 %v158_v33, %v157_v20  ;;  %v147_v40 = vmul.f32 %v274_v19, %v132_v34 }
 0x13b   :  { %v311_v28 = vpop.eup %310  ;;  %v144_v44 = vmul.f32 %v274_v19, %v129_v36 }
 0x13c   :  { %v313_v41 = vpop.eup %312  ;;  %289 = vmatprep.mubr.msk.bf16.mxu0 %vm29_vm0, %v165_v37  ;;  %v162_v43 = vadd.f32 %v275_v26, %v147_v40  ;;  %v130_v21 = vmul.f32 %v311_v28, %v398_v39 }
 0x13d   :  { %v133_v45 = vmul.f32 %v313_v41, %v406_v48  ;;  %v159_v29 = vadd.f32 %v275_v26, %v144_v44  ;;  %v276_v48 = vld [vmem:[%s478_s4] ss:$0 sm:$0xff] }
 0x13e   :  { %v167_v46 = vpack.c.bf16 %v162_v43, %v161_v42  ;;  %v145_v47 = vmul.f32 %v274_v19, %v130_v21 }
 0x13f   :  { %v315_v50 = vpop.eup %314  ;;  %v148_v52 = vmul.f32 %v274_v19, %v133_v45 }
 0x140   :  { %293 = vmatprep.mubr.msk.bf16.mxu1 %vm29_vm0, %v167_v46  ;;  %v160_v38 = vadd.f32 %v275_v26, %v145_v47  ;;  %v134_v51 = vmul.f32 %v315_v50, %v408_v49 }
 0x141   :  { %v163_v55 = vadd.f32 %v275_v26, %v148_v52 }
 0x142   :  { %v166_v53 = vpack.c.bf16 %v160_v38, %v159_v29  ;;  %v149_v54 = vmul.f32 %v274_v19, %v134_v51 }
 0x144   :  { %290 = vmatmul.mubr.msk.bf16.vlgmr.msra.gmra.mxu0 %vm29_vm0, %v166_v53  ;;  %v164_v56 = vadd.f32 %v275_v26, %v149_v54 }
 0x146   :  { %v168_v39 = vpack.c.bf16 %v164_v56, %v163_v55 }
 0x148   :  { %294 = vmatmul.mubr.msk.bf16.vlgmr.msra.gmra.mxu1 %vm29_vm0, %v168_v39 }
 0x204   :  { %v291_v57 = vpop.f32.mrf.mxu0 }
 0x205   :  { %v239_v58 = vadd.f32 %v291_v57, %v276_v48 }
 0x206   :  { %v230_v59 = vpop.f32.mrf.mxu0 }
 0x207   :  { %264 = vst.msk [vmem:[%s479_s5 + $0x10] sm:$0xff] %vm261_vm1, %v239_v58  ;;  %v231_v49 = vadd.f32 %v276_v48, %v230_v59 }
 0x208   :  { %v292_v60 = vpop.f32.mrf.mxu0  ;;  %v295_v61 = vpop.f32.mrf.mxu1 }
 0x209   :  { %262 = vst.msk [vmem:[%s479_s5] sm:$0xff] %vm261_vm1, %v231_v49  ;;  %v242_v62 = vadd.f32 %v292_v60, %v276_v48  ;;  %v255_v63 = vadd.f32 %v295_v61, %v276_v48 }
 0x20a   :  { %v233_v0 = vpop.f32.mrf.mxu0  ;;  %v246_v1 = vpop.f32.mrf.mxu1 }
 0x20b   :  { %265 = vst.msk [vmem:[%s479_s5 + $0x18] sm:$0xff] %vm261_vm1, %v242_v62  ;;  %268 = vst.msk [vmem:[%s479_s5 + $0x30] sm:$0xff] %vm261_vm1, %v255_v63  ;;  %v234_v2 = vadd.f32 %v276_v48, %v233_v0  ;;  %v247_v3 = vadd.f32 %v276_v48, %v246_v1 }
 0x20c   :  { %v296_v4 = vpop.f32.mrf.mxu1 }
 0x20d   :  { %263 = vst.msk [vmem:[%s479_s5 + $0x8] sm:$0xff] %vm261_vm1, %v234_v2  ;;  %266 = vst.msk [vmem:[%s479_s5 + $0x20] sm:$0xff] %vm261_vm1, %v247_v3  ;;  %v258_v5 = vadd.f32 %v296_v4, %v276_v48 }
 0x20e   :  { %v249_v6 = vpop.f32.mrf.mxu1 }
 0x20f   :  { %269 = vst.msk [vmem:[%s479_s5 + $0x38] sm:$0xff] %vm261_vm1, %v258_v5  ;;  %v250_v7 = vadd.f32 %v276_v48, %v249_v6 }
 0x211   :  { %267 = vst.msk [vmem:[%s479_s5 + $0x28] sm:$0xff] %vm261_vm1, %v250_v7 }

// kernel: msapairstr2msa_forward.16
= control target key start
LH: loop header
LB: loop body
LE: loop exit
PB: predicated region body
PF: predicated region fallthrough
CT: control target
= control target key end

     0   :  { %s1288_s30 = smov 0   ;;  %s1290_s10 = smov 0   ;;  %s1376_s0 = inlined_call_operand.vmem [shape: bf16[1,4,8,32], index: 0, kind: input, shape index: {}]   ;;  %s1377_s1 = inlined_call_operand.vmem [shape: bf16[1,4,8,32], index: 1, kind: input, shape index: {}]   ;;  %s1378_s2 = inlined_call_operand.vmem [shape: bf16[1,4,8,32], index: 2, kind: input, shape index: {}]   ;;  %s1379_s3 = inlined_call_operand.vmem [shape: bf16[1,4,8,32], index: 3, kind: input, shape index: {}]   ;;  %s1380_s4 = inlined_call_operand.vmem [shape: bf16[1,4,8,32], index: 4, kind: input, shape index: {}]   ;;  %s1381_s5 = inlined_call_operand.vmem [shape: bf16[1,4,8,8], index: 5, kind: input, shape index: {}]   ;;  %s1382_s6 = inlined_call_operand.vmem [shape: f32[1,4,8,8], index: 6, kind: input, shape index: {}]   ;;  %s1383_s7 = inlined_call_operand.vmem [shape: f32[8,32], index: 7, kind: input, shape index: {}]   ;;  %s1384_s8 = inlined_call_operand.vmem [shape: f32[4,32], index: 8, kind: input, shape index: {}]   ;;  %s1385_s9 = inlined_call_operand.vmem [shape: bf16[1,4,8,32], index: 9, kind: output, shape index: {}]  }
   0x1   :  { %s1292_s11 = smov 0  }
   0x2 LB: > { %s28_s12 = sadd.s32 1, %s1230_s10  ;;  %p1118_p0 = scmp.ge.s32.totalorder %s1234_s11, 1  ;;  %s1234_s11 = sphi %s1292_s11, %s19_s11   ;;  %s1230_s10 = sphi %s1290_s10, %s1387_s10   ;;  %s1226_s30 = sphi %s1288_s30, %s1386_s30  }
   0x3   : > { %p29_p1 = scmp.ge.s32.totalorder %s28_s12, 4  ;;  %p396_p2 = scmp.lt.s32.totalorder %s1234_s11, 5 }
   0x5   : > { %s1389_s12 = smov (%p29_p1, %s28_s12), 0  ;;  %p397_p3 = pnand %p1118_p0, %p396_p2 }
   0x6   : > { %p488_p4 = scmp.lt.s32.totalorder (!%p397_p3), %s1226_s30, 3 }
   0x7   : > { %400 = sbr.rel (%p397_p3) target bundleno = 1627 (0x65b), region = 56 }
   0xc   : > { %v566_v0 = vld [vmem:[%s1383_s7] sm:$0xff]  ;;  %v1236_v1 = vmov 0.0   ;;  %vm1237_vm0 = vmmov 0   ;;  %s1391_s30 = smov (!%p488_p4, %s1226_s30), 3  ;;  %vm568_vm1 = vcmask 64512   ;;  %vm643_vm2 = vcmask 261120  }
   0xd   : > { %1147 = vmatprep.subr.mxu0 %v1236_v1  ;;  %1149 = vmatprep.mubr.msk.f32.mxu0 %vm1237_vm0, %v1236_v1  ;;  %s1314_s15 = sshll.u32 %s1391_s30, 2  ;;  %v567_v4 = vld [vmem:[%s1384_s8] sm:$0xf]  ;;  %vm721_vm3 = vcmask 31744   ;;  %vm736_vm4 = vcmask 1043456   ;;  %s1125_s13 = sshll.u32 %s1391_s30, 3 }
   0xe   : > { %1148 = vmatpush3.msra.mxu0 %v566_v0  ;;  %1152 = vmatprep.subr.mxu1 %v1236_v1  ;;  %s533_s18 = scalar_lea.vmem %s1381_s5, %s1314_s15  ;;  %s525_s23 = scalar_lea.vmem %s1380_s4, %s1314_s15  ;;  %vm921_vm5 = vcmask 257024  }
   0xf   : > { %1154 = vmatprep.mubr.msk.f32.mxu1 %vm1237_vm0, %v1236_v1  ;;  %1157 = vmatprep.subr.mxu0 %v1236_v1  ;;  %v564_v2 = vld [vmem:[%s533_s18] sm:$0xf]  ;;  %s501_s26 = scalar_lea.vmem %s1377_s1, %s1314_s15  ;;  %s493_s29 = scalar_lea.vmem %s1376_s0, %s1314_s15 }
  0x10   : > { %v565_v3 = vunpack.c.l.bf16 %v564_v2  ;;  %1153 = vmatpush3.xpose.msk.msra.mxu1 %vm643_vm2, %v567_v4  ;;  %v562_v5 = vld [vmem:[%s525_s23] sm:$0xf]  ;;  %s541_s17 = scalar_lea.vmem %s1382_s6, %s1125_s13  ;;  %s509_s19 = scalar_lea.vmem %s1378_s2, %s1314_s15 }
  0x11   : > { %1162 = vmatprep.subr.bf16.mxu1 %v1236_v1  ;;  %v563_v6 = vunpack.c.l.bf16 %v562_v5  ;;  %v552_v19 = vld [vmem:[%s501_s26] sm:$0xf]  ;;  %s517_s22 = scalar_lea.vmem %s1379_s3, %s1314_s15  ;;  %s549_s25 = scalar_lea.vmem %s1385_s9, %s1314_s15 }
  0x12   : > { %1150 = vmatmul.mubr.msk.f32.vlgmr.msra.gmra.mxu0 %vm568_vm1, %v565_v3  ;;  %v816_v20 = vsel %vm643_vm2, %v552_v19, 0  ;;  %v551_v24 = vld [vmem:[%s493_s29] sm:$0xf] }
  0x13   : > { %1159 = vmatprep.mubr.msk.f32.mxu0 %vm1237_vm0, %v1236_v1  ;;  %1158 = vmatpush3.msk.msra.mxu0 %vm736_vm4, %v567_v4  ;;  %v809_v25 = vunpack.c.l.bf16 %v551_v24  ;;  %v859_v31 = vld [vmem:[%s541_s17] sm:$0xff] }
  0x14   : > { %1168 = vmatprep.subr.bf16.mxu0 %v1236_v1  ;;  %v553_v43 = vld [vmem:[%s509_s19] sm:$0xf] }
  0x15   : > { %v877_v44 = vsel %vm736_vm4, %v553_v43, 0  ;;  %v554_v49 = vld [vmem:[%s517_s22] sm:$0xf] }
  0x16   : > { %v555_v50 = vunpack.c.l.bf16 %v554_v49 }
  0x18   : > { %v1127_v51 = vmul.f32 -1.442695, %v555_v50 }
  0xd2   : > { %v638_v7 = vpop.f32.mrf.mxu0 }
  0xd3   : > { %v642_v8 = vmul.f32 %v638_v7, %v563_v6 }
  0xd4   : > { %v1151_v9 = vpop.f32.mrf.mxu0 }
  0xd5   : > { %1155 = vmatmul.mubr.msk.f32.vlgmr.msra.gmra.mxu1 %vm643_vm2, %v642_v8 }
  0xd6   : > { %1164 = vmatprep.mubr.msk.bf16.mxu1 %vm1237_vm0, %v1236_v1  ;;  %1163 = vmatpush3.bf16.xpose.msra.mxu1 %v816_v20 }
 0x195   : > { %v716_v10 = vpop.f32.mrf.mxu1 }
 0x196   : > { %v720_v11 = vmul.f32 0.35355338, %v716_v10 }
 0x197   : > { %v1156_v12 = vpop.f32.mrf.mxu1 }
 0x198   : > { %v722_v13 = vsel %vm721_vm3, %v720_v11, -inf }
 0x199   : > { %723 = vmax.xlane.f32.xlu0 %v722_v13 }
 0x222   : > { %v724_v14 = vpop.xlane.xlu0 %723 }
 0x223   : > { %v725_v15 = vsub.f32 %v720_v11, %v724_v14 }
 0x225   : > { %v726_v16 = vmul.f32 1.442695, %v725_v15 }
 0x227   : > { %1200 = vpow2.f32 %v726_v16 }
 0x234   : > { %v1201_v17 = vpop.eup %1200 }
 0x235   : > { %v728_v18 = vsel %vm721_vm3, %v1201_v17, 0.0 }
 0x236   : > { %729 = vadd.xlane.f32.xlu0 %v728_v18 }
 0x2bf   : > { %v730_v21 = vpop.xlane.xlu0 %729 }
 0x2c0   : > { %1202 = vrcp.f32 %v730_v21 }
 0x2cd   : > { %v1203_v22 = vpop.eup %1202 }
 0x2ce   : > { %v732_v23 = vmul.f32 %v1203_v22, %v1201_v17 }
 0x2d0   : > { %1160 = vmatmul.mubr.msk.f32.vlgmr.msra.gmra.mxu0 %vm721_vm3, %v732_v23 }
 0x2d1   : > { %1170 = vmatprep.mubr.msk.bf16.mxu0 %vm1237_vm0, %v1236_v1  ;;  %1169 = vmatpush3.bf16.msra.mxu0 %v877_v44 }
 0x390   : > { %v805_v26 = vpop.f32.mrf.mxu0 }
 0x391   : > { %v810_v27 = vmul.f32 %v809_v25, %v805_v26 }
 0x392   : > { %v1161_v28 = vpop.f32.mrf.mxu0 }
 0x393   : > { %v811_v29 = vpack.c.bf16 %v810_v27, %v810_v27 }
 0x395   : > { %1165 = vmatmul.mubr.msk.bf16.vlgmr.msra.gmra.mxu1 %vm643_vm2, %v811_v29 }
 0x455   : > { %v852_v30 = vpop.f32.mrf.mxu1 }
 0x456   : > { %v858_v32 = vmul.f32 0.35355338, %v852_v30 }
 0x457   : > { %v1166_v33 = vpop.f32.mrf.mxu1 }
 0x458   : > { %v860_v34 = vadd.f32 %v859_v31, %v858_v32 }
 0x459   : > { %v855_v35 = vpop.f32.mrf.mxu1 }
 0x45a   : > { %v861_v36 = vsel %vm568_vm1, %v860_v34, -inf }
 0x45b   : > { %862 = vmax.xlane.f32.xlu1 %v861_v36  ;;  %v1167_v37 = vpop.f32.mrf.mxu1 }
 0x4e4   : > { %v863_v38 = vpop.xlane.xlu1 %862 }
 0x4e5   : > { %v864_v39 = vsub.f32 %v860_v34, %v863_v38 }
 0x4e7   : > { %v865_v40 = vmul.f32 1.442695, %v864_v39 }
 0x4e9   : > { %1204 = vpow2.f32 %v865_v40 }
 0x4f6   : > { %v1205_v41 = vpop.eup %1204 }
 0x4f7   : > { %v867_v42 = vsel %vm568_vm1, %v1205_v41, 0.0 }
 0x4f8   : > { %868 = vadd.xlane.f32.xlu1 %v867_v42 }
 0x581   : > { %v869_v45 = vpop.xlane.xlu1 %868 }
 0x582   : > { %1206 = vrcp.f32 %v869_v45 }
 0x583   : > { %1208 = vpow2.f32 %v1127_v51 }
 0x58f   : > { %v1207_v46 = vpop.eup %1206 }
 0x590   : > { %v871_v47 = vmul.f32 %v1207_v46, %v1205_v41  ;;  %v1209_v52 = vpop.eup %1208 }
 0x591   : > { %v559_v53 = vadd.f32 1.0, %v1209_v52 }
 0x592   : > { %v872_v48 = vpack.c.bf16 %v871_v47, %v871_v47 }
 0x593   : > { %1210 = vrcp.f32 %v559_v53 }
 0x594   : > { %1171 = vmatmul.mubr.msk.bf16.vlgmr.msra.gmra.mxu0 %vm568_vm1, %v872_v48 }
 0x5a0   : > { %v1211_v54 = vpop.eup %1210 }
 0x654   : > { %v913_v55 = vpop.f32.mrf.mxu0 }
 0x655   : > { %v919_v56 = vmul.f32 %v1211_v54, %v913_v55 }
 0x656   : > { %v1172_v57 = vpop.f32.mrf.mxu0 }
 0x657   : > { %v920_v58 = vpack.c.bf16 %v919_v56, %v919_v56 }
 0x658   : > { %v916_v59 = vpop.f32.mrf.mxu0 }
 0x659   : > { %922 = vst.msk [vmem:[%s549_s25] sm:$0xf] %vm921_vm5, %v920_v58 }
 0x65a   : > { %v1173_v60 = vpop.f32.mrf.mxu0 }
 0x65b PF: > { %s19_s11 = sadd.s32 1, %s1234_s11   ;;  %s1386_s30 = smov %s1230_s10 }
 0x65c   : > { %p16_p5 = scmp.ge.s32.totalorder %s19_s11, 6   ;;  %s1387_s10 = smov %s1389_s12 }
 0x65e   :  { %18 = sbr.rel (!%p16_p5) target bundleno = 2 (0x2), region = 104 }

// kernel: msapairstr2msa_forward.17
= control target key start
LH: loop header
LB: loop body
LE: loop exit
PB: predicated region body
PF: predicated region fallthrough
CT: control target
= control target key end

     0   :  { %vm48_vm0 = vcmask 261120   ;;  %s224_s2 = inlined_call_operand.vmem [shape: bf16[32,32], index: 2, kind: input, shape index: {}]   ;;  %s225_s0 = inlined_call_operand.vmem [shape: bf16[32,32], index: 0, kind: input, shape index: {}]   ;;  %s226_s1 = inlined_call_operand.vmem [shape: f32[32,32], index: 1, kind: input, shape index: {}]   ;;  %s227_s3 = inlined_call_operand.vmem [shape: f32[1,32], index: 3, kind: input, shape index: {}]   ;;  %s228_s4 = inlined_call_operand.vmem [shape: f32[32,32], index: 4, kind: output, shape index: {}]  }
   0x1   :  { %v150_v0 = vld [vmem:[%s224_s2 + $0x8] sm:$0xff]   ;;  %v151_v1 = vld [vmem:[%s224_s2] sm:$0xff]   ;;  %v106_v4 = vld [vmem:[%s226_s1 + $0x10] sm:$0xff] }
   0x2   :  { %142 = vmatprep.subr.bf16.mxu0 %v150_v0  ;;  %v152_v2 = vld [vmem:[%s225_s0] sm:$0xff]   ;;  %v153_v3 = vld [vmem:[%s225_s0 + $0x8] sm:$0xff]   ;;  %v107_v10 = vld [vmem:[%s226_s1 + $0x18] sm:$0xff] }
   0x3   :  { %143 = vmatpush3.bf16.msra.mxu0 %v150_v0  ;;  %146 = vmatprep.mubr.msk.bf16.mxu0 %vm48_vm0, %v152_v2  ;;  %v137_v6 = vld [vmem:[%s227_s3] ss:$0 sm:$0xff]  ;;  %v105_v14 = vld [vmem:[%s226_s1 + $0x8] sm:$0xff] }
   0x4   :  { %144 = vmatprep.subr.bf16.mxu0 %v151_v1  ;;  %v104_v7 = vld [vmem:[%s226_s1] sm:$0xff] }
   0x7   :  { %145 = vmatpush3.bf16.msra.mxu0 %v151_v1 }
   0xa   :  { %147 = vmatmul.mubr.msk.bf16.vlgmr.msra.gmra.mxu0 %vm48_vm0, %v153_v3 }
  0xca   :  { %v148_v5 = vpop.f32.mrf.mxu0 }
  0xcb   :  { %v110_v8 = vadd.f32 %v148_v5, %v106_v4 }
  0xcc   :  { %v89_v9 = vpop.f32.mrf.mxu0 }
  0xcd   :  { %v121_v11 = vadd.f32 %v137_v6, %v110_v8  ;;  %v108_v12 = vadd.f32 %v104_v7, %v89_v9 }
  0xce   :  { %v149_v13 = vpop.f32.mrf.mxu0 }
  0xcf   :  { %125 = vst.msk [vmem:[%s228_s4 + $0x10] sm:$0xff] %vm48_vm0, %v121_v11  ;;  %v119_v15 = vadd.f32 %v137_v6, %v108_v12  ;;  %v111_v16 = vadd.f32 %v149_v13, %v107_v10 }
  0xd0   :  { %v92_v17 = vpop.f32.mrf.mxu0 }
  0xd1   :  { %123 = vst.msk [vmem:[%s228_s4] sm:$0xff] %vm48_vm0, %v119_v15  ;;  %v122_v18 = vadd.f32 %v137_v6, %v111_v16  ;;  %v109_v19 = vadd.f32 %v105_v14, %v92_v17 }
  0xd3   :  { %126 = vst.msk [vmem:[%s228_s4 + $0x18] sm:$0xff] %vm48_vm0, %v122_v18  ;;  %v120_v20 = vadd.f32 %v137_v6, %v109_v19 }
  0xd5   :  { %124 = vst.msk [vmem:[%s228_s4 + $0x8] sm:$0xff] %vm48_vm0, %v120_v20 }

// kernel: msapairstr2msa_forward.18
= control target key start
LH: loop header
LB: loop body
LE: loop exit
PB: predicated region body
PF: predicated region fallthrough
CT: control target
= control target key end

     0   :  { %vm25_vm0 = vcmask 261120   ;;  %s326_s0 = inlined_call_operand.vmem [shape: f32[32,32], index: 0, kind: input, shape index: {}]   ;;  %s327_s3 = inlined_call_operand.vmem [shape: bf16[32,128], index: 3, kind: input, shape index: {}]   ;;  %s328_s1 = inlined_call_operand.vmem [shape: f32[1,32], index: 1, kind: input, shape index: {}]   ;;  %s329_s2 = inlined_call_operand.vmem [shape: f32[1,32], index: 2, kind: input, shape index: {}]   ;;  %s330_s4 = inlined_call_operand.vmem [shape: f32[1,128], index: 4, kind: input, shape index: {}]   ;;  %s331_s5 = inlined_call_operand.vmem [shape: bf16[32,128], index: 5, kind: output, shape index: {}]  }
   0x1   :  { %v21_v0 = vld [vmem:[%s326_s0] sm:$0xff]  ;;  %v23_v1 = vld [vmem:[%s326_s0 + $0x10] sm:$0xff]  ;;  %v22_v2 = vld [vmem:[%s326_s0 + $0x8] sm:$0xff] }
   0x2   :  { %v26_v3 = vsel %vm25_vm0, %v21_v0, 0.0  ;;  %v32_v4 = vsel %vm25_vm0, %v23_v1, 0.0  ;;  %v24_v5 = vld [vmem:[%s326_s0 + $0x18] sm:$0xff]  ;;  %v29_v6 = vsel %vm25_vm0, %v22_v2, 0.0  ;;  %v243_v28 = vld [vmem:[%s327_s3 + $0x8] sm:$0xff]   ;;  %v244_v29 = vld [vmem:[%s327_s3] sm:$0xff]  }
   0x3   :  { %27 = vadd.xlane.f32.xlu0 %v26_v3  ;;  %33 = vadd.xlane.f32.xlu1 %v32_v4  ;;  %v35_v7 = vsel %vm25_vm0, %v24_v5, 0.0  ;;  %v205_v44 = vld [vmem:[%s328_s1] ss:$0 sm:$0xff] }
   0x4   :  { %235 = vmatprep.subr.bf16.mxu0 %v243_v28  ;;  %v206_v49 = vld [vmem:[%s329_s2] ss:$0 sm:$0xff] }
   0x5   :  { %236 = vmatpush3.bf16.msra.mxu0 %v243_v28  ;;  %v207_v63 = vld [vmem:[%s330_s4] ss:$0 sm:$0xff] }
   0x6   :  { %237 = vmatprep.subr.bf16.mxu0 %v244_v29 }
   0x7   :  { %30 = vadd.xlane.f32.xlu0 %v29_v6  ;;  %36 = vadd.xlane.f32.xlu1 %v35_v7 }
   0x9   :  { %238 = vmatpush3.bf16.msra.mxu0 %v244_v29 }
  0x8c   :  { %v28_v8 = vpop.xlane.xlu0 %27  ;;  %v34_v9 = vpop.xlane.xlu1 %33 }
  0x8d   :  { %v39_v10 = vmul.f32 0.03125, %v28_v8  ;;  %v41_v11 = vmul.f32 0.03125, %v34_v9 }
  0x8f   :  { %v43_v12 = vsub.f32 %v21_v0, %v39_v10  ;;  %v45_v13 = vsub.f32 %v23_v1, %v41_v11 }
  0x90   :  { %v31_v14 = vpop.xlane.xlu0 %30  ;;  %v37_v15 = vpop.xlane.xlu1 %36 }
  0x91   :  { %v40_v16 = vmul.f32 0.03125, %v31_v14  ;;  %v42_v17 = vmul.f32 0.03125, %v37_v15  ;;  %v47_v18 = vmul.f32 %v43_v12, %v43_v12  ;;  %v49_v19 = vmul.f32 %v45_v13, %v45_v13 }
  0x93   :  { %v44_v20 = vsub.f32 %v22_v2, %v40_v16  ;;  %v46_v21 = vsub.f32 %v24_v5, %v42_v17  ;;  %v51_v22 = vsel %vm25_vm0, %v47_v18, 0.0  ;;  %v57_v23 = vsel %vm25_vm0, %v49_v19, 0.0 }
  0x94   :  { %52 = vadd.xlane.f32.xlu0 %v51_v22 }
  0x95   :  { %v48_v24 = vmul.f32 %v44_v20, %v44_v20  ;;  %v50_v25 = vmul.f32 %v46_v21, %v46_v21 }
  0x97   :  { %v54_v26 = vsel %vm25_vm0, %v48_v24, 0.0  ;;  %v60_v27 = vsel %vm25_vm0, %v50_v25, 0.0 }
  0x98   :  { %58 = vadd.xlane.f32.xlu0 %v57_v23  ;;  %55 = vadd.xlane.f32.xlu1 %v54_v26 }
  0x9c   :  { %61 = vadd.xlane.f32.xlu1 %v60_v27 }
 0x11d   :  { %v53_v30 = vpop.xlane.xlu0 %52 }
 0x11e   :  { %v63_v31 = vmul.f32 0.03125, %v53_v30 }
 0x120   :  { %v67_v32 = vadd.f32 1e-05, %v63_v31 }
 0x121   :  { %v56_v33 = vpop.xlane.xlu1 %55  ;;  %v59_v34 = vpop.xlane.xlu0 %58 }
 0x122   :  { %245 = vrsqrt.f32 %v67_v32  ;;  %v64_v35 = vmul.f32 0.03125, %v56_v33  ;;  %v65_v36 = vmul.f32 0.03125, %v59_v34 }
 0x124   :  { %v68_v37 = vadd.f32 1e-05, %v64_v35  ;;  %v69_v38 = vadd.f32 1e-05, %v65_v36 }
 0x125   :  { %v62_v39 = vpop.xlane.xlu1 %61 }
 0x126   :  { %247 = vrsqrt.f32 %v68_v37  ;;  %v66_v40 = vmul.f32 0.03125, %v62_v39 }
 0x127   :  { %249 = vrsqrt.f32 %v69_v38 }
 0x128   :  { %v70_v41 = vadd.f32 1e-05, %v66_v40 }
 0x12a   :  { %251 = vrsqrt.f32 %v70_v41 }
 0x12f   :  { %v246_v42 = vpop.eup %245 }
 0x130   :  { %v75_v43 = vmul.f32 %v246_v42, %v43_v12 }
 0x132   :  { %v86_v48 = vmul.f32 %v205_v44, %v75_v43 }
 0x133   :  { %v248_v45 = vpop.eup %247 }
 0x134   :  { %v250_v46 = vpop.eup %249  ;;  %v76_v47 = vmul.f32 %v248_v45, %v44_v20  ;;  %v97_v53 = vadd.f32 %v206_v49, %v86_v48 }
 0x135   :  { %v77_v50 = vmul.f32 %v250_v46, %v45_v13 }
 0x136   :  { %v87_v51 = vmul.f32 %v205_v44, %v76_v47 }
 0x137   :  { %v252_v52 = vpop.eup %251  ;;  %v88_v56 = vmul.f32 %v205_v44, %v77_v50 }
 0x138   :  { %v98_v54 = vadd.f32 %v206_v49, %v87_v51  ;;  %v78_v55 = vmul.f32 %v252_v52, %v46_v21 }
 0x139   :  { %v99_v59 = vadd.f32 %v206_v49, %v88_v56 }
 0x13a   :  { %v101_v57 = vpack.c.bf16 %v98_v54, %v97_v53  ;;  %v89_v58 = vmul.f32 %v205_v44, %v78_v55 }
 0x13c   :  { %239 = vmatprep.mubr.msk.bf16.mxu0 %vm25_vm0, %v101_v57  ;;  %v100_v60 = vadd.f32 %v206_v49, %v89_v58 }
 0x13e   :  { %v102_v61 = vpack.c.bf16 %v100_v60, %v99_v59 }
 0x140   :  { %240 = vmatmul.mubr.msk.bf16.vlgmr.msra.gmra.mxu0 %vm25_vm0, %v102_v61 }
 0x200   :  { %v241_v62 = vpop.f32.mrf.mxu0 }
 0x201   :  { %v175_v2 = vadd.f32 %v241_v62, %v207_v63 }
 0x202   :  { %v166_v0 = vpop.f32.mrf.mxu0 }
 0x203   :  { %v167_v5 = vadd.f32 %v207_v63, %v166_v0 }
 0x204   :  { %v242_v1 = vpop.f32.mrf.mxu0 }
 0x205   :  { %v178_v3 = vadd.f32 %v242_v1, %v207_v63 }
 0x206   :  { %v169_v4 = vpop.f32.mrf.mxu0 }
 0x207   :  { %v228_v6 = vpack.c.bf16 %v178_v3, %v175_v2  ;;  %v170_v7 = vadd.f32 %v207_v63, %v169_v4 }
 0x209   :  { %230 = vst [vmem:[%s331_s5 + $0x8] sm:$0xff] %v228_v6   ;;  %v223_v8 = vpack.c.bf16 %v170_v7, %v167_v5 }
 0x20b   :  { %224 = vst [vmem:[%s331_s5] sm:$0xff] %v223_v8  }

// kernel: msapairstr2msa_forward.19
= control target key start
LH: loop header
LB: loop body
LE: loop exit
PB: predicated region body
PF: predicated region fallthrough
CT: control target
= control target key end

     0   :  { %s1764_s15 = smov 0   ;;  %s1766_s16 = smov 0   ;;  %s1979_s0 = inlined_call_operand.vmem [shape: bf16[1,4,8,4,8], index: 0, kind: input, shape index: {}]   ;;  %s1980_s1 = inlined_call_operand.vmem [shape: bf16[1,4,8,4,8], index: 1, kind: input, shape index: {}]   ;;  %s1981_s2 = inlined_call_operand.vmem [shape: bf16[1,4,8,4,8], index: 2, kind: input, shape index: {}]   ;;  %s1982_s3 = inlined_call_operand.vmem [shape: bf16[1,4,8,4,8], index: 3, kind: input, shape index: {}]   ;;  %s1983_s4 = inlined_call_operand.vmem [shape: bf16[1,4,8,4,8], index: 4, kind: output, shape index: {}]  }
   0x1   :  { %s1768_s17 = smov 0  }
   0x2 LB: > { %s23_s18 = sadd.s32 1, %s1731_s16  ;;  %p1453_p0 = scmp.ge.s32.totalorder %s1735_s17, 1  ;;  %s1735_s17 = sphi %s1768_s17, %s14_s17   ;;  %s1731_s16 = sphi %s1766_s16, %s1985_s16   ;;  %s1727_s15 = sphi %s1764_s15, %s1984_s15  }
   0x3   : > { %p24_p1 = scmp.ge.s32.totalorder %s23_s18, 4  ;;  %p230_p2 = scmp.lt.s32.totalorder %s1735_s17, 5 }
   0x5   : > { %s1987_s18 = smov (%p24_p1, %s23_s18), 0  ;;  %p231_p3 = pnand %p1453_p0, %p230_p2 }
   0x6   : > { %p293_p4 = scmp.lt.s32.totalorder (!%p231_p3), %s1727_s15, 3 }
   0x7   : > { %234 = sbr.rel (%p231_p3) target bundleno = 760 (0x2f8), region = 36 }
   0xc   : > { %v1737_v0 = vmov 0.0   ;;  %s1989_s15 = smov (!%p293_p4, %s1727_s15), 3  ;;  %vm1738_vm0 = vmmov 0   ;;  %vm425_vm1 = vcmask 64512   ;;  %vm802_vm2 = vcmask 27648  }
   0xd   : > { %1527 = vmatprep.subr.bf16.mxu0 %v1737_v0  ;;  %1533 = vmatprep.subr.bf16.mxu1 %v1737_v0  ;;  %s1788_s19 = sshll.u32 %s1989_s15, 4  ;;  %vm903_vm3 = vcmask 1041408   ;;  %vm899_vm4 = vcmask 31744   ;;  %vm1285_vm5 = vcmask 58368  }
   0xe   : > { %1529 = vmatprep.mubr.msk.bf16.mxu0 %vm1738_vm0, %v1737_v0  ;;  %1535 = vmatprep.mubr.msk.bf16.mxu1 %vm1738_vm0, %v1737_v0  ;;  %s1794_s22 = scalar_lea.vmem %s1980_s1, %s1788_s19  ;;  %s1804_s25 = scalar_lea.vmem %s1979_s0, %s1788_s19 }
   0xf   : > { %v345_v1 = vld [vmem:[%s1794_s22] sm:$0x3]  ;;  %v346_v2 = vld [vmem:[%s1794_s22 + $0x2] sm:$0x3]  ;;  %v347_v5 = vld [vmem:[%s1794_s22 + $0x4] sm:$0x3]  ;;  %s317_s28 = scalar_lea.vmem %s1981_s2, %s1788_s19  ;;  %s326_s5 = scalar_lea.vmem %s1982_s3, %s1788_s19 }
  0x10   : > { %v430_v3 = vsel %vm425_vm1, %v345_v1, 0  ;;  %v476_v4 = vsel %vm425_vm1, %v346_v2, 0  ;;  %v348_v6 = vld [vmem:[%s1794_s22 + $0x6] sm:$0x3]  ;;  %v337_v7 = vld [vmem:[%s1804_s25] sm:$0x3]  ;;  %s1952_s8 = scalar_lea.vmem %s1983_s4, %s1788_s19 }
  0x11   : > { %1528 = vmatpush3.bf16.xpose.msra.mxu0 %v430_v3  ;;  %1534 = vmatpush3.bf16.xpose.msra.mxu1 %v476_v4  ;;  %v338_v8 = vld [vmem:[%s1804_s25 + $0x2] sm:$0x3]  ;;  %v522_v9 = vsel %vm425_vm1, %v347_v5, 0  ;;  %v568_v10 = vsel %vm425_vm1, %v348_v6, 0  ;;  %v349_v11 = vld [vmem:[%s1794_s22 + $0x8] sm:$0x3] }
  0x12   : > { %1539 = vmatprep.subr.bf16.mxu0 %v1737_v0  ;;  %1545 = vmatprep.subr.bf16.mxu1 %v1737_v0  ;;  %v350_v12 = vld [vmem:[%s1794_s22 + $0xa] sm:$0x3]  ;;  %v339_v13 = vld [vmem:[%s1804_s25 + $0x4] sm:$0x3]  ;;  %v340_v14 = vld [vmem:[%s1804_s25 + $0x6] sm:$0x3] }
  0x13   : > { %v614_v15 = vsel %vm425_vm1, %v349_v11, 0  ;;  %v660_v16 = vsel %vm425_vm1, %v350_v12, 0  ;;  %v351_v17 = vld [vmem:[%s1794_s22 + $0xc] sm:$0x3]  ;;  %v352_v18 = vld [vmem:[%s1794_s22 + $0xe] sm:$0x3] }
  0x14   : > { %v341_v19 = vld [vmem:[%s1804_s25 + $0x8] sm:$0x3]  ;;  %v342_v20 = vld [vmem:[%s1804_s25 + $0xa] sm:$0x3]  ;;  %v706_v21 = vsel %vm425_vm1, %v351_v17, 0  ;;  %v752_v22 = vsel %vm425_vm1, %v352_v18, 0 }
  0x15   : > { %v343_v23 = vld [vmem:[%s1804_s25 + $0xc] sm:$0x3]  ;;  %v344_v24 = vld [vmem:[%s1804_s25 + $0xe] sm:$0x3] }
  0x18   : > { %1530 = vmatmul.mubr.msk.bf16.vlgmr.msra.gmra.mxu0 %vm425_vm1, %v337_v7  ;;  %1536 = vmatmul.mubr.msk.bf16.vlgmr.msra.gmra.mxu1 %vm425_vm1, %v338_v8 }
  0x19   : > { %1540 = vmatpush3.bf16.xpose.msra.mxu0 %v522_v9  ;;  %1546 = vmatpush3.bf16.xpose.msra.mxu1 %v568_v10 }
  0x1a   : > { %1541 = vmatprep.mubr.msk.bf16.mxu0 %vm1738_vm0, %v1737_v0  ;;  %1547 = vmatprep.mubr.msk.bf16.mxu1 %vm1738_vm0, %v1737_v0 }
  0x1b   : > { %1551 = vmatprep.subr.bf16.mxu0 %v1737_v0  ;;  %1557 = vmatprep.subr.bf16.mxu1 %v1737_v0 }
  0x20   : > { %1542 = vmatmul.mubr.msk.bf16.vlgmr.msra.gmra.mxu0 %vm425_vm1, %v339_v13  ;;  %1548 = vmatmul.mubr.msk.bf16.vlgmr.msra.gmra.mxu1 %vm425_vm1, %v340_v14 }
  0x21   : > { %1552 = vmatpush3.bf16.xpose.msra.mxu0 %v614_v15  ;;  %1558 = vmatpush3.bf16.xpose.msra.mxu1 %v660_v16 }
  0x22   : > { %1553 = vmatprep.mubr.msk.bf16.mxu0 %vm1738_vm0, %v1737_v0  ;;  %1559 = vmatprep.mubr.msk.bf16.mxu1 %vm1738_vm0, %v1737_v0 }
  0x23   : > { %1563 = vmatprep.subr.bf16.mxu0 %v1737_v0  ;;  %1569 = vmatprep.subr.bf16.mxu1 %v1737_v0 }
  0x28   : > { %1554 = vmatmul.mubr.msk.bf16.vlgmr.msra.gmra.mxu0 %vm425_vm1, %v341_v19  ;;  %1560 = vmatmul.mubr.msk.bf16.vlgmr.msra.gmra.mxu1 %vm425_vm1, %v342_v20 }
  0x29   : > { %1564 = vmatpush3.bf16.xpose.msra.mxu0 %v706_v21  ;;  %1570 = vmatpush3.bf16.xpose.msra.mxu1 %v752_v22 }
  0x2a   : > { %1565 = vmatprep.mubr.msk.bf16.mxu0 %vm1738_vm0, %v1737_v0  ;;  %1571 = vmatprep.mubr.msk.bf16.mxu1 %vm1738_vm0, %v1737_v0 }
  0x2b   : > { %1575 = vmatprep.subr.bf16.mxu0 %v1737_v0  ;;  %1581 = vmatprep.subr.bf16.mxu1 %v1737_v0 }
  0x30   : > { %1566 = vmatmul.mubr.msk.bf16.vlgmr.msra.gmra.mxu0 %vm425_vm1, %v343_v23  ;;  %1572 = vmatmul.mubr.msk.bf16.vlgmr.msra.gmra.mxu1 %vm425_vm1, %v344_v24 }
  0x31   : > { %1577 = vmatprep.mubr.msk.bf16.mxu0 %vm1738_vm0, %v1737_v0  ;;  %1583 = vmatprep.mubr.msk.bf16.mxu1 %vm1738_vm0, %v1737_v0 }
  0xd8   : > { %v466_v25 = vpop.f32.mrf.mxu0  ;;  %v512_v26 = vpop.f32.mrf.mxu1 }
  0xd9   : > { %v794_v27 = vmul.f32 0.35355338, %v466_v25  ;;  %v795_v28 = vmul.f32 0.35355338, %v512_v26 }
  0xda   : > { %v1531_v29 = vpop.f32.mrf.mxu0  ;;  %v1537_v30 = vpop.f32.mrf.mxu1 }
  0xdb   : > { %v803_v31 = vsel %vm802_vm2, %v794_v27, -inf  ;;  %v806_v34 = vsel %vm802_vm2, %v795_v28, -inf }
  0xdc   : > { %v515_v32 = vpop.f32.mrf.mxu1  ;;  %804 = vmax.xlane.f32.xlu0 %v803_v31  ;;  %v469_v33 = vpop.f32.mrf.mxu0 }
  0xde   : > { %v1532_v35 = vpop.f32.mrf.mxu0  ;;  %v1538_v36 = vpop.f32.mrf.mxu1 }
  0xe0   : > { %v604_v37 = vpop.f32.mrf.mxu1  ;;  %807 = vmax.xlane.f32.xlu0 %v806_v34  ;;  %v558_v38 = vpop.f32.mrf.mxu0 }
  0xe1   : > { %v797_v39 = vmul.f32 0.35355338, %v604_v37  ;;  %v796_v40 = vmul.f32 0.35355338, %v558_v38 }
  0xe2   : > { %v1543_v41 = vpop.f32.mrf.mxu0  ;;  %v1549_v42 = vpop.f32.mrf.mxu1 }
  0xe3   : > { %v809_v43 = vsel %vm802_vm2, %v796_v40, -inf  ;;  %v812_v46 = vsel %vm802_vm2, %v797_v39, -inf }
  0xe4   : > { %v607_v44 = vpop.f32.mrf.mxu1  ;;  %810 = vmax.xlane.f32.xlu1 %v809_v43  ;;  %v561_v45 = vpop.f32.mrf.mxu0 }
  0xe6   : > { %v1544_v47 = vpop.f32.mrf.mxu0  ;;  %v1550_v48 = vpop.f32.mrf.mxu1 }
  0xe8   : > { %v696_v49 = vpop.f32.mrf.mxu1  ;;  %813 = vmax.xlane.f32.xlu1 %v812_v46  ;;  %v650_v50 = vpop.f32.mrf.mxu0 }
  0xe9   : > { %v799_v51 = vmul.f32 0.35355338, %v696_v49  ;;  %v798_v52 = vmul.f32 0.35355338, %v650_v50  ;;  %v353_v49 = vld [vmem:[%s317_s28] sm:$0x3] }
  0xea   : > { %v1555_v53 = vpop.f32.mrf.mxu0  ;;  %v1561_v54 = vpop.f32.mrf.mxu1  ;;  %v354_v50 = vld [vmem:[%s317_s28 + $0x2] sm:$0x3] }
  0xeb   : > { %v818_v55 = vsel %vm802_vm2, %v799_v51, -inf  ;;  %v815_v56 = vsel %vm802_vm2, %v798_v52, -inf  ;;  %v951_v53 = vsel %vm903_vm3, %v354_v50, 0  ;;  %v356_v54 = vld [vmem:[%s317_s28 + $0x6] sm:$0x3] }
  0xec   : > { %v699_v57 = vpop.f32.mrf.mxu1  ;;  %819 = vmax.xlane.f32.xlu1 %v818_v55  ;;  %816 = vmax.xlane.f32.xlu0 %v815_v56  ;;  %v653_v58 = vpop.f32.mrf.mxu0  ;;  %v355_v55 = vld [vmem:[%s317_s28 + $0x4] sm:$0x3]  ;;  %v1043_v56 = vsel %vm903_vm3, %v356_v54, 0 }
  0xed   : > { %1582 = vmatpush3.bf16.msra.mxu1 %v951_v53  ;;  %v997_v57 = vsel %vm903_vm3, %v355_v55, 0  ;;  %v357_v58 = vld [vmem:[%s317_s28 + $0x8] sm:$0x3] }
  0xee   : > { %v1556_v59 = vpop.f32.mrf.mxu0  ;;  %v1562_v60 = vpop.f32.mrf.mxu1  ;;  %1593 = vmatprep.subr.bf16.mxu1 %v1737_v0 }
  0xef   : > { %v358_v59 = vld [vmem:[%s317_s28 + $0xa] sm:$0x3]  ;;  %v1089_v60 = vsel %vm903_vm3, %v357_v58, 0 }
  0xf0   : > { %v742_v61 = vpop.f32.mrf.mxu0  ;;  %v788_v62 = vpop.f32.mrf.mxu1 }
  0xf1   : > { %v800_v63 = vmul.f32 0.35355338, %v742_v61  ;;  %v801_v1 = vmul.f32 0.35355338, %v788_v62  ;;  %v1135_v61 = vsel %vm903_vm3, %v358_v59, 0 }
  0xf2   : > { %v1567_v2 = vpop.f32.mrf.mxu0  ;;  %v1573_v3 = vpop.f32.mrf.mxu1  ;;  %v359_v62 = vld [vmem:[%s317_s28 + $0xc] sm:$0x3] }
  0xf3   : > { %v824_v4 = vsel %vm802_vm2, %v801_v1, -inf  ;;  %v821_v5 = vsel %vm802_vm2, %v800_v63, -inf }
  0xf4   : > { %v791_v6 = vpop.f32.mrf.mxu1  ;;  %825 = vmax.xlane.f32.xlu1 %v824_v4  ;;  %822 = vmax.xlane.f32.xlu0 %v821_v5  ;;  %v745_v7 = vpop.f32.mrf.mxu0 }
  0xf6   : > { %v1568_v8 = vpop.f32.mrf.mxu0  ;;  %v1574_v9 = vpop.f32.mrf.mxu1 }
 0x165   : > { %v805_v10 = vpop.xlane.xlu0 %804 }
 0x166   : > { %v827_v11 = vsub.f32 %v794_v27, %v805_v10 }
 0x168   : > { %v835_v12 = vmul.f32 1.442695, %v827_v11 }
 0x169   : > { %v808_v13 = vpop.xlane.xlu0 %807 }
 0x16a   : > { %1649 = vpow2.f32 %v835_v12  ;;  %v828_v14 = vsub.f32 %v795_v28, %v808_v13 }
 0x16c   : > { %v837_v15 = vmul.f32 1.442695, %v828_v14 }
 0x16d   : > { %v811_v16 = vpop.xlane.xlu1 %810 }
 0x16e   : > { %1651 = vpow2.f32 %v837_v15  ;;  %v829_v17 = vsub.f32 %v796_v40, %v811_v16 }
 0x170   : > { %v839_v18 = vmul.f32 1.442695, %v829_v17 }
 0x171   : > { %v814_v19 = vpop.xlane.xlu1 %813 }
 0x172   : > { %1653 = vpow2.f32 %v839_v18  ;;  %v830_v20 = vsub.f32 %v797_v39, %v814_v19 }
 0x174   : > { %v841_v21 = vmul.f32 1.442695, %v830_v20 }
 0x175   : > { %v820_v22 = vpop.xlane.xlu1 %819  ;;  %v817_v23 = vpop.xlane.xlu0 %816 }
 0x176   : > { %1655 = vpow2.f32 %v841_v21  ;;  %v832_v24 = vsub.f32 %v799_v51, %v820_v22  ;;  %v831_v25 = vsub.f32 %v798_v52, %v817_v23  ;;  %v905_v52 = vsel %vm903_vm3, %v353_v49, 0 }
 0x177   : > { %v1866_v26 = vpop.eup %1649  ;;  %1576 = vmatpush3.bf16.msra.mxu0 %v905_v52  ;;  %v367_v52 = vld [vmem:[%s326_s5 + $0xc] sm:$0x3] }
 0x178   : > { %v845_v27 = vmul.f32 1.442695, %v832_v24  ;;  %v843_v29 = vmul.f32 1.442695, %v831_v25  ;;  %v851_v28 = vsel %vm802_vm2, %v1866_v26, 0.0  ;;  %1587 = vmatprep.subr.bf16.mxu0 %v1737_v0 }
 0x179   : > { %852 = vadd.xlane.f32.xlu0 %v851_v28 }
 0x17a   : > { %1657 = vpow2.f32 %v845_v27 }
 0x17b   : > { %v1870_v30 = vpop.eup %1651  ;;  %1659 = vpow2.f32 %v843_v29 }
 0x17c   : > { %v854_v31 = vsel %vm802_vm2, %v1870_v30, 0.0 }
 0x17d   : > { %855 = vadd.xlane.f32.xlu1 %v854_v31  ;;  %v826_v32 = vpop.xlane.xlu1 %825  ;;  %v823_v33 = vpop.xlane.xlu0 %822 }
 0x17e   : > { %v834_v34 = vsub.f32 %v801_v1, %v826_v32  ;;  %v833_v35 = vsub.f32 %v800_v63, %v823_v33  ;;  %v360_v63 = vld [vmem:[%s317_s28 + $0xe] sm:$0x3]  ;;  %v1181_v1 = vsel %vm903_vm3, %v359_v62, 0 }
 0x17f   : > { %v1874_v36 = vpop.eup %1653  ;;  %v1227_v2 = vsel %vm903_vm3, %v360_v63, 0 }
 0x180   : > { %v849_v37 = vmul.f32 1.442695, %v834_v34  ;;  %v847_v38 = vmul.f32 1.442695, %v833_v35  ;;  %v857_v39 = vsel %vm802_vm2, %v1874_v36, 0.0 }
 0x181   : > { %858 = vadd.xlane.f32.xlu0 %v857_v39  ;;  %v361_v35 = vld [vmem:[%s326_s5] sm:$0x3] }
 0x182   : > { %1661 = vpow2.f32 %v849_v37  ;;  %v362_v37 = vld [vmem:[%s326_s5 + $0x2] sm:$0x3] }
 0x183   : > { %v1878_v40 = vpop.eup %1655  ;;  %1663 = vpow2.f32 %v847_v38  ;;  %v370_v39 = vunpack.c.l.bf16 %v362_v37 }
 0x184   : > { %v860_v41 = vsel %vm802_vm2, %v1878_v40, 0.0 }
 0x185   : > { %861 = vadd.xlane.f32.xlu1 %v860_v41  ;;  %v1465_v41 = vmul.f32 -1.442695, %v370_v39 }
 0x187   : > { %v1882_v42 = vpop.eup %1657 }
 0x188   : > { %v1884_v43 = vpop.eup %1659  ;;  %v866_v44 = vsel %vm802_vm2, %v1882_v42, 0.0 }
 0x189   : > { %867 = vadd.xlane.f32.xlu1 %v866_v44  ;;  %v863_v45 = vsel %vm802_vm2, %v1884_v43, 0.0 }
 0x18a   : > { %864 = vadd.xlane.f32.xlu0 %v863_v45  ;;  %v365_v45 = vld [vmem:[%s326_s5 + $0x8] sm:$0x3] }
 0x18f   : > { %v1890_v46 = vpop.eup %1661 }
 0x190   : > { %v1896_v47 = vpop.eup %1663  ;;  %v872_v48 = vsel %vm802_vm2, %v1890_v46, 0.0 }
 0x191   : > { %873 = vadd.xlane.f32.xlu1 %v872_v48  ;;  %v869_v51 = vsel %vm802_vm2, %v1896_v47, 0.0  ;;  %v366_v48 = vld [vmem:[%s326_s5 + $0xa] sm:$0x3] }
 0x192   : > { %870 = vadd.xlane.f32.xlu0 %v869_v51  ;;  %v374_v50 = vunpack.c.l.bf16 %v366_v48 }
 0x194   : > { %v1469_v54 = vmul.f32 -1.442695, %v374_v50 }
 0x202   : > { %v853_v3 = vpop.xlane.xlu0 %852 }
 0x203   : > { %1665 = vrcp.f32 %v853_v3 }
 0x206   : > { %v856_v4 = vpop.xlane.xlu1 %855 }
 0x207   : > { %1667 = vrcp.f32 %v856_v4 }
 0x20a   : > { %v859_v5 = vpop.xlane.xlu0 %858 }
 0x20b   : > { %1669 = vrcp.f32 %v859_v5 }
 0x20e   : > { %v862_v6 = vpop.xlane.xlu1 %861 }
 0x20f   : > { %1671 = vrcp.f32 %v862_v6 }
 0x210   : > { %v1666_v7 = vpop.eup %1665 }
 0x211   : > { %v883_v8 = vmul.f32 %v1666_v7, %v1866_v26 }
 0x212   : > { %v868_v9 = vpop.xlane.xlu1 %867 }
 0x213   : > { %1673 = vrcp.f32 %v868_v9  ;;  %v865_v10 = vpop.xlane.xlu0 %864  ;;  %v891_v11 = vpack.c.bf16 %v883_v8, %v883_v8 }
 0x214   : > { %v1668_v12 = vpop.eup %1667  ;;  %1675 = vrcp.f32 %v865_v10 }
 0x215   : > { %1578 = vmatmul.mubr.msk.bf16.vlgmr.msra.gmra.mxu0 %vm899_vm4, %v891_v11  ;;  %v884_v13 = vmul.f32 %v1668_v12, %v1870_v30 }
 0x216   : > { %1588 = vmatpush3.bf16.msra.mxu0 %v997_v57  ;;  %1589 = vmatprep.mubr.msk.bf16.mxu0 %vm1738_vm0, %v1737_v0  ;;  %v368_v57 = vld [vmem:[%s326_s5 + $0xe] sm:$0x3] }
 0x217   : > { %v892_v14 = vpack.c.bf16 %v884_v13, %v884_v13  ;;  %1599 = vmatprep.subr.bf16.mxu0 %v1737_v0 }
 0x218   : > { %v1670_v15 = vpop.eup %1669 }
 0x219   : > { %1584 = vmatmul.mubr.msk.bf16.vlgmr.msra.gmra.mxu1 %vm899_vm4, %v892_v14  ;;  %v885_v16 = vmul.f32 %v1670_v15, %v1874_v36  ;;  %v369_v36 = vunpack.c.l.bf16 %v361_v35 }
 0x21a   : > { %1594 = vmatpush3.bf16.msra.mxu1 %v1043_v56  ;;  %v874_v17 = vpop.xlane.xlu1 %873  ;;  %1595 = vmatprep.mubr.msk.bf16.mxu1 %vm1738_vm0, %v1737_v0  ;;  %v375_v56 = vunpack.c.l.bf16 %v367_v52 }
 0x21b   : > { %1677 = vrcp.f32 %v874_v17  ;;  %v871_v18 = vpop.xlane.xlu0 %870  ;;  %v893_v19 = vpack.c.bf16 %v885_v16, %v885_v16  ;;  %1605 = vmatprep.subr.bf16.mxu1 %v1737_v0  ;;  %v1464_v38 = vmul.f32 -1.442695, %v369_v36 }
 0x21c   : > { %v1672_v20 = vpop.eup %1671  ;;  %1679 = vrcp.f32 %v871_v18 }
 0x21d   : > { %1590 = vmatmul.mubr.msk.bf16.vlgmr.msra.gmra.mxu0 %vm899_vm4, %v893_v19  ;;  %v886_v21 = vmul.f32 %v1672_v20, %v1878_v40  ;;  %v363_v40 = vld [vmem:[%s326_s5 + $0x4] sm:$0x3]  ;;  %1681 = vpow2.f32 %v1464_v38 }
 0x21e   : > { %1600 = vmatpush3.bf16.msra.mxu0 %v1089_v60  ;;  %1601 = vmatprep.mubr.msk.bf16.mxu0 %vm1738_vm0, %v1737_v0  ;;  %1683 = vpow2.f32 %v1465_v41  ;;  %v376_v60 = vunpack.c.l.bf16 %v368_v57 }
 0x21f   : > { %v894_v22 = vpack.c.bf16 %v886_v21, %v886_v21  ;;  %1611 = vmatprep.subr.bf16.mxu0 %v1737_v0 }
 0x220   : > { %v1674_v23 = vpop.eup %1673  ;;  %v1471_v63 = vmul.f32 -1.442695, %v376_v60 }
 0x221   : > { %v1676_v24 = vpop.eup %1675  ;;  %1596 = vmatmul.mubr.msk.bf16.vlgmr.msra.gmra.mxu1 %vm899_vm4, %v894_v22  ;;  %v888_v26 = vmul.f32 %v1674_v23, %v1882_v42  ;;  %v364_v42 = vld [vmem:[%s326_s5 + $0x6] sm:$0x3] }
 0x222   : > { %1606 = vmatpush3.bf16.msra.mxu1 %v1135_v61  ;;  %v887_v25 = vmul.f32 %v1676_v24, %v1884_v43  ;;  %1607 = vmatprep.mubr.msk.bf16.mxu1 %vm1738_vm0, %v1737_v0  ;;  %v372_v44 = vunpack.c.l.bf16 %v364_v42  ;;  %v1470_v61 = vmul.f32 -1.442695, %v375_v56 }
 0x223   : > { %1617 = vmatprep.subr.bf16.mxu1 %v1737_v0  ;;  %v896_v29 = vpack.c.bf16 %v888_v26, %v888_v26 }
 0x224   : > { %v895_v27 = vpack.c.bf16 %v887_v25, %v887_v25 }
 0x226   : > { %1602 = vmatmul.mubr.msk.bf16.vlgmr.msra.gmra.mxu0 %vm899_vm4, %v895_v27 }
 0x227   : > { %1612 = vmatpush3.bf16.msra.mxu0 %v1181_v1  ;;  %1613 = vmatprep.mubr.msk.bf16.mxu0 %vm1738_vm0, %v1737_v0 }
 0x228   : > { %v1678_v28 = vpop.eup %1677 }
 0x229   : > { %v1680_v30 = vpop.eup %1679  ;;  %1608 = vmatmul.mubr.msk.bf16.vlgmr.msra.gmra.mxu1 %vm899_vm4, %v896_v29  ;;  %v890_v32 = vmul.f32 %v1678_v28, %v1890_v46  ;;  %v1467_v46 = vmul.f32 -1.442695, %v372_v44 }
 0x22a   : > { %1618 = vmatpush3.bf16.msra.mxu1 %v1227_v2  ;;  %v889_v31 = vmul.f32 %v1680_v30, %v1896_v47  ;;  %1619 = vmatprep.mubr.msk.bf16.mxu1 %vm1738_vm0, %v1737_v0  ;;  %v371_v0 = vunpack.c.l.bf16 %v363_v40  ;;  %v373_v47 = vunpack.c.l.bf16 %v365_v45  ;;  %v1682_v49 = vpop.eup %1681 }
 0x22b   : > { %v898_v34 = vpack.c.bf16 %v890_v32, %v890_v32  ;;  %v401_v53 = vadd.f32 1.0, %v1682_v49  ;;  %v1684_v55 = vpop.eup %1683 }
 0x22c   : > { %v897_v33 = vpack.c.bf16 %v889_v31, %v889_v31  ;;  %v1466_v43 = vmul.f32 -1.442695, %v371_v0  ;;  %v1468_v51 = vmul.f32 -1.442695, %v373_v47  ;;  %v402_v59 = vadd.f32 1.0, %v1684_v55 }
 0x22e   : > { %1614 = vmatmul.mubr.msk.bf16.vlgmr.msra.gmra.mxu0 %vm899_vm4, %v897_v33  ;;  %1685 = vpow2.f32 %v1466_v43 }
 0x22f   : > { %1687 = vpow2.f32 %v1467_v46 }
 0x230   : > { %1689 = vpow2.f32 %v1468_v51 }
 0x231   : > { %1620 = vmatmul.mubr.msk.bf16.vlgmr.msra.gmra.mxu1 %vm899_vm4, %v898_v34  ;;  %1691 = vrcp.f32 %v401_v53 }
 0x232   : > { %1693 = vpow2.f32 %v1469_v54 }
 0x233   : > { %1695 = vrcp.f32 %v402_v59 }
 0x234   : > { %1697 = vpow2.f32 %v1470_v61 }
 0x23b   : > { %v1686_v58 = vpop.eup %1685 }
 0x23c   : > { %v403_v62 = vadd.f32 1.0, %v1686_v58  ;;  %v1688_v1 = vpop.eup %1687 }
 0x23d   : > { %v404_v2 = vadd.f32 1.0, %v1688_v1  ;;  %v1690_v3 = vpop.eup %1689 }
 0x23e   : > { %1699 = vrcp.f32 %v403_v62  ;;  %v1692_v4 = vpop.eup %1691  ;;  %v405_v6 = vadd.f32 1.0, %v1690_v3 }
 0x23f   : > { %1701 = vpow2.f32 %v1471_v63  ;;  %v1694_v5 = vpop.eup %1693 }
 0x240   : > { %1703 = vrcp.f32 %v404_v2  ;;  %v406_v9 = vadd.f32 1.0, %v1694_v5  ;;  %v1696_v10 = vpop.eup %1695 }
 0x241   : > { %1705 = vrcp.f32 %v405_v6  ;;  %v1698_v12 = vpop.eup %1697 }
 0x242   : > { %1707 = vrcp.f32 %v406_v9  ;;  %v407_v21 = vadd.f32 1.0, %v1698_v12 }
 0x244   : > { %1709 = vrcp.f32 %v407_v21 }
 0x24b   : > { %v1700_v16 = vpop.eup %1699 }
 0x24c   : > { %v1702_v18 = vpop.eup %1701 }
 0x24d   : > { %v408_v26 = vadd.f32 1.0, %v1702_v18  ;;  %v1704_v27 = vpop.eup %1703 }
 0x24e   : > { %v1706_v36 = vpop.eup %1705 }
 0x24f   : > { %1711 = vrcp.f32 %v408_v26  ;;  %v1708_v40 = vpop.eup %1707 }
 0x251   : > { %v1710_v48 = vpop.eup %1709 }
 0x25c   : > { %v1712_v53 = vpop.eup %1711 }
 0x2d5   : > { %v941_v7 = vpop.f32.mrf.mxu0 }
 0x2d6   : > { %v1269_v8 = vmul.f32 %v1692_v4, %v941_v7 }
 0x2d7   : > { %v1579_v11 = vpop.f32.mrf.mxu0 }
 0x2d8   : > { %v1277_v13 = vpack.c.bf16 %v1269_v8, %v1269_v8 }
 0x2d9   : > { %v944_v14 = vpop.f32.mrf.mxu0  ;;  %v987_v15 = vpop.f32.mrf.mxu1 }
 0x2da   : > { %1286 = vst.msk [vmem:[%s1952_s8] sm:$0x3] %vm1285_vm5, %v1277_v13  ;;  %v1270_v17 = vmul.f32 %v1696_v10, %v987_v15 }
 0x2db   : > { %v1580_v19 = vpop.f32.mrf.mxu0  ;;  %v1585_v20 = vpop.f32.mrf.mxu1 }
 0x2dc   : > { %v1278_v22 = vpack.c.bf16 %v1270_v17, %v1270_v17 }
 0x2dd   : > { %v990_v23 = vpop.f32.mrf.mxu1  ;;  %v1033_v24 = vpop.f32.mrf.mxu0 }
 0x2de   : > { %1287 = vst.msk [vmem:[%s1952_s8 + $0x2] sm:$0x3] %vm1285_vm5, %v1278_v22  ;;  %v1271_v25 = vmul.f32 %v1700_v16, %v1033_v24 }
 0x2df   : > { %v1586_v29 = vpop.f32.mrf.mxu1  ;;  %v1591_v28 = vpop.f32.mrf.mxu0 }
 0x2e0   : > { %v1279_v30 = vpack.c.bf16 %v1271_v25, %v1271_v25 }
 0x2e1   : > { %v1036_v31 = vpop.f32.mrf.mxu0  ;;  %v1079_v32 = vpop.f32.mrf.mxu1 }
 0x2e2   : > { %1288 = vst.msk [vmem:[%s1952_s8 + $0x4] sm:$0x3] %vm1285_vm5, %v1279_v30  ;;  %v1272_v33 = vmul.f32 %v1704_v27, %v1079_v32 }
 0x2e3   : > { %v1592_v34 = vpop.f32.mrf.mxu0  ;;  %v1597_v35 = vpop.f32.mrf.mxu1 }
 0x2e4   : > { %v1280_v37 = vpack.c.bf16 %v1272_v33, %v1272_v33 }
 0x2e5   : > { %v1082_v38 = vpop.f32.mrf.mxu1 }
 0x2e6   : > { %1289 = vst.msk [vmem:[%s1952_s8 + $0x6] sm:$0x3] %vm1285_vm5, %v1280_v37  ;;  %v1125_v39 = vpop.f32.mrf.mxu0 }
 0x2e7   : > { %v1273_v0 = vmul.f32 %v1706_v36, %v1125_v39  ;;  %v1598_v41 = vpop.f32.mrf.mxu1 }
 0x2e8   : > { %v1603_v42 = vpop.f32.mrf.mxu0 }
 0x2e9   : > { %v1281_v43 = vpack.c.bf16 %v1273_v0, %v1273_v0  ;;  %v1171_v44 = vpop.f32.mrf.mxu1 }
 0x2ea   : > { %v1128_v45 = vpop.f32.mrf.mxu0  ;;  %v1274_v46 = vmul.f32 %v1708_v40, %v1171_v44 }
 0x2eb   : > { %1290 = vst.msk [vmem:[%s1952_s8 + $0x8] sm:$0x3] %vm1285_vm5, %v1281_v43  ;;  %v1609_v47 = vpop.f32.mrf.mxu1 }
 0x2ec   : > { %v1282_v49 = vpack.c.bf16 %v1274_v46, %v1274_v46  ;;  %v1604_v50 = vpop.f32.mrf.mxu0 }
 0x2ed   : > { %v1174_v51 = vpop.f32.mrf.mxu1 }
 0x2ee   : > { %1291 = vst.msk [vmem:[%s1952_s8 + $0xa] sm:$0x3] %vm1285_vm5, %v1282_v49  ;;  %v1217_v52 = vpop.f32.mrf.mxu0 }
 0x2ef   : > { %v1275_v54 = vmul.f32 %v1710_v48, %v1217_v52  ;;  %v1610_v55 = vpop.f32.mrf.mxu1 }
 0x2f0   : > { %v1615_v56 = vpop.f32.mrf.mxu0 }
 0x2f1   : > { %v1283_v57 = vpack.c.bf16 %v1275_v54, %v1275_v54  ;;  %v1263_v58 = vpop.f32.mrf.mxu1 }
 0x2f2   : > { %v1220_v59 = vpop.f32.mrf.mxu0  ;;  %v1276_v60 = vmul.f32 %v1712_v53, %v1263_v58 }
 0x2f3   : > { %1292 = vst.msk [vmem:[%s1952_s8 + $0xc] sm:$0x3] %vm1285_vm5, %v1283_v57  ;;  %v1621_v61 = vpop.f32.mrf.mxu1 }
 0x2f4   : > { %v1284_v62 = vpack.c.bf16 %v1276_v60, %v1276_v60  ;;  %v1616_v63 = vpop.f32.mrf.mxu0 }
 0x2f5   : > { %v1266_v1 = vpop.f32.mrf.mxu1 }
 0x2f6   : > { %1293 = vst.msk [vmem:[%s1952_s8 + $0xe] sm:$0x3] %vm1285_vm5, %v1284_v62 }
 0x2f7   : > { %v1622_v2 = vpop.f32.mrf.mxu1 }
 0x2f8 PF: > { %s14_s17 = sadd.s32 1, %s1735_s17   ;;  %s1984_s15 = smov %s1731_s16 }
 0x2f9   : > { %p11_p5 = scmp.ge.s32.totalorder %s14_s17, 6   ;;  %s1985_s16 = smov %s1987_s18 }
 0x2fb   :  { %13 = sbr.rel (!%p11_p5) target bundleno = 2 (0x2), region = 75 }

// kernel: msapairstr2msa_forward.21
= control target key start
LH: loop header
LB: loop body
LE: loop exit
PB: predicated region body
PF: predicated region fallthrough
CT: control target
= control target key end

     0   :  { %vm32_vm0 = vcmask 261120   ;;  %s578_s0 = inlined_call_operand.vmem [shape: f32[32,32], index: 0, kind: input, shape index: {}]   ;;  %s579_s1 = inlined_call_operand.vmem [shape: f32[1,32], index: 1, kind: input, shape index: {}]   ;;  %s580_s2 = inlined_call_operand.vmem [shape: f32[1,32], index: 2, kind: input, shape index: {}]   ;;  %s581_s3 = inlined_call_operand.vmem [shape: bf16[32,128], index: 3, kind: input, shape index: {}]   ;;  %s582_s4 = inlined_call_operand.vmem [shape: f32[1,128], index: 4, kind: input, shape index: {}]   ;;  %s583_s5 = inlined_call_operand.vmem [shape: bf16[128,32], index: 5, kind: input, shape index: {}]   ;;  %s584_s6 = inlined_call_operand.vmem [shape: f32[1,32], index: 6, kind: input, shape index: {}]   ;;  %s585_s7 = inlined_call_operand.hbm [shape: f32[32,32], index: 7, kind: output, shape index: {}]  }
   0x1   :  { %v485_v0 = vld [vmem:[%s578_s0] sm:$0xff]  ;;  %v490_v1 = vld [vmem:[%s578_s0 + $0x10] sm:$0xff]  ;;  %v495_v2 = vld [vmem:[%s578_s0 + $0x8] sm:$0xff] }
   0x2   :  { %v33_v3 = vsel %vm32_vm0, %v485_v0, 0.0  ;;  %v39_v4 = vsel %vm32_vm0, %v490_v1, 0.0  ;;  %v504_v5 = vld [vmem:[%s578_s0 + $0x18] sm:$0xff]  ;;  %v36_v6 = vsel %vm32_vm0, %v495_v2, 0.0 }
   0x3   :  { %34 = vadd.xlane.f32.xlu0 %v33_v3  ;;  %40 = vadd.xlane.f32.xlu1 %v39_v4  ;;  %v42_v7 = vsel %vm32_vm0, %v504_v5, 0.0 }
   0x7   :  { %37 = vadd.xlane.f32.xlu0 %v36_v6  ;;  %43 = vadd.xlane.f32.xlu1 %v42_v7 }
   0x8   :  { %12 = vsyncpa [#allocation3], 0  ;;  %v399_v28 = vld [vmem:[%s581_s3 + $0x8] sm:$0xff]   ;;  %v400_v29 = vld [vmem:[%s581_s3] sm:$0xff]  }
   0x9   :  { %368 = vmatprep.subr.bf16.mxu0 %v399_v28  ;;  %v401_v30 = vld [vmem:[%s583_s5 + $0x38] sm:$0xff]   ;;  %v402_v31 = vld [vmem:[%s583_s5 + $0x30] sm:$0xff]   ;;  %v403_v32 = vld [vmem:[%s583_s5 + $0x28] sm:$0xff]  }
   0xa   :  { %369 = vmatpush3.bf16.msra.mxu0 %v399_v28  ;;  %376 = vmatprep.subr.bf16.mxu1 %v401_v30  ;;  %v404_v33 = vld [vmem:[%s583_s5 + $0x20] sm:$0xff]   ;;  %v405_v34 = vld [vmem:[%s583_s5 + $0x18] sm:$0xff]   ;;  %v406_v7 = vld [vmem:[%s583_s5 + $0x10] sm:$0xff]  }
   0xb   :  { %370 = vmatprep.subr.bf16.mxu0 %v400_v29  ;;  %377 = vmatpush3.bf16.msra.mxu1 %v401_v30  ;;  %v338_v49 = vld [vmem:[%s579_s1] ss:$0 sm:$0xff] }
   0xc   :  { %378 = vmatprep.subr.bf16.mxu1 %v402_v31  ;;  %v339_v54 = vld [vmem:[%s580_s2] ss:$0 sm:$0xff] }
   0xe   :  { %371 = vmatpush3.bf16.msra.mxu0 %v400_v29 }
   0xf   :  { %379 = vmatpush3.bf16.msra.mxu1 %v402_v31 }
  0x10   :  { %380 = vmatprep.subr.bf16.mxu1 %v403_v32 }
  0x13   :  { %381 = vmatpush3.bf16.msra.mxu1 %v403_v32 }
  0x14   :  { %382 = vmatprep.subr.bf16.mxu1 %v404_v33 }
  0x17   :  { %383 = vmatpush3.bf16.msra.mxu1 %v404_v33 }
  0x18   :  { %384 = vmatprep.subr.bf16.mxu1 %v405_v34 }
  0x1b   :  { %385 = vmatpush3.bf16.msra.mxu1 %v405_v34 }
  0x1c   :  { %386 = vmatprep.subr.bf16.mxu1 %v406_v7 }
  0x1f   :  { %387 = vmatpush3.bf16.msra.mxu1 %v406_v7 }
  0x8c   :  { %v35_v8 = vpop.xlane.xlu0 %34  ;;  %v41_v9 = vpop.xlane.xlu1 %40 }
  0x8d   :  { %v46_v10 = vmul.f32 0.03125, %v35_v8  ;;  %v48_v11 = vmul.f32 0.03125, %v41_v9  ;;  %v407_v8 = vld [vmem:[%s583_s5 + $0x8] sm:$0xff]   ;;  %v408_v9 = vld [vmem:[%s583_s5] sm:$0xff]  }
  0x8e   :  { %388 = vmatprep.subr.bf16.mxu1 %v407_v8 }
  0x8f   :  { %v50_v12 = vsub.f32 %v485_v0, %v46_v10  ;;  %v512_v13 = vsub.f32 %v490_v1, %v48_v11  ;;  %389 = vmatpush3.bf16.msra.mxu1 %v407_v8 }
  0x90   :  { %v38_v14 = vpop.xlane.xlu0 %37  ;;  %v44_v15 = vpop.xlane.xlu1 %43  ;;  %390 = vmatprep.subr.bf16.mxu1 %v408_v9 }
  0x91   :  { %v47_v16 = vmul.f32 0.03125, %v38_v14  ;;  %v49_v17 = vmul.f32 0.03125, %v44_v15  ;;  %v54_v18 = vmul.f32 %v50_v12, %v50_v12  ;;  %v56_v19 = vmul.f32 %v512_v13, %v512_v13 }
  0x93   :  { %v51_v20 = vsub.f32 %v495_v2, %v47_v16  ;;  %v53_v21 = vsub.f32 %v504_v5, %v49_v17  ;;  %v58_v22 = vsel %vm32_vm0, %v54_v18, 0.0  ;;  %v64_v23 = vsel %vm32_vm0, %v56_v19, 0.0  ;;  %391 = vmatpush3.bf16.msra.mxu1 %v408_v9 }
  0x94   :  { %59 = vadd.xlane.f32.xlu0 %v58_v22 }
  0x95   :  { %v55_v24 = vmul.f32 %v51_v20, %v51_v20  ;;  %v57_v25 = vmul.f32 %v53_v21, %v53_v21 }
  0x97   :  { %v61_v26 = vsel %vm32_vm0, %v55_v24, 0.0  ;;  %v67_v27 = vsel %vm32_vm0, %v57_v25, 0.0  ;;  %v345_v25 = vld [vmem:[%s584_s6] ss:$0 sm:$0xff] }
  0x98   :  { %65 = vadd.xlane.f32.xlu0 %v64_v23  ;;  %62 = vadd.xlane.f32.xlu1 %v61_v26 }
  0x9c   :  { %68 = vadd.xlane.f32.xlu1 %v67_v27 }
 0x11d   :  { %v60_v35 = vpop.xlane.xlu0 %59 }
 0x11e   :  { %v70_v36 = vmul.f32 0.03125, %v60_v35 }
 0x120   :  { %v74_v37 = vadd.f32 1e-05, %v70_v36 }
 0x121   :  { %v63_v38 = vpop.xlane.xlu1 %62  ;;  %v66_v39 = vpop.xlane.xlu0 %65 }
 0x122   :  { %409 = vrsqrt.f32 %v74_v37  ;;  %v71_v40 = vmul.f32 0.03125, %v63_v38  ;;  %v72_v41 = vmul.f32 0.03125, %v66_v39 }
 0x124   :  { %v75_v42 = vadd.f32 1e-05, %v71_v40  ;;  %v76_v43 = vadd.f32 1e-05, %v72_v41 }
 0x125   :  { %v69_v44 = vpop.xlane.xlu1 %68 }
 0x126   :  { %411 = vrsqrt.f32 %v75_v42  ;;  %v73_v45 = vmul.f32 0.03125, %v69_v44 }
 0x127   :  { %413 = vrsqrt.f32 %v76_v43 }
 0x128   :  { %v77_v46 = vadd.f32 1e-05, %v73_v45 }
 0x12a   :  { %415 = vrsqrt.f32 %v77_v46 }
 0x12f   :  { %v410_v47 = vpop.eup %409 }
 0x130   :  { %v82_v48 = vmul.f32 %v410_v47, %v50_v12  ;;  %v340_v12 = vld [vmem:[%s582_s4] ss:$0 sm:$0xff]  ;;  %s439_s4 = smov [#allocation2]  }
 0x131   :  { %s327_s0 = sshll.u32 %s439_s4, 4  ;;  %s328_s0 = int_to_ptr.vmem [resolvable:$true] %s327_s0 }
 0x132   :  { %v93_v53 = vmul.f32 %v338_v49, %v82_v48  ;;  %s417_s6 = scalar_lea.vmem %s328_s0, 512  ;;  %p422_p1 = scmp.lt.s32.totalorder %s328_s0, %s328_s0 }
 0x133   :  { %v412_v50 = vpop.eup %411  ;;  %p418_p0 = scmp.ne.s32.totalorder %s328_s0, %s417_s6  ;;  %p423_p2 = scmp.lt.s32.totalorder %s417_s6, %s417_s6 }
 0x134   :  { %v414_v51 = vpop.eup %413  ;;  %v83_v52 = vmul.f32 %v412_v50, %v51_v20  ;;  %v104_v58 = vadd.f32 %v339_v54, %v93_v53 }
 0x135   :  { %v84_v55 = vmul.f32 %v414_v51, %v512_v13  ;;  %p424_p3 = por %p423_p2, %p422_p1 }
 0x136   :  { %v94_v56 = vmul.f32 %v338_v49, %v83_v52 }
 0x137   :  { %v416_v57 = vpop.eup %415  ;;  %v95_v61 = vmul.f32 %v338_v49, %v84_v55  ;;  %p425_p4 = pnand %p424_p3, %p418_p0 }
 0x138   :  { %v105_v59 = vadd.f32 %v339_v54, %v94_v56  ;;  %v85_v60 = vmul.f32 %v416_v57, %v53_v21 }
 0x139   :  { %v106_v3 = vadd.f32 %v339_v54, %v95_v61 }
 0x13a   :  { %v108_v62 = vpack.c.bf16 %v105_v59, %v104_v58  ;;  %v96_v63 = vmul.f32 %v338_v49, %v85_v60 }
 0x13c   :  { %372 = vmatprep.mubr.msk.bf16.mxu0 %vm32_vm0, %v108_v62  ;;  %v107_v4 = vadd.f32 %v339_v54, %v96_v63 }
 0x13e   :  { %v109_v6 = vpack.c.bf16 %v107_v4, %v106_v3 }
 0x140   :  { %373 = vmatmul.mubr.msk.bf16.vlgmr.msra.gmra.mxu0 %vm32_vm0, %v109_v6 }
 0x200   :  { %v374_v10 = vpop.f32.mrf.mxu0 }
 0x201   :  { %v182_v16 = vadd.f32 %v374_v10, %v340_v12 }
 0x202   :  { %v173_v11 = vpop.f32.mrf.mxu0 }
 0x203   :  { %v174_v14 = vadd.f32 %v340_v12, %v173_v11  ;;  %v190_v22 = vmax.f32 %v182_v16, 0.0 }
 0x204   :  { %v375_v13 = vpop.f32.mrf.mxu0 }
 0x205   :  { %v185_v15 = vadd.f32 %v375_v13, %v340_v12  ;;  %v188_v20 = vmax.f32 %v174_v14, 0.0 }
 0x206   :  { %v176_v17 = vpop.f32.mrf.mxu0 }
 0x207   :  { %v177_v18 = vadd.f32 %v340_v12, %v176_v17  ;;  %v191_v19 = vmax.f32 %v185_v15, 0.0 }
 0x209   :  { %v189_v21 = vmax.f32 %v177_v18, 0.0  ;;  %v193_v24 = vpack.c.bf16 %v191_v19, %v190_v22 }
 0x20b   :  { %v192_v23 = vpack.c.bf16 %v189_v21, %v188_v20 }
 0x20d   :  { %392 = vmatprep.mubr.bf16.mxu1 %v192_v23 }
 0x20e   :  { %393 = vmatmul.mubr.bf16.vlgmr.msra.gmra.mxu1 %v193_v24 }
 0x2ce   :  { %v394_v26 = vpop.f32.mrf.mxu1 }
 0x2cf   :  { %v308_v27 = vadd.f32 %v394_v26, %v345_v25 }
 0x2d0   :  { %v299_v28 = vpop.f32.mrf.mxu1 }
 0x2d1   :  { %v316_v29 = vadd.f32 %v308_v27, %v490_v1  ;;  %v300_v30 = vadd.f32 %v345_v25, %v299_v28 }
 0x2d2   :  { %v395_v31 = vpop.f32.mrf.mxu1 }
 0x2d3   :  { %320 = vst.msk [vmem:[#allocation2 + $0x10] sm:$0xff] %vm32_vm0, %v316_v29  ;;  %v314_v32 = vadd.f32 %v300_v30, %v485_v0  ;;  %v311_v33 = vadd.f32 %v395_v31, %v345_v25 }
 0x2d4   :  { %v302_v34 = vpop.f32.mrf.mxu1 }
 0x2d5   :  { %318 = vst.msk [vmem:[#allocation2] sm:$0xff] %vm32_vm0, %v314_v32  ;;  %v317_v35 = vadd.f32 %v311_v33, %v504_v5  ;;  %v303_v36 = vadd.f32 %v345_v25, %v302_v34 }
 0x2d7   :  { %321 = vst.msk [vmem:[#allocation2 + $0x18] sm:$0xff] %vm32_vm0, %v317_v35  ;;  %v315_v37 = vadd.f32 %v303_v36, %v495_v2 }
 0x2d9   :  { %319 = vst.msk [vmem:[#allocation2 + $0x8] sm:$0xff] %vm32_vm0, %v315_v37 }
 0x2da   :  { %428 = shalt.err (!%p425_p4)
}
 0x2db   :  { %s440_s9 = smov 128   ;;  %s441_s10 = smov 8  }
 0x2dc   :  { %333 = dma.vmem_to_hbm [thread:$0]  %s328_s0, 512, %s585_s7, [#allocation3], %s440_s9, %s440_s9, %s441_s10  }
 0x2dd   :  { %437 = dma.done.wait [#allocation3], 512  }
 0x2de   :  { %438 = vsyncadd [#allocation3], 4294966784 }
 0x2df   :  { %337 = vsyncpa [#allocation3], 1 }

</bundles_post_ra>
